<compile_context>
chip_gen: v5e
topology: v5e:2x2
jax: 0.10.0
libtpu: 0.0.40
codegen_flags: <defaults>
</compile_context>

<pallas_src>
import jax
import jax.numpy as jnp
from jax.experimental import pallas as pl
from jax.experimental.pallas import tpu as pltpu

EPS = 1e-5


def _round_up(x, m):
    return (x + m - 1) // m * m


# ---------------------------------------------------------------------------
# Kernel: 4x (bf16 MXU matmul, f32 accumulate) + f32 bias; ReLU layers emit bf16,
# the logits layer emits f32.  All weights/biases are VMEM-resident across the grid.
# ---------------------------------------------------------------------------
def _head_kernel(x_ref,
                 w1_ref, b1_ref,
                 w2_ref, b2_ref,
                 w3_ref, b3_ref,
                 w4_ref, b4_ref,
                 o_ref):
    def layer(h_bf16, w_ref, b_ref, relu):
        out = jnp.dot(h_bf16, w_ref[...],
                      preferred_element_type=jnp.float32) + b_ref[...]
        if relu:
            # Emit bf16 directly: same value as casting right before the next matmul,
            # but halves activation store/load width and VMEM residency.
            return jnp.maximum(out, 0.0).astype(jnp.bfloat16)
        return out

    h = x_ref[...]                       # (TB, K_pad) bf16 (cast/padded in wrapper)
    h = layer(h, w1_ref, b1_ref, True)   # (TB, 1024)  bf16
    h = layer(h, w2_ref, b2_ref, True)   # (TB, 256)   bf16
    h = layer(h, w3_ref, b3_ref, True)   # (TB, 128)   bf16
    o_ref[...] = layer(h, w4_ref, b4_ref, False).astype(o_ref.dtype)  # (TB, C_pad) f32


# ---------------------------------------------------------------------------
# Host-side parameter prep: fold eval-mode BN into the preceding Linear.
#   scale = gamma / sqrt(var + eps);  W' = W * scale;  b' = (b - mean) * scale + beta
# Weights stored bf16 (MXU inputs); biases stay f32.
# ---------------------------------------------------------------------------
def _fold_bn(params):
    folded = {}
    for layer in (1, 2, 3):
        scale = params[f"g{layer}"] * jax.lax.rsqrt(params[f"v{layer}"] + EPS)  # (1, dout)
        w = params[f"w{layer}"] * scale
        b = (params[f"b{layer}"] - params[f"m{layer}"]) * scale + params[f"be{layer}"]
        folded[f"w{layer}"] = w.astype(jnp.bfloat16)
        folded[f"b{layer}"] = b.astype(jnp.float32)
    folded["w4"] = params["w4"].astype(jnp.bfloat16)
    folded["b4"] = params["b4"].astype(jnp.float32)
    return folded


# ---------------------------------------------------------------------------
# Generation-aware tiling / VMEM configuration.
# ---------------------------------------------------------------------------
def _tpu_config():
    """Returns (vmem_limit_bytes, mxu_m_align, tensorcores_per_chip)."""
    try:
        kind = jax.devices()[0].device_kind.lower()
    except Exception:
        kind = ""
    if "v7" in kind:
        # 64 MiB physical VMEM per TC, 2 TCs/chip, 2x256^2 MXU.
        return 48 << 20, 256, 2
    if "v6" in kind:
        # 128 MiB physical VMEM, 1 TC, 2x256^2 MXU: don't let a 32 MiB cap limit tiling.
        return 96 << 20, 256, 1
    if "v5" in kind:
        # 128 MiB physical VMEM but default scoped VMEM is only 16 MiB -> must override.
        # 4x128^2 MXU -> 128-aligned M tiles.
        return 64 << 20, 128, 1
    # Unknown chip: conservative.
    return 48 << 20, 128, 1


def _vmem_estimate(tb, k_pad, c_pad, single_buffer_resident=True):
    """Rough VMEM footprint (bytes) for a given batch tile."""
    x_tile = tb * k_pad * 2 * 2                      # bf16 x tile, double-buffered
    o_tile = tb * c_pad * 4 * 2                      # f32 out tile, double-buffered
    w_bytes = (k_pad * 1024 + 1024 * 256 + 256 * 128 + 128 * c_pad) * 2   # bf16 weights
    b_bytes = (1024 + 256 + 128 + c_pad) * 4                              # f32 biases
    if not single_buffer_resident:
        w_bytes *= 2
        b_bytes *= 2
    # Live intermediates: f32 matmul result + bf16 activation copy (conservative: all layers).
    inter = tb * (1024 + 256 + 128) * (4 + 2)
    return x_tile + o_tile + w_bytes + b_bytes + inter


def classification_head_forward(x, params, *, batch_tile=None):
    """x: (B, in_features) float. params: dict of f32 arrays (see init_params)."""
    B, in_features = x.shape
    num_classes = params["w4"].shape[1]

    folded = _fold_bn(params)

    # Lane-dense padding of the fc1 contraction dim and the tiny logits dim.
    K_pad = _round_up(in_features, 128)
    C_pad = _round_up(num_classes, 128)

    vmem_limit, mxu_m, num_tc = _tpu_config()

    if batch_tile is None:
        # MXU-M-aligned batch tile (falls back to 8-aligned when B is tiny).
        align = mxu_m if B >= mxu_m else 8
        tb = min(2048, _round_up(B, align))
        # v7x megacore: keep >= num_tc grid steps so the "parallel" axis shards across cores.
        if num_tc > 1 and B >= 2 * align:
            tb = min(tb, _round_up(-(-B // num_tc), align))
        # Shrink until the whole working set (tiles + resident weights + intermediates) fits.
        budget = vmem_limit - (4 << 20)  # headroom for compiler-internal scratch
        while tb > align and _vmem_estimate(tb, K_pad, C_pad) > budget:
            tb = max(align, _round_up(tb // 2, align))
        batch_tile = max(8, _round_up(tb, 8))
    TB = batch_tile
    B_pad = _round_up(B, TB)

    # Stream x as bf16 (the kernel feeds it straight to the MXU): half the DMA bytes.
    x_p = jnp.pad(x, ((0, B_pad - B), (0, K_pad - in_features))).astype(jnp.bfloat16)
    w1 = jnp.pad(folded["w1"], ((0, K_pad - in_features), (0, 0)))
    w4 = jnp.pad(folded["w4"], ((0, 0), (0, C_pad - num_classes)))
    b4 = jnp.pad(folded["b4"], ((0, 0), (0, C_pad - num_classes)))

    operands = (
        x_p,
        w1, folded["b1"],
        folded["w2"], folded["b2"],
        folded["w3"], folded["b3"],
        w4, b4,
    )

    grid = (B_pad // TB,)

    def make_call(single_buffer_resident):
        def resident(arr):
            # Weights/biases have a constant block index -> a single VMEM buffer is enough.
            if single_buffer_resident:
                return pl.BlockSpec(arr.shape, lambda i: (0, 0),
                                    pipeline_mode=pl.Buffered(1))
            return pl.BlockSpec(arr.shape, lambda i: (0, 0))

        in_specs = [pl.BlockSpec((TB, K_pad), lambda i: (i, 0))]
        in_specs += [resident(a) for a in operands[1:]]
        out_specs = pl.BlockSpec((TB, C_pad), lambda i: (i, 0))

        return pl.pallas_call(
            _head_kernel,
            out_shape=jax.ShapeDtypeStruct((B_pad, C_pad), jnp.float32),
            grid=grid,
            in_specs=in_specs,
            out_specs=out_specs,
            compiler_params=pltpu.CompilerParams(
                dimension_semantics=("parallel",),   # megacore sharding on v7x
                vmem_limit_bytes=vmem_limit,
            ),
        )

    try:
        out = make_call(single_buffer_resident=True)(*operands)
    except Exception:
        # Fallback if this jax version rejects pipeline_mode on pallas_call BlockSpecs:
        # identical semantics, just default double-buffering of the resident operands.
        out = make_call(single_buffer_resident=False)(*operands)

    # NOTE: padded batch rows (B_pad > B) hold bias+ReLU garbage and MUST be sliced off,
    # as must the padded logits columns.  Do not remove this slice.
    return out[:B, :num_classes]


# ---------------------------------------------------------------------------
# Deterministic synthetic parameters matching the PyTorch module's shapes.
# Linear weights are stored transposed: (in_dim, out_dim); bias / BN vectors are (1, N).
# ---------------------------------------------------------------------------
def init_params(key, in_features, num_classes):
    dims = [(in_features, 1024), (1024, 256), (256, 128), (128, num_classes)]
    params = {}
    keys = jax.random.split(key, 16)
    ki = 0
    for layer, (din, dout) in enumerate(dims, start=1):
        scale = 1.0 / jnp.sqrt(jnp.float32(din))
        params[f"w{layer}"] = jax.random.uniform(
            keys[ki], (din, dout), jnp.float32, -scale, scale); ki += 1
        params[f"b{layer}"] = jax.random.uniform(
            keys[ki], (1, dout), jnp.float32, -scale, scale); ki += 1
        if layer < 4:  # BatchNorm1d after fc1/fc2/fc3 only
            params[f"g{layer}"] = 1.0 + 0.1 * jax.random.normal(
                keys[ki], (1, dout), jnp.float32); ki += 1
            params[f"be{layer}"] = 0.1 * jax.random.normal(
                keys[ki], (1, dout), jnp.float32); ki += 1
            params[f"m{layer}"] = 0.05 * jnp.sin(
                jnp.arange(dout, dtype=jnp.float32)).reshape(1, dout)
            params[f"v{layer}"] = 1.0 + 0.1 * jnp.cos(
                jnp.arange(dout, dtype=jnp.float32)).reshape(1, dout)
    return params


# ---------------------------------------------------------------------------
# References
# ---------------------------------------------------------------------------
def reference_forward_f32(x, params):
    """Pure f32 eval-mode forward with explicit BN (semantic reference)."""
    h = x.astype(jnp.float32)
    for layer in (1, 2, 3):
        h = h @ params[f"w{layer}"] + params[f"b{layer}"]
        h = (h - params[f"m{layer}"]) * jax.lax.rsqrt(params[f"v{layer}"] + EPS) \
            * params[f"g{layer}"] + params[f"be{layer}"]
        h = jnp.maximum(h, 0.0)
    return h @ params["w4"] + params["b4"]


def reference_forward_matched(x, params):
    """Same folded-BN / bf16-matmul-with-f32-accumulate / bf16-activation path as the kernel."""
    f = _fold_bn(params)
    h = x.astype(jnp.bfloat16)
    for layer in (1, 2, 3):
        h = jnp.dot(h, f[f"w{layer}"], preferred_element_type=jnp.float32) + f[f"b{layer}"]
        h = jnp.maximum(h, 0.0).astype(jnp.bfloat16)
    return jnp.dot(h, f["w4"], preferred_element_type=jnp.float32) + f["b4"]


if __name__ == "__main__":
    key = jax.random.PRNGKey(0)
    k_params, k_x = jax.random.split(key)

    B, in_features, num_classes = 8, 32, 5
    params = init_params(k_params, in_features, num_classes)
    x = jax.random.normal(k_x, (B, in_features), jnp.float32)

    logits = classification_head_forward(x, params)
    logits = jax.block_until_ready(logits)
    assert logits.shape == (B, num_classes)

    # Tight check vs. a reference using the identical folded-bf16 math path.
    ref_matched = reference_forward_matched(x, params)
    assert jnp.allclose(logits, ref_matched, atol=1e-3, rtol=1e-3), \
        "mismatch vs bf16-matched reference"

    # Loose semantic check vs. the pure-f32 BN reference (bf16 MXU inputs perturb slightly).
    ref_f32 = reference_forward_f32(x, params)
    assert jnp.allclose(logits, ref_f32, atol=5e-2, rtol=5e-2), \
        "mismatch vs f32 eval-mode reference"

    print("KERNEL_OK")
</pallas_src>

<mosaic_0001>
module attributes {stable_mosaic.version = 11 : i64} {
  func.func @_head_kernel(%arg0: i32, %arg1: memref<8x128xbf16, #tpu.memory_space<vmem>>, %arg2: memref<128x1024xbf16, #tpu.memory_space<vmem>>, %arg3: memref<1x1024xf32, #tpu.memory_space<vmem>>, %arg4: memref<1024x256xbf16, #tpu.memory_space<vmem>>, %arg5: memref<1x256xf32, #tpu.memory_space<vmem>>, %arg6: memref<256x128xbf16, #tpu.memory_space<vmem>>, %arg7: memref<1x128xf32, #tpu.memory_space<vmem>>, %arg8: memref<128x128xbf16, #tpu.memory_space<vmem>>, %arg9: memref<1x128xf32, #tpu.memory_space<vmem>>, %arg10: memref<8x128xf32, #tpu.memory_space<vmem>>) attributes {dimension_semantics = [#tpu.dimension_semantics<parallel>], iteration_bounds = array<i64: 1>, scalar_prefetch = 0 : i64, scratch_operands = 0 : i64, tpu.core_type = #tpu.core_type<tc>, window_params = [{transform_indices = @transform_0, window_bounds = array<i64: 8, 128>}, {pipeline_mode = #tpu.pipeline_mode<synchronous>, transform_indices = @transform_1, window_bounds = array<i64: 128, 1024>}, {pipeline_mode = #tpu.pipeline_mode<synchronous>, transform_indices = @transform_2, window_bounds = array<i64: 1, 1024>}, {pipeline_mode = #tpu.pipeline_mode<synchronous>, transform_indices = @transform_3, window_bounds = array<i64: 1024, 256>}, {pipeline_mode = #tpu.pipeline_mode<synchronous>, transform_indices = @transform_4, window_bounds = array<i64: 1, 256>}, {pipeline_mode = #tpu.pipeline_mode<synchronous>, transform_indices = @transform_5, window_bounds = array<i64: 256, 128>}, {pipeline_mode = #tpu.pipeline_mode<synchronous>, transform_indices = @transform_6, window_bounds = array<i64: 1, 128>}, {pipeline_mode = #tpu.pipeline_mode<synchronous>, transform_indices = @transform_7, window_bounds = array<i64: 128, 128>}, {pipeline_mode = #tpu.pipeline_mode<synchronous>, transform_indices = @transform_8, window_bounds = array<i64: 1, 128>}, {transform_indices = @transform_9, window_bounds = array<i64: 8, 128>}]} {
    %c0 = arith.constant 0 : index
    %c0_0 = arith.constant 0 : index
    %0 = vector.load %arg1[%c0, %c0_0] : memref<8x128xbf16, #tpu.memory_space<vmem>>, vector<8x128xbf16>
    %c0_1 = arith.constant 0 : index
    %c0_2 = arith.constant 0 : index
    %1 = vector.load %arg2[%c0_1, %c0_2] : memref<128x1024xbf16, #tpu.memory_space<vmem>>, vector<128x1024xbf16>
    %cst = arith.constant dense<0.000000e+00> : vector<8x1024xf32>
    %2 = tpu.matmul %0, %1, %cst {dimension_numbers = #tpu.dot_dimension_numbers<[1], [0], [0], [1], [0, 0, 1, 1], [], []>} : vector<8x128xbf16>, vector<128x1024xbf16>, vector<8x1024xf32> -> vector<8x1024xf32>
    %c0_3 = arith.constant 0 : index
    %c0_4 = arith.constant 0 : index
    %3 = vector.load %arg3[%c0_3, %c0_4] : memref<1x1024xf32, #tpu.memory_space<vmem>>, vector<1x1024xf32>
    %4 = vector.broadcast %3 : vector<1x1024xf32> to vector<8x1024xf32>
    %5 = arith.addf %2, %4 : vector<8x1024xf32>
    %cst_5 = arith.constant 0.000000e+00 : f32
    %6 = vector.broadcast %cst_5 : f32 to vector<8x1024xf32>
    %7 = arith.maximumf %5, %6 : vector<8x1024xf32>
    %8 = arith.truncf %7 : vector<8x1024xf32> to vector<8x1024xbf16>
    %c0_6 = arith.constant 0 : index
    %c0_7 = arith.constant 0 : index
    %9 = vector.load %arg4[%c0_6, %c0_7] : memref<1024x256xbf16, #tpu.memory_space<vmem>>, vector<1024x256xbf16>
    %cst_8 = arith.constant dense<0.000000e+00> : vector<8x256xf32>
    %10 = tpu.matmul %8, %9, %cst_8 {dimension_numbers = #tpu.dot_dimension_numbers<[1], [0], [0], [1], [0, 0, 1, 1], [], []>} : vector<8x1024xbf16>, vector<1024x256xbf16>, vector<8x256xf32> -> vector<8x256xf32>
    %c0_9 = arith.constant 0 : index
    %c0_10 = arith.constant 0 : index
    %11 = vector.load %arg5[%c0_9, %c0_10] : memref<1x256xf32, #tpu.memory_space<vmem>>, vector<1x256xf32>
    %12 = vector.broadcast %11 : vector<1x256xf32> to vector<8x256xf32>
    %13 = arith.addf %10, %12 : vector<8x256xf32>
    %cst_11 = arith.constant 0.000000e+00 : f32
    %14 = vector.broadcast %cst_11 : f32 to vector<8x256xf32>
    %15 = arith.maximumf %13, %14 : vector<8x256xf32>
    %16 = arith.truncf %15 : vector<8x256xf32> to vector<8x256xbf16>
    %c0_12 = arith.constant 0 : index
    %c0_13 = arith.constant 0 : index
    %17 = vector.load %arg6[%c0_12, %c0_13] : memref<256x128xbf16, #tpu.memory_space<vmem>>, vector<256x128xbf16>
    %cst_14 = arith.constant dense<0.000000e+00> : vector<8x128xf32>
    %18 = tpu.matmul %16, %17, %cst_14 {dimension_numbers = #tpu.dot_dimension_numbers<[1], [0], [0], [1], [0, 0, 1, 1], [], []>} : vector<8x256xbf16>, vector<256x128xbf16>, vector<8x128xf32> -> vector<8x128xf32>
    %c0_15 = arith.constant 0 : index
    %c0_16 = arith.constant 0 : index
    %19 = vector.load %arg7[%c0_15, %c0_16] : memref<1x128xf32, #tpu.memory_space<vmem>>, vector<1x128xf32>
    %20 = vector.broadcast %19 : vector<1x128xf32> to vector<8x128xf32>
    %21 = arith.addf %18, %20 : vector<8x128xf32>
    %cst_17 = arith.constant 0.000000e+00 : f32
    %22 = vector.broadcast %cst_17 : f32 to vector<8x128xf32>
    %23 = arith.maximumf %21, %22 : vector<8x128xf32>
    %24 = arith.truncf %23 : vector<8x128xf32> to vector<8x128xbf16>
    %c0_18 = arith.constant 0 : index
    %c0_19 = arith.constant 0 : index
    %25 = vector.load %arg8[%c0_18, %c0_19] : memref<128x128xbf16, #tpu.memory_space<vmem>>, vector<128x128xbf16>
    %cst_20 = arith.constant dense<0.000000e+00> : vector<8x128xf32>
    %26 = tpu.matmul %24, %25, %cst_20 {dimension_numbers = #tpu.dot_dimension_numbers<[1], [0], [0], [1], [0, 0, 1, 1], [], []>} : vector<8x128xbf16>, vector<128x128xbf16>, vector<8x128xf32> -> vector<8x128xf32>
    %c0_21 = arith.constant 0 : index
    %c0_22 = arith.constant 0 : index
    %27 = vector.load %arg9[%c0_21, %c0_22] : memref<1x128xf32, #tpu.memory_space<vmem>>, vector<1x128xf32>
    %28 = vector.broadcast %27 : vector<1x128xf32> to vector<8x128xf32>
    %29 = arith.addf %26, %28 : vector<8x128xf32>
    %c0_23 = arith.constant 0 : index
    %c0_24 = arith.constant 0 : index
    %30 = vector.load %arg10[%c0_23, %c0_24] : memref<8x128xf32, #tpu.memory_space<vmem>>, vector<8x128xf32>
    tpu.vector_store %arg10[%c0_23, %c0_24], %29 {strides = array<i32>} : memref<8x128xf32, #tpu.memory_space<vmem>>, vector<8x128xf32>,
    return
  }
  func.func @transform_0(%arg0: i32) -> (i32, i32) {
    %c0_i32 = arith.constant 0 : i32
    %c0_i32_0 = arith.constant 0 : i32
    return %arg0, %c0_i32 : i32, i32
  }
  func.func @transform_1(%arg0: i32) -> (i32, i32) {
    %c0_i32 = arith.constant 0 : i32
    %c0_i32_0 = arith.constant 0 : i32
    %c0_i32_1 = arith.constant 0 : i32
    return %c0_i32, %c0_i32_0 : i32, i32
  }
  func.func @transform_2(%arg0: i32) -> (i32, i32) {
    %c0_i32 = arith.constant 0 : i32
    %c0_i32_0 = arith.constant 0 : i32
    %c0_i32_1 = arith.constant 0 : i32
    return %c0_i32, %c0_i32_0 : i32, i32
  }
  func.func @transform_3(%arg0: i32) -> (i32, i32) {
    %c0_i32 = arith.constant 0 : i32
    %c0_i32_0 = arith.constant 0 : i32
    %c0_i32_1 = arith.constant 0 : i32
    return %c0_i32, %c0_i32_0 : i32, i32
  }
  func.func @transform_4(%arg0: i32) -> (i32, i32) {
    %c0_i32 = arith.constant 0 : i32
    %c0_i32_0 = arith.constant 0 : i32
    %c0_i32_1 = arith.constant 0 : i32
    return %c0_i32, %c0_i32_0 : i32, i32
  }
  func.func @transform_5(%arg0: i32) -> (i32, i32) {
    %c0_i32 = arith.constant 0 : i32
    %c0_i32_0 = arith.constant 0 : i32
    %c0_i32_1 = arith.constant 0 : i32
    return %c0_i32, %c0_i32_0 : i32, i32
  }
  func.func @transform_6(%arg0: i32) -> (i32, i32) {
    %c0_i32 = arith.constant 0 : i32
    %c0_i32_0 = arith.constant 0 : i32
    %c0_i32_1 = arith.constant 0 : i32
    return %c0_i32, %c0_i32_0 : i32, i32
  }
  func.func @transform_7(%arg0: i32) -> (i32, i32) {
    %c0_i32 = arith.constant 0 : i32
    %c0_i32_0 = arith.constant 0 : i32
    %c0_i32_1 = arith.constant 0 : i32
    return %c0_i32, %c0_i32_0 : i32, i32
  }
  func.func @transform_8(%arg0: i32) -> (i32, i32) {
    %c0_i32 = arith.constant 0 : i32
    %c0_i32_0 = arith.constant 0 : i32
    %c0_i32_1 = arith.constant 0 : i32
    return %c0_i32, %c0_i32_0 : i32, i32
  }
  func.func @transform_9(%arg0: i32) -> (i32, i32) {
    %c0_i32 = arith.constant 0 : i32
    %c0_i32_0 = arith.constant 0 : i32
    return %arg0, %c0_i32 : i32, i32
  }
}

module attributes {stable_mosaic.version = 11 : i64} {
  func.func @_head_kernel(%arg0: i32, %arg1: memref<8x128xbf16, #tpu.memory_space<vmem>>, %arg2: memref<128x1024xbf16, #tpu.memory_space<vmem>>, %arg3: memref<1x1024xf32, #tpu.memory_space<vmem>>, %arg4: memref<1024x256xbf16, #tpu.memory_space<vmem>>, %arg5: memref<1x256xf32, #tpu.memory_space<vmem>>, %arg6: memref<256x128xbf16, #tpu.memory_space<vmem>>, %arg7: memref<1x128xf32, #tpu.memory_space<vmem>>, %arg8: memref<128x128xbf16, #tpu.memory_space<vmem>>, %arg9: memref<1x128xf32, #tpu.memory_space<vmem>>, %arg10: memref<8x128xf32, #tpu.memory_space<vmem>>) attributes {dimension_semantics = [#tpu.dimension_semantics<parallel>], iteration_bounds = array<i64: 1>, scalar_prefetch = 0 : i64, scratch_operands = 0 : i64, tpu.core_type = #tpu.core_type<tc>, window_params = [{transform_indices = @transform_0, window_bounds = array<i64: 8, 128>}, {pipeline_mode = #tpu.pipeline_mode<synchronous>, transform_indices = @transform_1, window_bounds = array<i64: 128, 1024>}, {pipeline_mode = #tpu.pipeline_mode<synchronous>, transform_indices = @transform_2, window_bounds = array<i64: 1, 1024>}, {pipeline_mode = #tpu.pipeline_mode<synchronous>, transform_indices = @transform_3, window_bounds = array<i64: 1024, 256>}, {pipeline_mode = #tpu.pipeline_mode<synchronous>, transform_indices = @transform_4, window_bounds = array<i64: 1, 256>}, {pipeline_mode = #tpu.pipeline_mode<synchronous>, transform_indices = @transform_5, window_bounds = array<i64: 256, 128>}, {pipeline_mode = #tpu.pipeline_mode<synchronous>, transform_indices = @transform_6, window_bounds = array<i64: 1, 128>}, {pipeline_mode = #tpu.pipeline_mode<synchronous>, transform_indices = @transform_7, window_bounds = array<i64: 128, 128>}, {pipeline_mode = #tpu.pipeline_mode<synchronous>, transform_indices = @transform_8, window_bounds = array<i64: 1, 128>}, {transform_indices = @transform_9, window_bounds = array<i64: 8, 128>}]} {
    %c0 = arith.constant 0 : index
    %c0_0 = arith.constant 0 : index
    %0 = vector.load %arg1[%c0, %c0_0] : memref<8x128xbf16, #tpu.memory_space<vmem>>, vector<8x128xbf16>
    %c0_1 = arith.constant 0 : index
    %c0_2 = arith.constant 0 : index
    %1 = vector.load %arg2[%c0_1, %c0_2] : memref<128x1024xbf16, #tpu.memory_space<vmem>>, vector<128x1024xbf16>
    %cst = arith.constant dense<0.000000e+00> : vector<8x1024xf32>
    %2 = tpu.matmul %0, %1, %cst {dimension_numbers = #tpu.dot_dimension_numbers<[1], [0], [0], [1], [0, 0, 1, 1], [], []>} : vector<8x128xbf16>, vector<128x1024xbf16>, vector<8x1024xf32> -> vector<8x1024xf32>
    %c0_3 = arith.constant 0 : index
    %c0_4 = arith.constant 0 : index
    %3 = vector.load %arg3[%c0_3, %c0_4] : memref<1x1024xf32, #tpu.memory_space<vmem>>, vector<1x1024xf32>
    %4 = vector.broadcast %3 : vector<1x1024xf32> to vector<8x1024xf32>
    %5 = arith.addf %2, %4 : vector<8x1024xf32>
    %cst_5 = arith.constant 0.000000e+00 : f32
    %6 = vector.broadcast %cst_5 : f32 to vector<8x1024xf32>
    %7 = arith.maximumf %5, %6 : vector<8x1024xf32>
    %8 = arith.truncf %7 : vector<8x1024xf32> to vector<8x1024xbf16>
    %c0_6 = arith.constant 0 : index
    %c0_7 = arith.constant 0 : index
    %9 = vector.load %arg4[%c0_6, %c0_7] : memref<1024x256xbf16, #tpu.memory_space<vmem>>, vector<1024x256xbf16>
    %cst_8 = arith.constant dense<0.000000e+00> : vector<8x256xf32>
    %10 = tpu.matmul %8, %9, %cst_8 {dimension_numbers = #tpu.dot_dimension_numbers<[1], [0], [0], [1], [0, 0, 1, 1], [], []>} : vector<8x1024xbf16>, vector<1024x256xbf16>, vector<8x256xf32> -> vector<8x256xf32>
    %c0_9 = arith.constant 0 : index
    %c0_10 = arith.constant 0 : index
    %11 = vector.load %arg5[%c0_9, %c0_10] : memref<1x256xf32, #tpu.memory_space<vmem>>, vector<1x256xf32>
    %12 = vector.broadcast %11 : vector<1x256xf32> to vector<8x256xf32>
    %13 = arith.addf %10, %12 : vector<8x256xf32>
    %cst_11 = arith.constant 0.000000e+00 : f32
    %14 = vector.broadcast %cst_11 : f32 to vector<8x256xf32>
    %15 = arith.maximumf %13, %14 : vector<8x256xf32>
    %16 = arith.truncf %15 : vector<8x256xf32> to vector<8x256xbf16>
    %c0_12 = arith.constant 0 : index
    %c0_13 = arith.constant 0 : index
    %17 = vector.load %arg6[%c0_12, %c0_13] : memref<256x128xbf16, #tpu.memory_space<vmem>>, vector<256x128xbf16>
    %cst_14 = arith.constant dense<0.000000e+00> : vector<8x128xf32>
    %18 = tpu.matmul %16, %17, %cst_14 {dimension_numbers = #tpu.dot_dimension_numbers<[1], [0], [0], [1], [0, 0, 1, 1], [], []>} : vector<8x256xbf16>, vector<256x128xbf16>, vector<8x128xf32> -> vector<8x128xf32>
    %c0_15 = arith.constant 0 : index
    %c0_16 = arith.constant 0 : index
    %19 = vector.load %arg7[%c0_15, %c0_16] : memref<1x128xf32, #tpu.memory_space<vmem>>, vector<1x128xf32>
    %20 = vector.broadcast %19 : vector<1x128xf32> to vector<8x128xf32>
    %21 = arith.addf %18, %20 : vector<8x128xf32>
    %cst_17 = arith.constant 0.000000e+00 : f32
    %22 = vector.broadcast %cst_17 : f32 to vector<8x128xf32>
    %23 = arith.maximumf %21, %22 : vector<8x128xf32>
    %24 = arith.truncf %23 : vector<8x128xf32> to vector<8x128xbf16>
    %c0_18 = arith.constant 0 : index
    %c0_19 = arith.constant 0 : index
    %25 = vector.load %arg8[%c0_18, %c0_19] : memref<128x128xbf16, #tpu.memory_space<vmem>>, vector<128x128xbf16>
    %cst_20 = arith.constant dense<0.000000e+00> : vector<8x128xf32>
    %26 = tpu.matmul %24, %25, %cst_20 {dimension_numbers = #tpu.dot_dimension_numbers<[1], [0], [0], [1], [0, 0, 1, 1], [], []>} : vector<8x128xbf16>, vector<128x128xbf16>, vector<8x128xf32> -> vector<8x128xf32>
    %c0_21 = arith.constant 0 : index
    %c0_22 = arith.constant 0 : index
    %27 = vector.load %arg9[%c0_21, %c0_22] : memref<1x128xf32, #tpu.memory_space<vmem>>, vector<1x128xf32>
    %28 = vector.broadcast %27 : vector<1x128xf32> to vector<8x128xf32>
    %29 = arith.addf %26, %28 : vector<8x128xf32>
    %c0_23 = arith.constant 0 : index
    %c0_24 = arith.constant 0 : index
    %30 = vector.load %arg10[%c0_23, %c0_24] : memref<8x128xf32, #tpu.memory_space<vmem>>, vector<8x128xf32>
    tpu.vector_store %arg10[%c0_23, %c0_24], %29 {strides = array<i32>} : memref<8x128xf32, #tpu.memory_space<vmem>>, vector<8x128xf32>,
    return
  }
  func.func @transform_0(%arg0: i32) -> (i32, i32) {
    %c0_i32 = arith.constant 0 : i32
    %c0_i32_0 = arith.constant 0 : i32
    return %arg0, %c0_i32 : i32, i32
  }
  func.func @transform_1(%arg0: i32) -> (i32, i32) {
    %c0_i32 = arith.constant 0 : i32
    %c0_i32_0 = arith.constant 0 : i32
    %c0_i32_1 = arith.constant 0 : i32
    return %c0_i32, %c0_i32_0 : i32, i32
  }
  func.func @transform_2(%arg0: i32) -> (i32, i32) {
    %c0_i32 = arith.constant 0 : i32
    %c0_i32_0 = arith.constant 0 : i32
    %c0_i32_1 = arith.constant 0 : i32
    return %c0_i32, %c0_i32_0 : i32, i32
  }
  func.func @transform_3(%arg0: i32) -> (i32, i32) {
    %c0_i32 = arith.constant 0 : i32
    %c0_i32_0 = arith.constant 0 : i32
    %c0_i32_1 = arith.constant 0 : i32
    return %c0_i32, %c0_i32_0 : i32, i32
  }
  func.func @transform_4(%arg0: i32) -> (i32, i32) {
    %c0_i32 = arith.constant 0 : i32
    %c0_i32_0 = arith.constant 0 : i32
    %c0_i32_1 = arith.constant 0 : i32
    return %c0_i32, %c0_i32_0 : i32, i32
  }
  func.func @transform_5(%arg0: i32) -> (i32, i32) {
    %c0_i32 = arith.constant 0 : i32
    %c0_i32_0 = arith.constant 0 : i32
    %c0_i32_1 = arith.constant 0 : i32
    return %c0_i32, %c0_i32_0 : i32, i32
  }
  func.func @transform_6(%arg0: i32) -> (i32, i32) {
    %c0_i32 = arith.constant 0 : i32
    %c0_i32_0 = arith.constant 0 : i32
    %c0_i32_1 = arith.constant 0 : i32
    return %c0_i32, %c0_i32_0 : i32, i32
  }
  func.func @transform_7(%arg0: i32) -> (i32, i32) {
    %c0_i32 = arith.constant 0 : i32
    %c0_i32_0 = arith.constant 0 : i32
    %c0_i32_1 = arith.constant 0 : i32
    return %c0_i32, %c0_i32_0 : i32, i32
  }
  func.func @transform_8(%arg0: i32) -> (i32, i32) {
    %c0_i32 = arith.constant 0 : i32
    %c0_i32_0 = arith.constant 0 : i32
    %c0_i32_1 = arith.constant 0 : i32
    return %c0_i32, %c0_i32_0 : i32, i32
  }
  func.func @transform_9(%arg0: i32) -> (i32, i32) {
    %c0_i32 = arith.constant 0 : i32
    %c0_i32_0 = arith.constant 0 : i32
    return %arg0, %c0_i32 : i32, i32
  }
}

</mosaic_0001>

<bundles_post_ra>
// kernel: tpu_custom_call.1
= control target key start
LH: loop header
LB: loop body
LE: loop exit
PB: predicated region body
PF: predicated region fallthrough
CT: control target
= control target key end

     0   :  { %14 = vsyncpa [#allocation3], 0  ;;  %s3312_s0 = inlined_call_operand.hbm [shape: bf16[8,128], index: 0, kind: input, shape index: {}]   ;;  %s3313_s1 = inlined_call_operand.hbm [shape: bf16[128,1024], index: 1, kind: input, shape index: {}]   ;;  %s3314_s2 = inlined_call_operand.hbm [shape: f32[1,1024], index: 2, kind: input, shape index: {}]   ;;  %s3315_s3 = inlined_call_operand.hbm [shape: bf16[1024,256], index: 3, kind: input, shape index: {}]   ;;  %s3316_s4 = inlined_call_operand.vmem [shape: f32[1,256], index: 4, kind: input, shape index: {}]   ;;  %s3317_s5 = inlined_call_operand.hbm [shape: bf16[256,128], index: 5, kind: input, shape index: {}]   ;;  %s3318_s6 = inlined_call_operand.vmem [shape: f32[1,128], index: 6, kind: input, shape index: {}]   ;;  %s3319_s7 = inlined_call_operand.hbm [shape: bf16[128,128], index: 7, kind: input, shape index: {}]   ;;  %s3320_s8 = inlined_call_operand.vmem [shape: f32[1,128], index: 8, kind: input, shape index: {}]   ;;  %s3321_s9 = inlined_call_operand.hbm [shape: f32[8,128], index: 9, kind: output, shape index: {}]  }
   0x1   :  { %15 = vsyncpa [#allocation6], 0 }
   0x2   :  { %16 = vsyncpa [#allocation9], 0 }
   0x3   :  { %17 = vsyncpa [#allocation12], 0  ;;  %s34_s11 = sshll.u32 %s3313_s1, 4  ;;  %s35_s11 = int_to_ptr.hbm [resolvable:$true] %s34_s11 }
   0x4   :  { %18 = vsyncpa [#allocation4], 0  ;;  %s3167_s12 = smov [#allocation5]   ;;  %s58_s16 = sshll.u32 %s3315_s3, 4  ;;  %s59_s16 = int_to_ptr.hbm [resolvable:$true] %s58_s16 }
   0x5   :  { %s36_s13 = sshll.u32 %s3167_s12, 4  ;;  %s3168_s17 = smov 512   ;;  %s37_s13 = int_to_ptr.vmem [resolvable:$true] %s36_s13 }
   0x6   :  { %s3169_s18 = smov 32   ;;  %s3170_s19 = smov [#allocation8]  }
   0x7   :  { %42 = dma.hbm_to_vmem [thread:$0]  %s35_s11, 8192, %s37_s13, [#allocation6], %s3168_s17, %s3168_s17, %s3169_s18  }
   0x8   :  { %s60_s20 = sshll.u32 %s3170_s19, 4  ;;  %s3171_s21 = smov 128   ;;  %s61_s20 = int_to_ptr.vmem [resolvable:$true] %s60_s20 }
   0x9   :  { %s3172_s22 = smov 8   ;;  %s24_s24 = sshll.u32 %s3312_s0, 4  ;;  %s25_s24 = int_to_ptr.hbm [resolvable:$true] %s24_s24 }
   0xa   :  { %66 = dma.hbm_to_vmem [thread:$0]  %s59_s16, 16384, %s61_s20, [#allocation9], %s3171_s21, %s3171_s21, %s3172_s22  }
   0xb   :  { %s3173_s25 = smov [#allocation2]   ;;  %s48_s28 = sshll.u32 %s3314_s2, 4  ;;  %s49_s28 = int_to_ptr.hbm [resolvable:$true] %s48_s28 }
   0xc   :  { %s26_s26 = sshll.u32 %s3173_s25, 4  ;;  %s3174_s29 = smov [#allocation7]   ;;  %s27_s26 = int_to_ptr.vmem [resolvable:$true] %s26_s26 }
   0xd   :  { %29 = dma.hbm_to_vmem [thread:$0]  %s25_s24, 64, %s27_s26, [#allocation3]  }
   0xe   :  { %s50_s30 = sshll.u32 %s3174_s29, 4  ;;  %s73_s12 = sshll.u32 %s3317_s5, 4  ;;  %s51_s30 = int_to_ptr.vmem [resolvable:$true] %s50_s30  ;;  %s74_s12 = int_to_ptr.hbm [resolvable:$true] %s73_s12 }
   0xf   :  { %53 = dma.hbm_to_vmem [thread:$0]  %s49_s28, 128, %s51_s30, [#allocation6]  }
  0x10   :  { %s3175_s0 = smov [#allocation10]   ;;  %s88_s16 = sshll.u32 %s3319_s7, 4  ;;  %s89_s16 = int_to_ptr.hbm [resolvable:$true] %s88_s16 }
  0x11   :  { %s75_s13 = sshll.u32 %s3175_s0, 4  ;;  %s3176_s17 = smov 64   ;;  %s76_s13 = int_to_ptr.vmem [resolvable:$true] %s75_s13 }
  0x12   :  { %s3177_s2 = smov 4   ;;  %s3178_s18 = smov [#allocation11]  }
  0x13   :  { %81 = dma.hbm_to_vmem [thread:$0]  %s74_s12, 2048, %s76_s13, [#allocation9], %s3176_s17, %s3176_s17, %s3177_s2  }
  0x14   :  { %s90_s19 = sshll.u32 %s3178_s18, 4  ;;  %s91_s19 = int_to_ptr.vmem [resolvable:$true] %s90_s19 }
  0x15   :  { %96 = dma.hbm_to_vmem [thread:$0]  %s89_s16, 1024, %s91_s19, [#allocation12], %s3176_s17, %s3176_s17, %s3177_s2  }
  0x16   :  { %3157 = dma.done.wait [#allocation3], 64  }
  0x17   :  { %3158 = vsyncadd [#allocation3], 4294967232 }
  0x18   :  { %3159 = dma.done.wait [#allocation6], 8320  }
  0x19   :  { %3160 = vsyncadd [#allocation6], 4294958976 }
  0x1a   :  { %3161 = dma.done.wait [#allocation9], 18432  }
  0x1b   :  { %3162 = vsyncadd [#allocation9], 4294948864 }
  0x1c   :  { %3163 = dma.done.wait [#allocation12], 1024  }
  0x1d   :  { %3164 = vsyncadd [#allocation12], 4294966272  ;;  %v2120_v0 = vld [vmem:[#allocation5 + $0x1c0] sm:$0xf]  ;;  %v2814_v2 = vld [vmem:[#allocation5 + $0x1c4] sm:$0xf] }
  0x1e   :  { %v2818_v1 = vld [vmem:[#allocation5 + $0x1dc] sm:$0xf0]  ;;  %v2122_v4 = vld [vmem:[#allocation5 + $0x1e0] sm:$0xf0]  ;;  %v2128_v5 = vld [vmem:[#allocation5 + $0x1c8] sm:$0xf] }
  0x1f   :  { %v2121_v3 = vor.u32 %v2818_v1, %v2120_v0  ;;  %v2819_v6 = vld [vmem:[#allocation5 + $0x1e4] sm:$0xf0]  ;;  %v2125_v7 = vor.u32 %v2814_v2, %v2122_v4  ;;  %v2815_v9 = vld [vmem:[#allocation5 + $0x1cc] sm:$0xf]  ;;  %v2088_v11 = vld [vmem:[#allocation5 + $0x180] sm:$0xf] }
  0x20   :  { %v2129_v8 = vor.u32 %v2819_v6, %v2128_v5  ;;  %v2130_v10 = vld [vmem:[#allocation5 + $0x1e8] sm:$0xf0]  ;;  %v2810_v13 = vld [vmem:[#allocation5 + $0x19c] sm:$0xf0]  ;;  %v2806_v14 = vld [vmem:[#allocation5 + $0x184] sm:$0xf] }
  0x21   :  { %526 = vmatpush.bf16.msra.mxu0 %v2121_v3  ;;  %v2133_v12 = vor.u32 %v2815_v9, %v2130_v10  ;;  %v2090_v15 = vld [vmem:[#allocation5 + $0x1a0] sm:$0xf0]  ;;  %539 = vmatpush.bf16.msra.mxu1 %v2125_v7  ;;  %v2089_v16 = vor.u32 %v2810_v13, %v2088_v11  ;;  %v2096_v18 = vld [vmem:[#allocation5 + $0x188] sm:$0xf]  ;;  %v2807_v20 = vld [vmem:[#allocation5 + $0x18c] sm:$0xf] }
  0x22   :  { %552 = vmatpush.bf16.msra.mxu2 %v2129_v8  ;;  %v2093_v17 = vor.u32 %v2806_v14, %v2090_v15  ;;  %v2811_v19 = vld [vmem:[#allocation5 + $0x1a4] sm:$0xf0]  ;;  %v2098_v22 = vld [vmem:[#allocation5 + $0x1a8] sm:$0xf0]  ;;  %v2056_v23 = vld [vmem:[#allocation5 + $0x140] sm:$0xf] }
  0x23   :  { %565 = vmatpush.bf16.msra.mxu3 %v2133_v12  ;;  %v2097_v21 = vor.u32 %v2811_v19, %v2096_v18  ;;  %v2802_v24 = vld [vmem:[#allocation5 + $0x15c] sm:$0xf0]  ;;  %v2101_v25 = vor.u32 %v2807_v20, %v2098_v22  ;;  %v2798_v26 = vld [vmem:[#allocation5 + $0x144] sm:$0xf]  ;;  %v2064_v28 = vld [vmem:[#allocation5 + $0x148] sm:$0xf] }
  0x24   :  { %v2058_v27 = vld [vmem:[#allocation5 + $0x160] sm:$0xf0]  ;;  %v2057_v29 = vor.u32 %v2802_v24, %v2056_v23  ;;  %v2803_v30 = vld [vmem:[#allocation5 + $0x164] sm:$0xf0]  ;;  %v2799_v31 = vld [vmem:[#allocation5 + $0x14c] sm:$0xf] }
  0x25   :  { %527 = vmatpush.bf16.msra.mxu0 %v2089_v16  ;;  %v2066_v32 = vld [vmem:[#allocation5 + $0x168] sm:$0xf0]  ;;  %540 = vmatpush.bf16.msra.mxu1 %v2093_v17  ;;  %v2061_v33 = vor.u32 %v2798_v26, %v2058_v27  ;;  %v2065_v34 = vor.u32 %v2803_v30, %v2064_v28  ;;  %v2024_v35 = vld [vmem:[#allocation5 + $0x100] sm:$0xf]  ;;  %v2790_v37 = vld [vmem:[#allocation5 + $0x104] sm:$0xf] }
  0x26   :  { %553 = vmatpush.bf16.msra.mxu2 %v2097_v21  ;;  %v2794_v36 = vld [vmem:[#allocation5 + $0x11c] sm:$0xf0]  ;;  %v2069_v38 = vor.u32 %v2799_v31, %v2066_v32  ;;  %v2026_v39 = vld [vmem:[#allocation5 + $0x120] sm:$0xf0]  ;;  %v2032_v40 = vld [vmem:[#allocation5 + $0x108] sm:$0xf] }
  0x27   :  { %566 = vmatpush.bf16.msra.mxu3 %v2101_v25  ;;  %v2795_v41 = vld [vmem:[#allocation5 + $0x124] sm:$0xf0]  ;;  %v2791_v42 = vld [vmem:[#allocation5 + $0x10c] sm:$0xf]  ;;  %v2025_v44 = vor.u32 %v2794_v36, %v2024_v35  ;;  %v2029_v45 = vor.u32 %v2790_v37, %v2026_v39  ;;  %v1992_v47 = vld [vmem:[#allocation5 + $0xc0] sm:$0xf] }
  0x28   :  { %v2034_v43 = vld [vmem:[#allocation5 + $0x128] sm:$0xf0]  ;;  %v2033_v46 = vor.u32 %v2795_v41, %v2032_v40  ;;  %v2786_v48 = vld [vmem:[#allocation5 + $0xdc] sm:$0xf0]  ;;  %v2782_v49 = vld [vmem:[#allocation5 + $0xc4] sm:$0xf] }
  0x29   :  { %528 = vmatpush.bf16.msra.mxu0 %v2057_v29  ;;  %541 = vmatpush.bf16.msra.mxu1 %v2061_v33  ;;  %v2037_v50 = vor.u32 %v2791_v42, %v2034_v43  ;;  %v1994_v51 = vld [vmem:[#allocation5 + $0xe0] sm:$0xf0]  ;;  %v2000_v52 = vld [vmem:[#allocation5 + $0xc8] sm:$0xf]  ;;  %v2783_v54 = vld [vmem:[#allocation5 + $0xcc] sm:$0xf]  ;;  %v1993_v56 = vor.u32 %v2786_v48, %v1992_v47 }
  0x2a   :  { %554 = vmatpush.bf16.msra.mxu2 %v2065_v34  ;;  %v2787_v53 = vld [vmem:[#allocation5 + $0xe4] sm:$0xf0]  ;;  %v2002_v55 = vld [vmem:[#allocation5 + $0xe8] sm:$0xf0]  ;;  %v1997_v57 = vor.u32 %v2782_v49, %v1994_v51  ;;  %v1960_v59 = vld [vmem:[#allocation5 + $0x80] sm:$0xf] }
  0x2b   :  { %567 = vmatpush.bf16.msra.mxu3 %v2069_v38  ;;  %v2001_v58 = vor.u32 %v2787_v53, %v2000_v52  ;;  %v2778_v60 = vld [vmem:[#allocation5 + $0x9c] sm:$0xf0]  ;;  %v2774_v61 = vld [vmem:[#allocation5 + $0x84] sm:$0xf]  ;;  %v2005_v62 = vor.u32 %v2783_v54, %v2002_v55  ;;  %v1968_v0 = vld [vmem:[#allocation5 + $0x88] sm:$0xf] }
  0x2c   :  { %v1962_v63 = vld [vmem:[#allocation5 + $0xa0] sm:$0xf0]  ;;  %v2779_v1 = vld [vmem:[#allocation5 + $0xa4] sm:$0xf0]  ;;  %v2775_v2 = vld [vmem:[#allocation5 + $0x8c] sm:$0xf]  ;;  %v1961_v4 = vor.u32 %v2778_v60, %v1960_v59 }
  0x2d   :  { %529 = vmatpush.bf16.msra.mxu0 %v2025_v44  ;;  %542 = vmatpush.bf16.msra.mxu1 %v2029_v45  ;;  %v1970_v3 = vld [vmem:[#allocation5 + $0xa8] sm:$0xf0]  ;;  %v1965_v5 = vor.u32 %v2774_v61, %v1962_v63  ;;  %v1969_v6 = vor.u32 %v2779_v1, %v1968_v0  ;;  %v1928_v7 = vld [vmem:[#allocation5 + $0x40] sm:$0xf]  ;;  %v2766_v9 = vld [vmem:[#allocation5 + $0x44] sm:$0xf] }
  0x2e   :  { %555 = vmatpush.bf16.msra.mxu2 %v2033_v46  ;;  %v2770_v8 = vld [vmem:[#allocation5 + $0x5c] sm:$0xf0]  ;;  %v1973_v10 = vor.u32 %v2775_v2, %v1970_v3  ;;  %v1930_v11 = vld [vmem:[#allocation5 + $0x60] sm:$0xf0]  ;;  %v1936_v12 = vld [vmem:[#allocation5 + $0x48] sm:$0xf] }
  0x2f   :  { %568 = vmatpush.bf16.msra.mxu3 %v2037_v50  ;;  %v2771_v13 = vld [vmem:[#allocation5 + $0x64] sm:$0xf0]  ;;  %v2767_v14 = vld [vmem:[#allocation5 + $0x4c] sm:$0xf]  ;;  %v1929_v16 = vor.u32 %v2770_v8, %v1928_v7  ;;  %v1896_v17 = vld [vmem:[#allocation5] sm:$0xf]  ;;  %v1933_v19 = vor.u32 %v2766_v9, %v1930_v11 }
  0x30   :  { %v1938_v15 = vld [vmem:[#allocation5 + $0x68] sm:$0xf0]  ;;  %v2762_v18 = vld [vmem:[#allocation5 + $0x1c] sm:$0xf0]  ;;  %v1937_v20 = vor.u32 %v2771_v13, %v1936_v12  ;;  %v2758_v21 = vld [vmem:[#allocation5 + $0x4] sm:$0xf] }
  0x31   :  { %530 = vmatpush.bf16.msra.mxu0 %v1993_v56  ;;  %543 = vmatpush.bf16.msra.mxu1 %v1997_v57  ;;  %v1898_v22 = vld [vmem:[#allocation5 + $0x20] sm:$0xf0]  ;;  %v1904_v23 = vld [vmem:[#allocation5 + $0x8] sm:$0xf]  ;;  %v1941_v24 = vor.u32 %v2767_v14, %v1938_v15  ;;  %v2759_v26 = vld [vmem:[#allocation5 + $0xc] sm:$0xf]  ;;  %v1897_v31 = vor.u32 %v2762_v18, %v1896_v17 }
  0x32   :  { %556 = vmatpush.bf16.msra.mxu2 %v2001_v58  ;;  %v2763_v25 = vld [vmem:[#allocation5 + $0x24] sm:$0xf0]  ;;  %v1906_v27 = vld [vmem:[#allocation5 + $0x28] sm:$0xf0]  ;;  %v2136_v28 = vld [vmem:[#allocation5 + $0x1d0] sm:$0xf]  ;;  %v1901_v35 = vor.u32 %v2758_v21, %v1898_v22 }
  0x33   :  { %569 = vmatpush.bf16.msra.mxu3 %v2005_v62  ;;  %v2820_v29 = vld [vmem:[#allocation5 + $0x1ec] sm:$0xf0]  ;;  %v2816_v30 = vld [vmem:[#allocation5 + $0x1d4] sm:$0xf]  ;;  %v2144_v33 = vld [vmem:[#allocation5 + $0x1d8] sm:$0xf]  ;;  %v1905_v36 = vor.u32 %v2763_v25, %v1904_v23  ;;  %v1909_v39 = vor.u32 %v2759_v26, %v1906_v27 }
  0x34   :  { %v2138_v32 = vld [vmem:[#allocation5 + $0x1f0] sm:$0xf0]  ;;  %v2821_v34 = vld [vmem:[#allocation5 + $0x1f4] sm:$0xf0]  ;;  %v2817_v37 = vld [vmem:[#allocation5 + $0x1dc] sm:$0xf]  ;;  %v2137_v40 = vor.u32 %v2820_v29, %v2136_v28 }
  0x35   :  { %531 = vmatpush.bf16.msra.mxu0 %v1961_v4  ;;  %544 = vmatpush.bf16.msra.mxu1 %v1965_v5  ;;  %v2146_v38 = vld [vmem:[#allocation5 + $0x1f8] sm:$0xf0]  ;;  %v2141_v41 = vor.u32 %v2816_v30, %v2138_v32  ;;  %v2145_v42 = vor.u32 %v2821_v34, %v2144_v33  ;;  %v2104_v43 = vld [vmem:[#allocation5 + $0x190] sm:$0xf]  ;;  %v2808_v45 = vld [vmem:[#allocation5 + $0x194] sm:$0xf] }
  0x36   :  { %557 = vmatpush.bf16.msra.mxu2 %v1969_v6  ;;  %v2812_v44 = vld [vmem:[#allocation5 + $0x1ac] sm:$0xf0]  ;;  %v2149_v46 = vor.u32 %v2817_v37, %v2146_v38  ;;  %v2106_v47 = vld [vmem:[#allocation5 + $0x1b0] sm:$0xf0]  ;;  %v2112_v48 = vld [vmem:[#allocation5 + $0x198] sm:$0xf] }
  0x37   :  { %570 = vmatpush.bf16.msra.mxu3 %v1973_v10  ;;  %v2813_v49 = vld [vmem:[#allocation5 + $0x1b4] sm:$0xf0]  ;;  %v3248_v50 = vld [vmem:[#allocation2] sm:$0xf]  ;;  %v2105_v53 = vor.u32 %v2812_v44, %v2104_v43  ;;  %v2109_v54 = vor.u32 %v2808_v45, %v2106_v47  ;;  %v2072_v56 = vld [vmem:[#allocation5 + $0x150] sm:$0xf] }
  0x38   :  { %v2809_v51 = vld [vmem:[#allocation5 + $0x19c] sm:$0xf]  ;;  %v2113_v55 = vor.u32 %v2813_v49, %v2112_v48  ;;  %v2804_v57 = vld [vmem:[#allocation5 + $0x16c] sm:$0xf0]  ;;  %v2800_v58 = vld [vmem:[#allocation5 + $0x154] sm:$0xf] }
  0x39   :  { %532 = vmatpush.bf16.msra.mxu0 %v1929_v16  ;;  %545 = vmatpush.bf16.msra.mxu1 %v1933_v19  ;;  %v2114_v52 = vld [vmem:[#allocation5 + $0x1b8] sm:$0xf0]  ;;  %v2074_v60 = vld [vmem:[#allocation5 + $0x170] sm:$0xf0]  ;;  %v2080_v61 = vld [vmem:[#allocation5 + $0x158] sm:$0xf]  ;;  %v2073_v1 = vor.u32 %v2804_v57, %v2072_v56 }
  0x3a   :  { %558 = vmatpush.bf16.msra.mxu2 %v1937_v20  ;;  %v2117_v59 = vor.u32 %v2809_v51, %v2114_v52  ;;  %v2805_v62 = vld [vmem:[#allocation5 + $0x174] sm:$0xf0]  ;;  %v2801_v63 = vld [vmem:[#allocation5 + $0x15c] sm:$0xf]  ;;  %v2077_v2 = vor.u32 %v2800_v58, %v2074_v60  ;;  %v2040_v4 = vld [vmem:[#allocation5 + $0x110] sm:$0xf] }
  0x3b   :  { %571 = vmatpush.bf16.msra.mxu3 %v1941_v24  ;;  %v2082_v0 = vld [vmem:[#allocation5 + $0x178] sm:$0xf0]  ;;  %v2081_v3 = vor.u32 %v2805_v62, %v2080_v61  ;;  %v2796_v5 = vld [vmem:[#allocation5 + $0x12c] sm:$0xf0]  ;;  %v2792_v6 = vld [vmem:[#allocation5 + $0x114] sm:$0xf] }
  0x3c   :  { %v2085_v7 = vor.u32 %v2801_v63, %v2082_v0  ;;  %v2042_v8 = vld [vmem:[#allocation5 + $0x130] sm:$0xf0]  ;;  %v2048_v9 = vld [vmem:[#allocation5 + $0x118] sm:$0xf]  ;;  %v2793_v11 = vld [vmem:[#allocation5 + $0x11c] sm:$0xf]  ;;  %v2041_v13 = vor.u32 %v2796_v5, %v2040_v4 }
  0x3d   :  { %533 = vmatpush.bf16.msra.mxu0 %v1897_v31  ;;  %546 = vmatpush.bf16.msra.mxu1 %v1901_v35  ;;  %v2797_v10 = vld [vmem:[#allocation5 + $0x134] sm:$0xf0]  ;;  %v2050_v12 = vld [vmem:[#allocation5 + $0x138] sm:$0xf0]  ;;  %v2045_v14 = vor.u32 %v2792_v6, %v2042_v8  ;;  %v2008_v16 = vld [vmem:[#allocation5 + $0xd0] sm:$0xf] }
  0x3e   :  { %559 = vmatpush.bf16.msra.mxu2 %v1905_v36  ;;  %v2049_v15 = vor.u32 %v2797_v10, %v2048_v9  ;;  %v2788_v17 = vld [vmem:[#allocation5 + $0xec] sm:$0xf0]  ;;  %v2784_v18 = vld [vmem:[#allocation5 + $0xd4] sm:$0xf]  ;;  %v2053_v19 = vor.u32 %v2793_v11, %v2050_v12  ;;  %v2016_v21 = vld [vmem:[#allocation5 + $0xd8] sm:$0xf] }
  0x3f   :  { %572 = vmatpush.bf16.msra.mxu3 %v1909_v39  ;;  %v2010_v20 = vld [vmem:[#allocation5 + $0xf0] sm:$0xf0]  ;;  %v2789_v22 = vld [vmem:[#allocation5 + $0xf4] sm:$0xf0]  ;;  %v2785_v23 = vld [vmem:[#allocation5 + $0xdc] sm:$0xf]  ;;  %v2009_v25 = vor.u32 %v2788_v17, %v2008_v16 }
  0x40   :  { %534 = vmatmul.bf16.vlgmr.msra.gmra.mxu0 %v3248_v50  ;;  %547 = vmatmul.bf16.vlgmr.msra.gmra.mxu1 %v3248_v50  ;;  %v2018_v24 = vld [vmem:[#allocation5 + $0xf8] sm:$0xf0]  ;;  %v2013_v26 = vor.u32 %v2784_v18, %v2010_v20  ;;  %v2017_v27 = vor.u32 %v2789_v22, %v2016_v21  ;;  %v1976_v28 = vld [vmem:[#allocation5 + $0x90] sm:$0xf]  ;;  %v2776_v30 = vld [vmem:[#allocation5 + $0x94] sm:$0xf] }
  0x41   :  { %578 = vmatpush.bf16.msrb.mxu0 %v2137_v40  ;;  %591 = vmatpush.bf16.msrb.mxu1 %v2141_v41  ;;  %v2780_v29 = vld [vmem:[#allocation5 + $0xac] sm:$0xf0]  ;;  %v2021_v31 = vor.u32 %v2785_v23, %v2018_v24  ;;  %v1978_v32 = vld [vmem:[#allocation5 + $0xb0] sm:$0xf0]  ;;  %v1984_v33 = vld [vmem:[#allocation5 + $0x98] sm:$0xf] }
  0x42   :  { %604 = vmatpush.bf16.msrb.mxu2 %v2145_v42  ;;  %573 = vmatmul.bf16.vlgmr.msra.gmra.mxu3 %v3248_v50  ;;  %v2781_v34 = vld [vmem:[#allocation5 + $0xb4] sm:$0xf0]  ;;  %v2777_v35 = vld [vmem:[#allocation5 + $0x9c] sm:$0xf]  ;;  %v1977_v37 = vor.u32 %v2780_v29, %v1976_v28  ;;  %v1981_v38 = vor.u32 %v2776_v30, %v1978_v32  ;;  %v1944_v40 = vld [vmem:[#allocation5 + $0x50] sm:$0xf] }
  0x43   :  { %617 = vmatpush.bf16.msrb.mxu3 %v2149_v46  ;;  %560 = vmatmul.bf16.vlgmr.msra.gmra.mxu2 %v3248_v50  ;;  %v1986_v36 = vld [vmem:[#allocation5 + $0xb8] sm:$0xf0]  ;;  %v1985_v39 = vor.u32 %v2781_v34, %v1984_v33  ;;  %v2772_v41 = vld [vmem:[#allocation5 + $0x6c] sm:$0xf0]  ;;  %v2768_v42 = vld [vmem:[#allocation5 + $0x54] sm:$0xf] }
  0x44   :  { %v1989_v43 = vor.u32 %v2777_v35, %v1986_v36  ;;  %v1946_v44 = vld [vmem:[#allocation5 + $0x70] sm:$0xf0]  ;;  %v1952_v45 = vld [vmem:[#allocation5 + $0x58] sm:$0xf]  ;;  %v2769_v47 = vld [vmem:[#allocation5 + $0x5c] sm:$0xf]  ;;  %v1945_v49 = vor.u32 %v2772_v41, %v1944_v40 }
  0x45   :  { %579 = vmatpush.bf16.msrb.mxu0 %v2105_v53  ;;  %592 = vmatpush.bf16.msrb.mxu1 %v2109_v54  ;;  %v2773_v46 = vld [vmem:[#allocation5 + $0x74] sm:$0xf0]  ;;  %v1954_v48 = vld [vmem:[#allocation5 + $0x78] sm:$0xf0]  ;;  %v1912_v51 = vld [vmem:[#allocation5 + $0x10] sm:$0xf]  ;;  %v1949_v52 = vor.u32 %v2768_v42, %v1946_v44 }
  0x46   :  { %605 = vmatpush.bf16.msrb.mxu2 %v2113_v55  ;;  %v1953_v53 = vor.u32 %v2773_v46, %v1952_v45  ;;  %v2764_v54 = vld [vmem:[#allocation5 + $0x2c] sm:$0xf0]  ;;  %v2760_v55 = vld [vmem:[#allocation5 + $0x14] sm:$0xf]  ;;  %v1957_v57 = vor.u32 %v2769_v47, %v1954_v48  ;;  %v1920_v58 = vld [vmem:[#allocation5 + $0x18] sm:$0xf] }
  0x47   :  { %618 = vmatpush.bf16.msrb.mxu3 %v2117_v59  ;;  %v1914_v56 = vld [vmem:[#allocation5 + $0x30] sm:$0xf0]  ;;  %v2765_v59 = vld [vmem:[#allocation5 + $0x34] sm:$0xf0]  ;;  %v2761_v60 = vld [vmem:[#allocation5 + $0x1c] sm:$0xf]  ;;  %v1913_v0 = vor.u32 %v2764_v54, %v1912_v51 }
  0x48   :  { %v1922_v61 = vld [vmem:[#allocation5 + $0x38] sm:$0xf0]  ;;  %v2208_v62 = vld [vmem:[#allocation8 + $0x70] sm:$0xf]  ;;  %v2837_v63 = vld [vmem:[#allocation8 + $0x74] sm:$0xf0]  ;;  %v1921_v4 = vor.u32 %v2765_v59, %v1920_v58 }
  0x49   :  { %580 = vmatpush.bf16.msrb.mxu0 %v2073_v1  ;;  %593 = vmatpush.bf16.msrb.mxu1 %v2077_v2  ;;  %v2272_v1 = vld [vmem:[#allocation8 + $0xf0] sm:$0xf]  ;;  %v2853_v2 = vld [vmem:[#allocation8 + $0xf4] sm:$0xf0]  ;;  %v1925_v5 = vor.u32 %v2761_v60, %v1922_v61  ;;  %v2209_v6 = vor.u32 %v2837_v63, %v2208_v62  ;;  %v2835_v11 = vld [vmem:[#allocation8 + $0x64] sm:$0xf0] }
  0x4a   :  { %606 = vmatpush.bf16.msrb.mxu2 %v2081_v3  ;;  %v1917_v3 = vor.u32 %v2760_v55, %v1914_v56  ;;  %v2336_v8 = vld [vmem:[#allocation8 + $0x170] sm:$0xf]  ;;  %v2869_v9 = vld [vmem:[#allocation8 + $0x174] sm:$0xf0]  ;;  %v2273_v10 = vor.u32 %v2853_v2, %v2272_v1  ;;  %v2328_v20 = vld [vmem:[#allocation8 + $0x160] sm:$0xf] }
  0x4b   :  { %619 = vmatpush.bf16.msrb.mxu3 %v2085_v7  ;;  %v2200_v7 = vld [vmem:[#allocation8 + $0x60] sm:$0xf]  ;;  %v2400_v12 = vld [vmem:[#allocation8 + $0x1f0] sm:$0xf]  ;;  %v2337_v16 = vor.u32 %v2869_v9, %v2336_v8  ;;  %v2867_v21 = vld [vmem:[#allocation8 + $0x164] sm:$0xf0] }
  0x4c   :  { %v2201_v17 = vor.u32 %v2835_v11, %v2200_v7  ;;  %v2833_v23 = vld [vmem:[#allocation8 + $0x54] sm:$0xf0]  ;;  %v2392_v24 = vld [vmem:[#allocation8 + $0x1e0] sm:$0xf]  ;;  %v2329_v28 = vor.u32 %v2867_v21, %v2328_v20  ;;  %v2320_v32 = vld [vmem:[#allocation8 + $0x150] sm:$0xf] }
  0x4d   :  { %581 = vmatpush.bf16.msrb.mxu0 %v2041_v13  ;;  %594 = vmatpush.bf16.msrb.mxu1 %v2045_v14  ;;  %v2885_v13 = vld [vmem:[#allocation8 + $0x1f4] sm:$0xf0]  ;;  %v2264_v14 = vld [vmem:[#allocation8 + $0xe0] sm:$0xf]  ;;  %v2831_v35 = vld [vmem:[#allocation8 + $0x44] sm:$0xf0] }
  0x4e   :  { %607 = vmatpush.bf16.msrb.mxu2 %v2049_v15  ;;  %v2851_v15 = vld [vmem:[#allocation8 + $0xe4] sm:$0xf0]  ;;  %v2401_v18 = vor.u32 %v2885_v13, %v2400_v12  ;;  %v2865_v33 = vld [vmem:[#allocation8 + $0x154] sm:$0xf0]  ;;  %v2384_v36 = vld [vmem:[#allocation8 + $0x1d0] sm:$0xf] }
  0x4f   :  { %620 = vmatpush.bf16.msrb.mxu3 %v2053_v19  ;;  %v2192_v19 = vld [vmem:[#allocation8 + $0x50] sm:$0xf]  ;;  %v2265_v22 = vor.u32 %v2851_v15, %v2264_v14  ;;  %v2321_v40 = vor.u32 %v2865_v33, %v2320_v32  ;;  %v2312_v44 = vld [vmem:[#allocation8 + $0x140] sm:$0xf]  ;;  %v2863_v45 = vld [vmem:[#allocation8 + $0x144] sm:$0xf0] }
  0x50   :  { %v2193_v29 = vor.u32 %v2833_v23, %v2192_v19  ;;  %v2176_v41 = vld [vmem:[#allocation8 + $0x30] sm:$0xf]  ;;  %v2376_v47 = vld [vmem:[#allocation8 + $0x1c0] sm:$0xf]  ;;  %v2879_v48 = vld [vmem:[#allocation8 + $0x1c4] sm:$0xf0] }
  0x51   :  { %582 = vmatpush.bf16.msrb.mxu0 %v2009_v25  ;;  %595 = vmatpush.bf16.msrb.mxu1 %v2013_v26  ;;  %v2883_v25 = vld [vmem:[#allocation8 + $0x1e4] sm:$0xf0]  ;;  %v2256_v26 = vld [vmem:[#allocation8 + $0xd0] sm:$0xf]  ;;  %v2845_v51 = vld [vmem:[#allocation8 + $0xb4] sm:$0xf0]  ;;  %v2377_v54 = vor.u32 %v2879_v48, %v2376_v47 }
  0x52   :  { %608 = vmatpush.bf16.msrb.mxu2 %v2017_v27  ;;  %v2849_v27 = vld [vmem:[#allocation8 + $0xd4] sm:$0xf0]  ;;  %v2393_v30 = vor.u32 %v2883_v25, %v2392_v24  ;;  %v2168_v55 = vld [vmem:[#allocation8 + $0x20] sm:$0xf]  ;;  %v2304_v56 = vld [vmem:[#allocation8 + $0x130] sm:$0xf] }
  0x53   :  { %621 = vmatpush.bf16.msrb.mxu3 %v2021_v31  ;;  %v2184_v31 = vld [vmem:[#allocation8 + $0x40] sm:$0xf]  ;;  %v2257_v34 = vor.u32 %v2849_v27, %v2256_v26  ;;  %v2827_v59 = vld [vmem:[#allocation8 + $0x24] sm:$0xf0]  ;;  %v2368_v60 = vld [vmem:[#allocation8 + $0x1b0] sm:$0xf] }
  0x54   :  { %v2185_v42 = vor.u32 %v2831_v35, %v2184_v31  ;;  %v2877_v61 = vld [vmem:[#allocation8 + $0x1b4] sm:$0xf0]  ;;  %v2232_v62 = vld [vmem:[#allocation8 + $0xa0] sm:$0xf]  ;;  %v2843_v63 = vld [vmem:[#allocation8 + $0xa4] sm:$0xf0]  ;;  %v2169_v1 = vor.u32 %v2827_v59, %v2168_v55 }
  0x55   :  { %583 = vmatpush.bf16.msrb.mxu0 %v1977_v37  ;;  %596 = vmatpush.bf16.msrb.mxu1 %v1981_v38  ;;  %v2881_v37 = vld [vmem:[#allocation8 + $0x1d4] sm:$0xf0]  ;;  %v2248_v38 = vld [vmem:[#allocation8 + $0xc0] sm:$0xf]  ;;  %v2369_v2 = vor.u32 %v2877_v61, %v2368_v60  ;;  %v2875_v9 = vld [vmem:[#allocation8 + $0x1a4] sm:$0xf0] }
  0x56   :  { %609 = vmatpush.bf16.msrb.mxu2 %v1985_v39  ;;  %v2847_v39 = vld [vmem:[#allocation8 + $0xc4] sm:$0xf0]  ;;  %v2825_v7 = vld [vmem:[#allocation8 + $0x14] sm:$0xf0]  ;;  %v2360_v8 = vld [vmem:[#allocation8 + $0x1a0] sm:$0xf] }
  0x57   :  { %622 = vmatpush.bf16.msrb.mxu3 %v1989_v43  ;;  %v2385_v43 = vor.u32 %v2881_v37, %v2384_v36  ;;  %v2249_v46 = vor.u32 %v2847_v39, %v2248_v38  ;;  %v2841_v11 = vld [vmem:[#allocation8 + $0x94] sm:$0xf0]  ;;  %v2152_v13 = vld [vmem:[#allocation8] sm:$0xf]  ;;  %v2361_v15 = vor.u32 %v2875_v9, %v2360_v8  ;;  %v2352_v21 = vld [vmem:[#allocation8 + $0x190] sm:$0xf] }
  0x58   :  { %v2216_v20 = vld [vmem:[#allocation8 + $0x80] sm:$0xf]  ;;  %v2839_v23 = vld [vmem:[#allocation8 + $0x84] sm:$0xf0]  ;;  %v2464_v24 = vld [vmem:[#allocation8 + $0x270] sm:$0xf] }
  0x59   :  { %584 = vmatpush.bf16.msrb.mxu0 %v1945_v49  ;;  %597 = vmatpush.bf16.msrb.mxu1 %v1949_v52  ;;  %v2240_v49 = vld [vmem:[#allocation8 + $0xb0] sm:$0xf]  ;;  %v2313_v52 = vor.u32 %v2863_v45, %v2312_v44  ;;  %v2901_v25 = vld [vmem:[#allocation8 + $0x274] sm:$0xf0]  ;;  %v2456_v31 = vld [vmem:[#allocation8 + $0x260] sm:$0xf]  ;;  %v2217_v35 = vor.u32 %v2839_v23, %v2216_v20 }
  0x5a   :  { %610 = vmatpush.bf16.msrb.mxu2 %v1953_v53  ;;  %v2241_v58 = vor.u32 %v2845_v51, %v2240_v49  ;;  %v2528_v26 = vld [vmem:[#allocation8 + $0x2f0] sm:$0xf]  ;;  %v2917_v27 = vld [vmem:[#allocation8 + $0x2f4] sm:$0xf0]  ;;  %v2280_v32 = vld [vmem:[#allocation8 + $0x100] sm:$0xf]  ;;  %v2465_v36 = vor.u32 %v2901_v25, %v2464_v24 }
  0x5b   :  { %623 = vmatpush.bf16.msrb.mxu3 %v1957_v57  ;;  %v2861_v57 = vld [vmem:[#allocation8 + $0x134] sm:$0xf0]  ;;  %v2855_v33 = vld [vmem:[#allocation8 + $0x104] sm:$0xf0]  ;;  %v2592_v38 = vld [vmem:[#allocation8 + $0x370] sm:$0xf] }
  0x5c   :  { %v2871_v37 = vld [vmem:[#allocation8 + $0x184] sm:$0xf0]  ;;  %v2933_v39 = vld [vmem:[#allocation8 + $0x374] sm:$0xf0]  ;;  %v2281_v45 = vor.u32 %v2855_v33, %v2280_v32  ;;  %v2448_v51 = vld [vmem:[#allocation8 + $0x250] sm:$0xf] }
  0x5d   :  { %585 = vmatpush.bf16.msrb.mxu0 %v1913_v0  ;;  %598 = vmatpush.bf16.msrb.mxu1 %v1917_v3  ;;  %v2305_v0 = vor.u32 %v2861_v57, %v2304_v56  ;;  %v2160_v3 = vld [vmem:[#allocation8 + $0x10] sm:$0xf]  ;;  %v2915_v44 = vld [vmem:[#allocation8 + $0x2e4] sm:$0xf0]  ;;  %v2593_v47 = vor.u32 %v2933_v39, %v2592_v38  ;;  %v2897_v55 = vld [vmem:[#allocation8 + $0x254] sm:$0xf0] }
  0x5e   :  { %611 = vmatpush.bf16.msrb.mxu2 %v1921_v4  ;;  %v2296_v4 = vld [vmem:[#allocation8 + $0x120] sm:$0xf]  ;;  %v2161_v14 = vor.u32 %v2825_v7, %v2160_v3  ;;  %v2947_v57 = vld [vmem:[#allocation8 + $0x3e4] sm:$0xf0]  ;;  %v2913_v59 = vld [vmem:[#allocation8 + $0x2d4] sm:$0xf0]  ;;  %v2449_v61 = vor.u32 %v2897_v55, %v2448_v51 }
  0x5f   :  { %624 = vmatpush.bf16.msrb.mxu3 %v1925_v5  ;;  %v2859_v5 = vld [vmem:[#allocation8 + $0x124] sm:$0xf0]  ;;  %v2648_v56 = vld [vmem:[#allocation8 + $0x3e0] sm:$0xf]  ;;  %v2624_v32 = vld [vmem:[#allocation8 + $0x3b0] sm:$0xf] }
  0x60   :  { %586 = vmatmul.bf16.vlgmr.msrb.gmra.mxu0 %v3248_v50  ;;  %599 = vmatmul.bf16.vlgmr.msrb.gmra.mxu1 %v3248_v50  ;;  %v2297_v12 = vor.u32 %v2859_v5, %v2296_v4  ;;  %v2895_v3 = vld [vmem:[#allocation8 + $0x244] sm:$0xf0]  ;;  %v2640_v4 = vld [vmem:[#allocation8 + $0x3d0] sm:$0xf]  ;;  %v2945_v5 = vld [vmem:[#allocation8 + $0x3d4] sm:$0xf0] }
  0x61   :  { %1420 = vmatpush.bf16.msra.mxu0 %v2209_v6  ;;  %1433 = vmatpush.bf16.msra.mxu1 %v2273_v10  ;;  %v2233_v6 = vor.u32 %v2843_v63, %v2232_v62  ;;  %v2224_v10 = vld [vmem:[#allocation8 + $0x90] sm:$0xf]  ;;  %v2649_v62 = vor.u32 %v2947_v57, %v2648_v56  ;;  %v2440_v63 = vld [vmem:[#allocation8 + $0x240] sm:$0xf]  ;;  %v2911_v7 = vld [vmem:[#allocation8 + $0x2c4] sm:$0xf0] }
  0x62   :  { %612 = vmatmul.bf16.vlgmr.msrb.gmra.mxu2 %v3248_v50  ;;  %625 = vmatmul.bf16.vlgmr.msrb.gmra.mxu3 %v3248_v50  ;;  %v2829_v50 = vld [vmem:[#allocation8 + $0x34] sm:$0xf0]  ;;  %v2225_v19 = vor.u32 %v2841_v11, %v2224_v10  ;;  %v2441_v9 = vor.u32 %v2895_v3, %v2440_v63  ;;  %v2641_v10 = vor.u32 %v2945_v5, %v2640_v4  ;;  %v2432_v11 = vld [vmem:[#allocation8 + $0x230] sm:$0xf]  ;;  %v2424_v24 = vld [vmem:[#allocation8 + $0x220] sm:$0xf] }
  0x63   :  { %1446 = vmatpush.bf16.msra.mxu2 %v2337_v16  ;;  %1459 = vmatpush.bf16.msra.mxu3 %v2401_v18  ;;  %v2177_v53 = vor.u32 %v2829_v50, %v2176_v41  ;;  %v2823_v16 = vld [vmem:[#allocation8 + $0x4] sm:$0xf0]  ;;  %v2857_v18 = vld [vmem:[#allocation8 + $0x114] sm:$0xf0]  ;;  %v2656_v50 = vld [vmem:[#allocation8 + $0x3f0] sm:$0xf] }
  0x64   :  { %v2899_v41 = vld [vmem:[#allocation8 + $0x264] sm:$0xf0]  ;;  %v2480_v39 = vld [vmem:[#allocation8 + $0x290] sm:$0xf]  ;;  %v2921_v55 = vld [vmem:[#allocation8 + $0x314] sm:$0xf0] }
  0x65   :  { %1421 = vmatpush.bf16.msra.mxu0 %v2201_v17  ;;  %1434 = vmatpush.bf16.msra.mxu1 %v2265_v22  ;;  %v2288_v17 = vld [vmem:[#allocation8 + $0x110] sm:$0xf]  ;;  %v2873_v22 = vld [vmem:[#allocation8 + $0x194] sm:$0xf0]  ;;  %v2457_v48 = vor.u32 %v2899_v41, %v2456_v31  ;;  %v2891_v25 = vld [vmem:[#allocation8 + $0x224] sm:$0xf0] }
  0x66   :  { %v2925_v31 = vld [vmem:[#allocation8 + $0x334] sm:$0xf0]  ;;  %v2608_v56 = vld [vmem:[#allocation8 + $0x390] sm:$0xf]  ;;  %v2600_v63 = vld [vmem:[#allocation8 + $0x380] sm:$0xf] }
  0x67   :  { %1447 = vmatpush.bf16.msra.mxu2 %v2329_v28  ;;  %1460 = vmatpush.bf16.msra.mxu3 %v2393_v30  ;;  %v2289_v28 = vor.u32 %v2857_v18, %v2288_v17  ;;  %v2353_v30 = vor.u32 %v2873_v22, %v2352_v21  ;;  %v2943_v17 = vld [vmem:[#allocation8 + $0x3c4] sm:$0xf0]  ;;  %v2496_v18 = vld [vmem:[#allocation8 + $0x2b0] sm:$0xf]  ;;  %s3179_s1 = smov [#allocation13]   ;;  %s1881_s26 = sshll.u32 %s3321_s9, 4  ;;  %s1882_s26 = int_to_ptr.hbm [resolvable:$true] %s1881_s26 }
  0x68   :  { %s1879_s23 = sshll.u32 %s3179_s1, 4  ;;  %s1880_s23 = int_to_ptr.vmem [resolvable:$true] %s1879_s23 }
  0x69   :  { %1422 = vmatpush.bf16.msra.mxu0 %v2193_v29  ;;  %1435 = vmatpush.bf16.msra.mxu1 %v2257_v34  ;;  %v2153_v29 = vor.u32 %v2823_v16, %v2152_v13  ;;  %v2344_v34 = vld [vmem:[#allocation8 + $0x180] sm:$0xf]  ;;  %v2927_v13 = vld [vmem:[#allocation8 + $0x344] sm:$0xf0] }
  0x6a   :  { %v2632_v16 = vld [vmem:[#allocation8 + $0x3c0] sm:$0xf] }
  0x6b   :  { %1448 = vmatpush.bf16.msra.mxu2 %v2321_v40  ;;  %1461 = vmatpush.bf16.msra.mxu3 %v2385_v43  ;;  %v2529_v40 = vor.u32 %v2917_v27, %v2528_v26  ;;  %v2520_v43 = vld [vmem:[#allocation8 + $0x2e0] sm:$0xf]  ;;  %v2633_v22 = vor.u32 %v2943_v17, %v2632_v16  ;;  %v2907_v27 = vld [vmem:[#allocation8 + $0x2a4] sm:$0xf0] }
  0x6c   :  { %v2488_v26 = vld [vmem:[#allocation8 + $0x2a0] sm:$0xf] }
  0x6d   :  { %1423 = vmatpush.bf16.msra.mxu0 %v2185_v42  ;;  %1436 = vmatpush.bf16.msra.mxu1 %v2249_v46  ;;  %v2949_v42 = vld [vmem:[#allocation8 + $0x3f4] sm:$0xf0]  ;;  %v2345_v46 = vor.u32 %v2871_v37, %v2344_v34 }
  0x6e   :  { %v2657_v49 = vor.u32 %v2949_v42, %v2656_v50  ;;  %v2941_v34 = vld [vmem:[#allocation8 + $0x3b4] sm:$0xf0]  ;;  %v2552_v50 = vld [vmem:[#allocation8 + $0x320] sm:$0xf]  ;;  %v2923_v42 = vld [vmem:[#allocation8 + $0x324] sm:$0xf0] }
  0x6f   :  { %1449 = vmatpush.bf16.msra.mxu2 %v2313_v52  ;;  %1462 = vmatpush.bf16.msra.mxu3 %v2377_v54  ;;  %v2584_v52 = vld [vmem:[#allocation8 + $0x360] sm:$0xf]  ;;  %v2521_v54 = vor.u32 %v2915_v44, %v2520_v43  ;;  %v2889_v37 = vld [vmem:[#allocation8 + $0x214] sm:$0xf0]  ;;  %v2553_v44 = vor.u32 %v2923_v42, %v2552_v50 }
  0x70   :  { %v2616_v43 = vld [vmem:[#allocation8 + $0x3a0] sm:$0xf] }
  0x71   :  { %1424 = vmatpush.bf16.msra.mxu0 %v2177_v53  ;;  %1437 = vmatpush.bf16.msra.mxu1 %v2241_v58  ;;  %v2931_v53 = vld [vmem:[#allocation8 + $0x364] sm:$0xf0]  ;;  %v2512_v58 = vld [vmem:[#allocation8 + $0x2d0] sm:$0xf] }
  0x72   :  { %v2585_v60 = vor.u32 %v2931_v53, %v2584_v52  ;;  %v2903_v52 = vld [vmem:[#allocation8 + $0x284] sm:$0xf0] }
  0x73   :  { %1450 = vmatpush.bf16.msra.mxu2 %v2305_v0  ;;  %1463 = vmatpush.bf16.msra.mxu3 %v2369_v2  ;;  %v2576_v0 = vld [vmem:[#allocation8 + $0x350] sm:$0xf]  ;;  %v2513_v2 = vor.u32 %v2913_v59, %v2512_v58  ;;  %v2937_v58 = vld [vmem:[#allocation8 + $0x394] sm:$0xf0] }
  0x74   :  { %v2609_v59 = vor.u32 %v2937_v58, %v2608_v56 }
  0x75   :  { %1425 = vmatpush.bf16.msra.mxu0 %v2169_v1  ;;  %1438 = vmatpush.bf16.msra.mxu1 %v2233_v6  ;;  %v2929_v1 = vld [vmem:[#allocation8 + $0x354] sm:$0xf0]  ;;  %v2504_v6 = vld [vmem:[#allocation8 + $0x2c0] sm:$0xf] }
  0x76   :  { %v2577_v8 = vor.u32 %v2929_v1, %v2576_v0  ;;  %v2935_v0 = vld [vmem:[#allocation8 + $0x384] sm:$0xf0] }
  0x77   :  { %1451 = vmatpush.bf16.msra.mxu2 %v2297_v12  ;;  %1464 = vmatpush.bf16.msra.mxu3 %v2361_v15  ;;  %v2568_v12 = vld [vmem:[#allocation8 + $0x340] sm:$0xf]  ;;  %v2893_v15 = vld [vmem:[#allocation8 + $0x234] sm:$0xf0]  ;;  %v2601_v1 = vor.u32 %v2935_v0, %v2600_v63  ;;  %v2880_v63 = vld [vmem:[#allocation8 + $0x1d4] sm:$0xf] }
  0x78   :  { %v2569_v20 = vor.u32 %v2927_v13, %v2568_v12  ;;  %v2433_v21 = vor.u32 %v2893_v15, %v2432_v11  ;;  %v2852_v12 = vld [vmem:[#allocation8 + $0xf4] sm:$0xf]  ;;  %v2274_v13 = vld [vmem:[#allocation8 + $0xf8] sm:$0xf0] }
  0x79   :  { %1426 = vmatpush.bf16.msra.mxu0 %v2161_v14  ;;  %1439 = vmatpush.bf16.msra.mxu1 %v2225_v19  ;;  %v2505_v14 = vor.u32 %v2911_v7, %v2504_v6  ;;  %v2909_v19 = vld [vmem:[#allocation8 + $0x2b4] sm:$0xf0]  ;;  %v2386_v0 = vld [vmem:[#allocation8 + $0x1d8] sm:$0xf0] }
  0x7a   :  { %v2497_v23 = vor.u32 %v2909_v19, %v2496_v18 }
  0x7b   :  { %1452 = vmatpush.bf16.msra.mxu2 %v2289_v28  ;;  %1465 = vmatpush.bf16.msra.mxu3 %v2353_v30  ;;  %v2425_v28 = vor.u32 %v2891_v25, %v2424_v24  ;;  %v2560_v30 = vld [vmem:[#allocation8 + $0x330] sm:$0xf] }
  0x7c   :  { %v2561_v33 = vor.u32 %v2925_v31, %v2560_v30  ;;  %v2338_v30 = vld [vmem:[#allocation8 + $0x178] sm:$0xf0]  ;;  %v2884_v31 = vld [vmem:[#allocation8 + $0x1f4] sm:$0xf] }
  0x7d   :  { %1427 = vmatpush.bf16.msra.mxu0 %v2153_v29  ;;  %1440 = vmatpush.bf16.msra.mxu1 %v2217_v35  ;;  %v2489_v29 = vor.u32 %v2907_v27, %v2488_v26  ;;  %v2625_v35 = vor.u32 %v2941_v34, %v2624_v32  ;;  %v2850_v26 = vld [vmem:[#allocation8 + $0xe4] sm:$0xf]  ;;  %v2266_v27 = vld [vmem:[#allocation8 + $0xe8] sm:$0xf0]  ;;  %v2402_v32 = vld [vmem:[#allocation8 + $0x1f8] sm:$0xf0] }
  0x7e   :  { %v2405_v42 = vor.u32 %v2884_v31, %v2402_v32  ;;  %v2824_v32 = vld [vmem:[#allocation8 + $0x14] sm:$0xf] }
  0x7f   :  { %1453 = vmatpush.bf16.msra.mxu2 %v2281_v45  ;;  %1466 = vmatpush.bf16.msra.mxu3 %v2345_v46  ;;  %v2939_v45 = vld [vmem:[#allocation8 + $0x3a4] sm:$0xf0] }
  0x80   :  { %v2617_v46 = vor.u32 %v2939_v45, %v2616_v43  ;;  %v2848_v43 = vld [vmem:[#allocation8 + $0xd4] sm:$0xf]  ;;  %v2866_v45 = vld [vmem:[#allocation8 + $0x164] sm:$0xf] }
  0x81   :  { %1472 = vmatpush.bf16.msrb.mxu0 %v2465_v36  ;;  %1485 = vmatpush.bf16.msrb.mxu1 %v2529_v40  ;;  %v2416_v36 = vld [vmem:[#allocation8 + $0x210] sm:$0xf]  ;;  %v2905_v40 = vld [vmem:[#allocation8 + $0x294] sm:$0xf0] }
  0x82   :  { %v2417_v38 = vor.u32 %v2889_v37, %v2416_v36  ;;  %v2481_v41 = vor.u32 %v2905_v40, %v2480_v39  ;;  %v2832_v39 = vld [vmem:[#allocation8 + $0x54] sm:$0xf]  ;;  %v2194_v40 = vld [vmem:[#allocation8 + $0x58] sm:$0xf0] }
  0x83   :  { %1498 = vmatpush.bf16.msrb.mxu2 %v2593_v47  ;;  %1511 = vmatpush.bf16.msrb.mxu3 %v2657_v49  ;;  %v2408_v47 = vld [vmem:[#allocation8 + $0x200] sm:$0xf] }
  0x84   :  { %v2472_v49 = vld [vmem:[#allocation8 + $0x280] sm:$0xf] }
  0x85   :  { %1473 = vmatpush.bf16.msrb.mxu0 %v2457_v48  ;;  %1486 = vmatpush.bf16.msrb.mxu1 %v2521_v54  ;;  %v2887_v48 = vld [vmem:[#allocation8 + $0x204] sm:$0xf0]  ;;  %v2473_v53 = vor.u32 %v2903_v52, %v2472_v49  ;;  %v2544_v54 = vld [vmem:[#allocation8 + $0x310] sm:$0xf]  ;;  %v2394_v49 = vld [vmem:[#allocation8 + $0x1e8] sm:$0xf0] }
  0x86   :  { %v2409_v51 = vor.u32 %v2887_v48, %v2408_v47  ;;  %v2545_v57 = vor.u32 %v2921_v55, %v2544_v54  ;;  %v2330_v47 = vld [vmem:[#allocation8 + $0x168] sm:$0xf0]  ;;  %v2882_v48 = vld [vmem:[#allocation8 + $0x1e4] sm:$0xf] }
  0x87   :  { %1499 = vmatpush.bf16.msrb.mxu2 %v2585_v60  ;;  %1512 = vmatpush.bf16.msrb.mxu3 %v2649_v62  ;;  %v2536_v60 = vld [vmem:[#allocation8 + $0x300] sm:$0xf]  ;;  %v2830_v54 = vld [vmem:[#allocation8 + $0x44] sm:$0xf]  ;;  %v2186_v55 = vld [vmem:[#allocation8 + $0x48] sm:$0xf0]  ;;  %v2397_v58 = vor.u32 %v2882_v48, %v2394_v49 }
  0x89   :  { %1474 = vmatpush.bf16.msrb.mxu0 %v2449_v61  ;;  %1487 = vmatpush.bf16.msrb.mxu1 %v2513_v2  ;;  %v2919_v61 = vld [vmem:[#allocation8 + $0x304] sm:$0xf0]  ;;  %v3258_v2 = vld [vmem:[#allocation7] sm:$0xff] }
  0x8a   :  { %v2537_v62 = vor.u32 %v2919_v61, %v2536_v60  ;;  %v190_v3 = vperm.slane %v3258_v2, 0  ;;  %v191_v4 = vperm.slane %v3258_v2, 1  ;;  %v192_v11 = vperm.slane %v3258_v2, 2  ;;  %v2250_v60 = vld [vmem:[#allocation8 + $0xc8] sm:$0xf0] }
  0x8b   :  { %1500 = vmatpush.bf16.msrb.mxu2 %v2577_v8  ;;  %1513 = vmatpush.bf16.msrb.mxu3 %v2641_v10  ;;  %v2836_v8 = vld [vmem:[#allocation8 + $0x74] sm:$0xf]  ;;  %v193_v15 = vperm.slane %v3258_v2, 3  ;;  %v195_v31 = vperm.slane %v3258_v2, 5 }
  0x8c   :  { %v2864_v61 = vld [vmem:[#allocation8 + $0x154] sm:$0xf] }
  0x8d   :  { %1475 = vmatpush.bf16.msrb.mxu0 %v2441_v9  ;;  %1488 = vmatpush.bf16.msrb.mxu1 %v2505_v14  ;;  %v2210_v9 = vld [vmem:[#allocation8 + $0x78] sm:$0xf0] }
  0x8e   :  { %v2213_v17 = vor.u32 %v2836_v8, %v2210_v9  ;;  %v2844_v8 = vld [vmem:[#allocation8 + $0xb4] sm:$0xf]  ;;  %v2242_v9 = vld [vmem:[#allocation8 + $0xb8] sm:$0xf0] }
  0x8f   :  { %1501 = vmatpush.bf16.msrb.mxu2 %v2569_v20  ;;  %1514 = vmatpush.bf16.msrb.mxu3 %v2633_v22  ;;  %v2277_v20 = vor.u32 %v2852_v12, %v2274_v13  ;;  %v2202_v22 = vld [vmem:[#allocation8 + $0x68] sm:$0xf0]  ;;  %v2878_v12 = vld [vmem:[#allocation8 + $0x1c4] sm:$0xf] }
  0x90   :  { %v2378_v13 = vld [vmem:[#allocation8 + $0x1c8] sm:$0xf0] }
  0x91   :  { %1476 = vmatpush.bf16.msrb.mxu0 %v2433_v21  ;;  %1489 = vmatpush.bf16.msrb.mxu1 %v2497_v23  ;;  %v2834_v21 = vld [vmem:[#allocation8 + $0x64] sm:$0xf] }
  0x93   :  { %1502 = vmatpush.bf16.msrb.mxu2 %v2561_v33  ;;  %1515 = vmatpush.bf16.msrb.mxu3 %v2625_v35  ;;  %v2205_v35 = vor.u32 %v2834_v21, %v2202_v22  ;;  %v2842_v21 = vld [vmem:[#allocation8 + $0xa4] sm:$0xf]  ;;  %v2234_v22 = vld [vmem:[#allocation8 + $0xa8] sm:$0xf0] }
  0x95   :  { %1477 = vmatpush.bf16.msrb.mxu0 %v2425_v28  ;;  %1490 = vmatpush.bf16.msrb.mxu1 %v2489_v29  ;;  %v2868_v28 = vld [vmem:[#allocation8 + $0x174] sm:$0xf] }
  0x96   :  { %v2341_v50 = vor.u32 %v2868_v28, %v2338_v30  ;;  %v194_v30 = vperm.slane %v3258_v2, 4 }
  0x97   :  { %1503 = vmatpush.bf16.msrb.mxu2 %v2553_v44  ;;  %1516 = vmatpush.bf16.msrb.mxu3 %v2617_v46  ;;  %v2258_v44 = vld [vmem:[#allocation8 + $0xd8] sm:$0xf0] }
  0x99   :  { %1478 = vmatpush.bf16.msrb.mxu0 %v2417_v38  ;;  %1491 = vmatpush.bf16.msrb.mxu1 %v2481_v41  ;;  %v2269_v38 = vor.u32 %v2850_v26, %v2266_v27  ;;  %v2876_v26 = vld [vmem:[#allocation8 + $0x1b4] sm:$0xf]  ;;  %v2370_v27 = vld [vmem:[#allocation8 + $0x1b8] sm:$0xf0] }
  0x9b   :  { %1504 = vmatpush.bf16.msrb.mxu2 %v2545_v57  ;;  %1517 = vmatpush.bf16.msrb.mxu3 %v2609_v59  ;;  %v2333_v57 = vor.u32 %v2866_v45, %v2330_v47  ;;  %v2846_v59 = vld [vmem:[#allocation8 + $0xc4] sm:$0xf]  ;;  %v2154_v45 = vld [vmem:[#allocation8 + $0x8] sm:$0xf0] }
  0x9d   :  { %1479 = vmatpush.bf16.msrb.mxu0 %v2409_v51  ;;  %1492 = vmatpush.bf16.msrb.mxu1 %v2473_v53  ;;  %v2197_v51 = vor.u32 %v2832_v39, %v2194_v40  ;;  %v2261_v53 = vor.u32 %v2848_v43, %v2258_v44  ;;  %v2298_v39 = vld [vmem:[#allocation8 + $0x128] sm:$0xf0]  ;;  %v2874_v40 = vld [vmem:[#allocation8 + $0x1a4] sm:$0xf] }
  0x9e   :  { %v2822_v44 = vld [vmem:[#allocation8 + $0x4] sm:$0xf] }
  0x9f   :  { %1505 = vmatpush.bf16.msrb.mxu2 %v2537_v62  ;;  %1518 = vmatpush.bf16.msrb.mxu3 %v2601_v1  ;;  %v2322_v62 = vld [vmem:[#allocation8 + $0x158] sm:$0xf0]  ;;  %v2189_v1 = vor.u32 %v2830_v54, %v2186_v55 }
  0xbd   :  { %v535_v5 = vpop.f32.mrf.mxu0  ;;  %v548_v7 = vpop.f32.mrf.mxu1 }
  0xbe   :  { %v536_v6 = vadd.f32 %v535_v5, %v190_v3  ;;  %v549_v10 = vadd.f32 %v548_v7, %v191_v4  ;;  %v2253_v3 = vor.u32 %v2846_v59, %v2250_v60  ;;  %v2828_v4 = vld [vmem:[#allocation8 + $0x34] sm:$0xf]  ;;  %v2178_v5 = vld [vmem:[#allocation8 + $0x38] sm:$0xf0]  ;;  %v2389_v7 = vor.u32 %v2880_v63, %v2386_v0 }
  0xbf   :  { %v2530_v59 = vld [vmem:[#allocation8 + $0x2f8] sm:$0xf0]  ;;  %v196_v0 = vperm.slane %v3258_v2, 6 }
  0xc0   :  { %v630_v14 = vmax.f32 %v536_v6, 0.0  ;;  %v631_v16 = vmax.f32 %v549_v10, 0.0  ;;  %v2325_v6 = vor.u32 %v2864_v61, %v2322_v62  ;;  %v2862_v10 = vld [vmem:[#allocation8 + $0x144] sm:$0xf]  ;;  %v2856_v61 = vld [vmem:[#allocation8 + $0x114] sm:$0xf] }
  0xc1   :  { %v2290_v62 = vld [vmem:[#allocation8 + $0x118] sm:$0xf0] }
  0xc2   :  { %v3264_v18 = vpack.c.bf16 %v630_v14, %v630_v14  ;;  %v3266_v23 = vpack.c.bf16 %v631_v16, %v631_v16  ;;  %v2181_v14 = vor.u32 %v2828_v4, %v2178_v5  ;;  %v2826_v16 = vld [vmem:[#allocation8 + $0x24] sm:$0xf]  ;;  %v2354_v4 = vld [vmem:[#allocation8 + $0x198] sm:$0xf0] }
  0xc4   :  { %1428 = vmatmul.bf16.vlgmr.msra.gmra.mxu0 %v3264_v18  ;;  %1441 = vmatmul.bf16.vlgmr.msra.gmra.mxu1 %v3266_v23 }
  0xc5   :  { %v574_v25 = vpop.f32.mrf.mxu3  ;;  %1524 = vmatpush.bf16.msra.mxu0 %v2213_v17  ;;  %v537_v34 = vpop.f32.mrf.mxu0  ;;  %1537 = vmatpush.bf16.msra.mxu1 %v2277_v20  ;;  %v2170_v17 = vld [vmem:[#allocation8 + $0x28] sm:$0xf0]  ;;  %v2381_v20 = vor.u32 %v2878_v12, %v2378_v13  ;;  %v2898_v12 = vld [vmem:[#allocation8 + $0x264] sm:$0xf] }
  0xc6   :  { %v561_v19 = vpop.f32.mrf.mxu2  ;;  %v575_v29 = vadd.f32 %v574_v25, %v193_v15  ;;  %v550_v37 = vpop.f32.mrf.mxu1  ;;  %v2245_v15 = vor.u32 %v2844_v8, %v2242_v9  ;;  %v2306_v25 = vld [vmem:[#allocation8 + $0x138] sm:$0xf0]  ;;  %v2173_v28 = vor.u32 %v2826_v16, %v2170_v17  ;;  %v2458_v13 = vld [vmem:[#allocation8 + $0x268] sm:$0xf0] }
  0xc7   :  { %v562_v24 = vadd.f32 %v561_v19, %v192_v11  ;;  %v2314_v11 = vld [vmem:[#allocation8 + $0x148] sm:$0xf0]  ;;  %v2226_v37 = vld [vmem:[#allocation8 + $0x98] sm:$0xf0] }
  0xc8   :  { %v633_v36 = vmax.f32 %v575_v29, 0.0  ;;  %v2317_v19 = vor.u32 %v2862_v10, %v2314_v11  ;;  %v2237_v29 = vor.u32 %v2842_v21, %v2234_v22  ;;  %v2293_v11 = vor.u32 %v2856_v61, %v2290_v62  ;;  %v2522_v17 = vld [vmem:[#allocation8 + $0x2e8] sm:$0xf0] }
  0xc9   :  { %v632_v33 = vmax.f32 %v562_v24, 0.0  ;;  %1525 = vmatpush.bf16.msra.mxu0 %v2205_v35  ;;  %1538 = vmatpush.bf16.msra.mxu1 %v2269_v38  ;;  %v2860_v24 = vld [vmem:[#allocation8 + $0x134] sm:$0xf]  ;;  %v2373_v35 = vor.u32 %v2876_v26, %v2370_v27  ;;  %v2858_v38 = vld [vmem:[#allocation8 + $0x124] sm:$0xf] }
  0xca   :  { %v3272_v46 = vpack.c.bf16 %v633_v36, %v633_v36  ;;  %v2309_v34 = vor.u32 %v2860_v24, %v2306_v25  ;;  %v2840_v36 = vld [vmem:[#allocation8 + $0x94] sm:$0xf]  ;;  %v2301_v55 = vor.u32 %v2858_v38, %v2298_v39  ;;  %v2870_v24 = vld [vmem:[#allocation8 + $0x184] sm:$0xf]  ;;  %v2346_v25 = vld [vmem:[#allocation8 + $0x188] sm:$0xf0] }
  0xcb   :  { %v3270_v41 = vpack.c.bf16 %v632_v33, %v632_v33  ;;  %v2162_v33 = vld [vmem:[#allocation8 + $0x18] sm:$0xf0]  ;;  %v2229_v49 = vor.u32 %v2840_v36, %v2226_v37  ;;  %v2932_v26 = vld [vmem:[#allocation8 + $0x374] sm:$0xf] }
  0xcc   :  { %1467 = vmatmul.bf16.vlgmr.msra.gmra.mxu3 %v3272_v46  ;;  %v2165_v43 = vor.u32 %v2824_v32, %v2162_v33  ;;  %v2658_v32 = vld [vmem:[#allocation8 + $0x3f8] sm:$0xf0]  ;;  %v2912_v39 = vld [vmem:[#allocation8 + $0x2d4] sm:$0xf] }
  0xcd   :  { %1454 = vmatmul.bf16.vlgmr.msra.gmra.mxu2 %v3270_v41  ;;  %v576_v56 = vpop.f32.mrf.mxu3  ;;  %1563 = vmatpush.bf16.msra.mxu3 %v2405_v42  ;;  %v2450_v36 = vld [vmem:[#allocation8 + $0x258] sm:$0xf0] }
  0xce   :  { %v563_v52 = vpop.f32.mrf.mxu2  ;;  %1550 = vmatpush.bf16.msra.mxu2 %v2341_v50  ;;  %1526 = vmatpush.bf16.msra.mxu0 %v2197_v51  ;;  %v2362_v50 = vld [vmem:[#allocation8 + $0x1a8] sm:$0xf0]  ;;  %v2838_v51 = vld [vmem:[#allocation8 + $0x84] sm:$0xf] }
  0xcf   :  { %1539 = vmatpush.bf16.msra.mxu1 %v2261_v53  ;;  %v2218_v52 = vld [vmem:[#allocation8 + $0x88] sm:$0xf0]  ;;  %v2900_v53 = vld [vmem:[#allocation8 + $0x274] sm:$0xf]  ;;  %v2365_v56 = vor.u32 %v2874_v40, %v2362_v50  ;;  %v2514_v40 = vld [vmem:[#allocation8 + $0x2d8] sm:$0xf0] }
  0xd1   :  { %1564 = vmatpush.bf16.msra.mxu3 %v2397_v58  ;;  %v2916_v58 = vld [vmem:[#allocation8 + $0x2f4] sm:$0xf] }
  0xd2   :  { %1551 = vmatpush.bf16.msra.mxu2 %v2333_v57  ;;  %1527 = vmatpush.bf16.msra.mxu0 %v2189_v1  ;;  %v2466_v57 = vld [vmem:[#allocation8 + $0x278] sm:$0xf0]  ;;  %v2157_v1 = vor.u32 %v2822_v44, %v2154_v45  ;;  %v2533_v10 = vor.u32 %v2916_v58, %v2530_v59  ;;  %v2506_v58 = vld [vmem:[#allocation8 + $0x2c8] sm:$0xf0] }
  0xd3   :  { %1540 = vmatpush.bf16.msra.mxu1 %v2253_v3  ;;  %v2872_v3 = vld [vmem:[#allocation8 + $0x194] sm:$0xf]  ;;  %v2469_v8 = vor.u32 %v2900_v53, %v2466_v57  ;;  %v2650_v53 = vld [vmem:[#allocation8 + $0x3e8] sm:$0xf0]  ;;  %v2910_v57 = vld [vmem:[#allocation8 + $0x2c4] sm:$0xf] }
  0xd4   :  { %v2357_v16 = vor.u32 %v2872_v3, %v2354_v4  ;;  %v2509_v3 = vor.u32 %v2910_v57, %v2506_v58  ;;  %v2642_v4 = vld [vmem:[#allocation8 + $0x3d8] sm:$0xf0] }
  0xd5   :  { %1565 = vmatpush.bf16.msra.mxu3 %v2389_v7  ;;  %v2221_v7 = vor.u32 %v2838_v51, %v2218_v52  ;;  %v2946_v51 = vld [vmem:[#allocation8 + $0x3e4] sm:$0xf]  ;;  %v2517_v52 = vor.u32 %v2912_v39, %v2514_v40 }
  0xd6   :  { %1552 = vmatpush.bf16.msra.mxu2 %v2325_v6  ;;  %1528 = vmatpush.bf16.msra.mxu0 %v2181_v14  ;;  %v197_v6 = vperm.slane %v3258_v2, 7  ;;  %v2914_v14 = vld [vmem:[#allocation8 + $0x2e4] sm:$0xf]  ;;  %v2653_v61 = vor.u32 %v2946_v51, %v2650_v53  ;;  %v2920_v53 = vld [vmem:[#allocation8 + $0x314] sm:$0xf] }
  0xd7   :  { %1541 = vmatpush.bf16.msra.mxu1 %v2245_v15  ;;  %v2938_v39 = vld [vmem:[#allocation8 + $0x3a4] sm:$0xf] }
  0xd9   :  { %1566 = vmatpush.bf16.msra.mxu3 %v2381_v20  ;;  %v2282_v20 = vld [vmem:[#allocation8 + $0x108] sm:$0xf0] }
  0xda   :  { %1553 = vmatpush.bf16.msra.mxu2 %v2317_v19  ;;  %1529 = vmatpush.bf16.msra.mxu0 %v2173_v28  ;;  %v2854_v19 = vld [vmem:[#allocation8 + $0x104] sm:$0xf] }
  0xdb   :  { %1542 = vmatpush.bf16.msra.mxu1 %v2237_v29  ;;  %v2461_v29 = vor.u32 %v2898_v12, %v2458_v13  ;;  %v2285_v38 = vor.u32 %v2854_v19, %v2282_v20  ;;  %v2634_v19 = vld [vmem:[#allocation8 + $0x3c8] sm:$0xf0]  ;;  %v2890_v20 = vld [vmem:[#allocation8 + $0x224] sm:$0xf] }
  0xdd   :  { %v587_v42 = vpop.f32.mrf.mxu0  ;;  %v600_v48 = vpop.f32.mrf.mxu1  ;;  %1567 = vmatpush.bf16.msra.mxu3 %v2373_v35  ;;  %v2896_v35 = vld [vmem:[#allocation8 + $0x254] sm:$0xf] }
  0xde   :  { %v588_v47 = vadd.f32 %v587_v42, %v194_v30  ;;  %v601_v54 = vadd.f32 %v600_v48, %v195_v31  ;;  %1554 = vmatpush.bf16.msra.mxu2 %v2309_v34  ;;  %1530 = vmatpush.bf16.msra.mxu0 %v2165_v43  ;;  %v2594_v30 = vld [vmem:[#allocation8 + $0x378] sm:$0xf0]  ;;  %v2948_v31 = vld [vmem:[#allocation8 + $0x3f4] sm:$0xf]  ;;  %v2525_v34 = vor.u32 %v2914_v14, %v2522_v17  ;;  %v2930_v48 = vld [vmem:[#allocation8 + $0x364] sm:$0xf] }
  0xdf   :  { %1543 = vmatpush.bf16.msra.mxu1 %v2229_v49  ;;  %v2349_v42 = vor.u32 %v2870_v24, %v2346_v25  ;;  %v2597_v43 = vor.u32 %v2932_v26, %v2594_v30  ;;  %v2661_v45 = vor.u32 %v2948_v31, %v2658_v32  ;;  %v2586_v49 = vld [vmem:[#allocation8 + $0x368] sm:$0xf0]  ;;  %v2926_v14 = vld [vmem:[#allocation8 + $0x344] sm:$0xf]  ;;  %v2626_v31 = vld [vmem:[#allocation8 + $0x3b8] sm:$0xf0] }
  0xe0   :  { %v634_v60 = vmax.f32 %v588_v47, 0.0  ;;  %v635_v63 = vmax.f32 %v601_v54, 0.0  ;;  %v2453_v47 = vor.u32 %v2896_v35, %v2450_v36  ;;  %v2894_v54 = vld [vmem:[#allocation8 + $0x244] sm:$0xf]  ;;  %v2888_v32 = vld [vmem:[#allocation8 + $0x214] sm:$0xf] }
  0xe1   :  { %1568 = vmatpush.bf16.msra.mxu3 %v2365_v56 }
  0xe2   :  { %v3279_v5 = vpack.c.bf16 %v634_v60, %v634_v60  ;;  %v3282_v9 = vpack.c.bf16 %v635_v63, %v635_v63  ;;  %1555 = vmatpush.bf16.msra.mxu2 %v2301_v55  ;;  %1531 = vmatpush.bf16.msra.mxu0 %v2157_v1  ;;  %v2442_v55 = vld [vmem:[#allocation8 + $0x248] sm:$0xf0]  ;;  %v2589_v60 = vor.u32 %v2930_v48, %v2586_v49  ;;  %v2928_v63 = vld [vmem:[#allocation8 + $0x354] sm:$0xf] }
  0xe3   :  { %1544 = vmatpush.bf16.msra.mxu1 %v2221_v7  ;;  %v2445_v62 = vor.u32 %v2894_v54, %v2442_v55  ;;  %v2944_v1 = vld [vmem:[#allocation8 + $0x3d4] sm:$0xf]  ;;  %v2434_v7 = vld [vmem:[#allocation8 + $0x238] sm:$0xf0]  ;;  %v2474_v48 = vld [vmem:[#allocation8 + $0x288] sm:$0xf0] }
  0xe4   :  { %1480 = vmatmul.bf16.vlgmr.msrb.gmra.mxu0 %v3279_v5  ;;  %1493 = vmatmul.bf16.vlgmr.msrb.gmra.mxu1 %v3282_v9  ;;  %v2645_v12 = vor.u32 %v2944_v1, %v2642_v4  ;;  %v2546_v54 = vld [vmem:[#allocation8 + $0x318] sm:$0xf0]  ;;  %v2956_v1 = vld [vmem:[#allocation10 + $0x30] sm:$0xff]  ;;  %v2954_v4 = vld [vmem:[#allocation10 + $0x20] sm:$0xff] }
  0xe5   :  { %v613_v15 = vpop.f32.mrf.mxu2  ;;  %v626_v2 = vpop.f32.mrf.mxu3  ;;  %1569 = vmatpush.bf16.msra.mxu3 %v2357_v16  ;;  %v2942_v16 = vld [vmem:[#allocation8 + $0x3c4] sm:$0xf]  ;;  %v2549_v57 = vor.u32 %v2920_v53, %v2546_v54 }
  0xe6   :  { %v614_v21 = vadd.f32 %v613_v15, %v196_v0  ;;  %v589_v22 = vpop.f32.mrf.mxu0  ;;  %v627_v27 = vadd.f32 %v626_v2, %v197_v6  ;;  %1576 = vmatpush.bf16.msrb.mxu0 %v2469_v8  ;;  %v602_v28 = vpop.f32.mrf.mxu1  ;;  %1556 = vmatpush.bf16.msra.mxu2 %v2293_v11  ;;  %v2578_v0 = vld [vmem:[#allocation8 + $0x358] sm:$0xf0]  ;;  %v2892_v6 = vld [vmem:[#allocation8 + $0x234] sm:$0xf]  ;;  %v2570_v15 = vld [vmem:[#allocation8 + $0x348] sm:$0xf0]  ;;  %v2637_v25 = vor.u32 %v2942_v16, %v2634_v19 }
  0xe7   :  { %1589 = vmatpush.bf16.msrb.mxu1 %v2533_v10  ;;  %v2908_v8 = vld [vmem:[#allocation8 + $0x2b4] sm:$0xf]  ;;  %v2498_v10 = vld [vmem:[#allocation8 + $0x2b8] sm:$0xf0]  ;;  %v2581_v11 = vor.u32 %v2928_v63, %v2578_v0  ;;  %v2437_v13 = vor.u32 %v2892_v6, %v2434_v7  ;;  %v2906_v2 = vld [vmem:[#allocation8 + $0x2a4] sm:$0xf]  ;;  %v2573_v24 = vor.u32 %v2926_v14, %v2570_v15 }
  0xe8   :  { %v636_v33 = vmax.f32 %v614_v21, 0.0  ;;  %v637_v37 = vmax.f32 %v627_v27, 0.0  ;;  %v2501_v17 = vor.u32 %v2908_v8, %v2498_v10  ;;  %v2426_v21 = vld [vmem:[#allocation8 + $0x228] sm:$0xf0]  ;;  %v2924_v27 = vld [vmem:[#allocation8 + $0x334] sm:$0xf] }
  0xe9   :  { %1570 = vmatpush.bf16.msra.mxu3 %v2349_v42  ;;  %v2490_v22 = vld [vmem:[#allocation8 + $0x2a8] sm:$0xf0]  ;;  %v2429_v26 = vor.u32 %v2890_v20, %v2426_v21  ;;  %v2562_v28 = vld [vmem:[#allocation8 + $0x338] sm:$0xf0]  ;;  %v2964_v19 = vld [vmem:[#allocation10 + $0x70] sm:$0xff] }
  0xea   :  { %v3286_v50 = vpack.c.bf16 %v636_v33, %v636_v33  ;;  %v3288_v44 = vpack.c.bf16 %v637_v37, %v637_v37  ;;  %1577 = vmatpush.bf16.msrb.mxu0 %v2461_v29  ;;  %1557 = vmatpush.bf16.msra.mxu2 %v2285_v38  ;;  %v2940_v29 = vld [vmem:[#allocation8 + $0x3b4] sm:$0xf]  ;;  %v2493_v30 = vor.u32 %v2906_v2, %v2490_v22  ;;  %v2418_v33 = vld [vmem:[#allocation8 + $0x218] sm:$0xf0]  ;;  %v2922_v37 = vld [vmem:[#allocation8 + $0x324] sm:$0xf] }
  0xeb   :  { %1590 = vmatpush.bf16.msrb.mxu1 %v2525_v34  ;;  %v2904_v34 = vld [vmem:[#allocation8 + $0x294] sm:$0xf]  ;;  %v2565_v35 = vor.u32 %v2924_v27, %v2562_v28  ;;  %v2421_v36 = vor.u32 %v2888_v32, %v2418_v33  ;;  %v2554_v38 = vld [vmem:[#allocation8 + $0x328] sm:$0xf0]  ;;  %v2957_v0 = vld [vmem:[#allocation10 + $0x38] sm:$0xff] }
  0xec   :  { %1506 = vmatmul.bf16.vlgmr.msrb.gmra.mxu2 %v3286_v50  ;;  %1519 = vmatmul.bf16.vlgmr.msrb.gmra.mxu3 %v3288_v44  ;;  %v2618_v42 = vld [vmem:[#allocation8 + $0x3a8] sm:$0xf0]  ;;  %v2557_v49 = vor.u32 %v2922_v37, %v2554_v38  ;;  %v2953_v7 = vld [vmem:[#allocation10 + $0x18] sm:$0xff]  ;;  %v2960_v32 = vld [vmem:[#allocation10 + $0x50] sm:$0xff] }
  0xed   :  { %v615_v56 = vpop.f32.mrf.mxu2  ;;  %v628_v59 = vpop.f32.mrf.mxu3  ;;  %1615 = vmatpush.bf16.msrb.mxu3 %v2661_v45  ;;  %v2410_v45 = vld [vmem:[#allocation8 + $0x208] sm:$0xf0]  ;;  %v2621_v51 = vor.u32 %v2938_v39, %v2618_v42  ;;  %v2965_v15 = vld [vmem:[#allocation10 + $0x78] sm:$0xff] }
  0xee   :  { %1602 = vmatpush.bf16.msrb.mxu2 %v2597_v43  ;;  %1578 = vmatpush.bf16.msrb.mxu0 %v2453_v47  ;;  %v2886_v43 = vld [vmem:[#allocation8 + $0x204] sm:$0xf]  ;;  %v2936_v56 = vld [vmem:[#allocation8 + $0x394] sm:$0xf]  ;;  %v2538_v59 = vld [vmem:[#allocation8 + $0x308] sm:$0xf0] }
  0xef   :  { %1591 = vmatpush.bf16.msrb.mxu1 %v2517_v52  ;;  %v2902_v47 = vld [vmem:[#allocation8 + $0x284] sm:$0xf]  ;;  %v2413_v52 = vor.u32 %v2886_v43, %v2410_v45  ;;  %v2963_v2 = vld [vmem:[#allocation10 + $0x68] sm:$0xff]  ;;  %v2961_v28 = vld [vmem:[#allocation10 + $0x58] sm:$0xff] }
  0xf0   :  { %v2477_v55 = vor.u32 %v2902_v47, %v2474_v48 }
  0xf1   :  { %1616 = vmatpush.bf16.msrb.mxu3 %v2653_v61  ;;  %v2602_v61 = vld [vmem:[#allocation8 + $0x388] sm:$0xf0] }
  0xf2   :  { %1603 = vmatpush.bf16.msrb.mxu2 %v2589_v60  ;;  %1579 = vmatpush.bf16.msrb.mxu0 %v2445_v62  ;;  %v2934_v60 = vld [vmem:[#allocation8 + $0x384] sm:$0xf] }
  0xf3   :  { %1592 = vmatpush.bf16.msrb.mxu1 %v2509_v3  ;;  %v2605_v63 = vor.u32 %v2934_v60, %v2602_v61  ;;  %v2955_v3 = vld [vmem:[#allocation10 + $0x28] sm:$0xff] }
  0xf4   :  { %1532 = vmatmul.bf16.vlgmr.msra.gmra.mxu0 %v3264_v18  ;;  %1545 = vmatmul.bf16.vlgmr.msra.gmra.mxu1 %v3266_v23  ;;  %v2482_v18 = vld [vmem:[#allocation8 + $0x298] sm:$0xf0]  ;;  %v2629_v23 = vor.u32 %v2940_v29, %v2626_v31 }
  0xf5   :  { %1617 = vmatpush.bf16.msrb.mxu3 %v2645_v12  ;;  %v2485_v40 = vor.u32 %v2904_v34, %v2482_v18 }
  0xf6   :  { %1604 = vmatpush.bf16.msrb.mxu2 %v2581_v11  ;;  %1580 = vmatpush.bf16.msrb.mxu0 %v2437_v13  ;;  %v2950_v13 = vld [vmem:[#allocation10] sm:$0xff] }
  0xf7   :  { %1593 = vmatpush.bf16.msrb.mxu1 %v2501_v17 }
  0xf9   :  { %1618 = vmatpush.bf16.msrb.mxu3 %v2637_v25 }
  0xfa   :  { %1605 = vmatpush.bf16.msrb.mxu2 %v2573_v24  ;;  %1581 = vmatpush.bf16.msrb.mxu0 %v2429_v26  ;;  %v2962_v26 = vld [vmem:[#allocation10 + $0x60] sm:$0xff] }
  0xfb   :  { %1594 = vmatpush.bf16.msrb.mxu1 %v2493_v30 }
  0xfc   :  { %1558 = vmatmul.bf16.vlgmr.msra.gmra.mxu2 %v3270_v41  ;;  %1571 = vmatmul.bf16.vlgmr.msra.gmra.mxu3 %v3272_v46  ;;  %v2610_v41 = vld [vmem:[#allocation8 + $0x398] sm:$0xf0]  ;;  %v2918_v46 = vld [vmem:[#allocation8 + $0x304] sm:$0xf] }
  0xfd   :  { %1619 = vmatpush.bf16.msrb.mxu3 %v2629_v23  ;;  %v2613_v58 = vor.u32 %v2936_v56, %v2610_v41  ;;  %v2541_v62 = vor.u32 %v2918_v46, %v2538_v59  ;;  %v2959_v23 = vld [vmem:[#allocation10 + $0x48] sm:$0xff] }
  0xfe   :  { %1606 = vmatpush.bf16.msrb.mxu2 %v2565_v35  ;;  %1582 = vmatpush.bf16.msrb.mxu0 %v2421_v36 }
  0xff   :  { %1595 = vmatpush.bf16.msrb.mxu1 %v2485_v40  ;;  %v2958_v40 = vld [vmem:[#allocation10 + $0x40] sm:$0xff] }
 0x101   :  { %1620 = vmatpush.bf16.msrb.mxu3 %v2621_v51 }
 0x102   :  { %1607 = vmatpush.bf16.msrb.mxu2 %v2557_v49  ;;  %1583 = vmatpush.bf16.msrb.mxu0 %v2413_v52 }
 0x103   :  { %1596 = vmatpush.bf16.msrb.mxu1 %v2477_v55 }
 0x105   :  { %1584 = vmatmul.bf16.vlgmr.msrb.gmra.mxu0 %v3279_v5  ;;  %1621 = vmatpush.bf16.msrb.mxu3 %v2613_v58 }
 0x106   :  { %1608 = vmatpush.bf16.msrb.mxu2 %v2549_v57  ;;  %1597 = vmatmul.bf16.vlgmr.msrb.gmra.mxu1 %v3282_v9  ;;  %v2952_v9 = vld [vmem:[#allocation10 + $0x10] sm:$0xff] }
 0x107   :  { %1764 = vmatpush.bf16.msra.mxu0 %v2957_v0  ;;  %1777 = vmatpush.bf16.msra.mxu1 %v2965_v15 }
 0x109   :  { %1622 = vmatpush.bf16.msrb.mxu3 %v2605_v63 }
 0x10a   :  { %1609 = vmatpush.bf16.msrb.mxu2 %v2541_v62 }
 0x10b   :  { %1765 = vmatpush.bf16.msra.mxu0 %v2956_v1  ;;  %1778 = vmatpush.bf16.msra.mxu1 %v2964_v19 }
 0x10c   :  { %1623 = vmatmul.bf16.vlgmr.msrb.gmra.mxu3 %v3288_v44  ;;  %v774_v44 = vld [vmem:[%s3316_s4] sm:$0x3] }
 0x10d   :  { %1610 = vmatmul.bf16.vlgmr.msrb.gmra.mxu2 %v3286_v50  ;;  %v2951_v50 = vld [vmem:[#allocation10 + $0x8] sm:$0xff]  ;;  %v776_v14 = vperm.slane %v774_v44, 0  ;;  %v777_v47 = vperm.slane %v774_v44, 1 }
 0x10f   :  { %1766 = vmatpush.bf16.msra.mxu0 %v2955_v3  ;;  %1779 = vmatpush.bf16.msra.mxu1 %v2963_v2 }
 0x113   :  { %1767 = vmatpush.bf16.msra.mxu0 %v2954_v4  ;;  %1780 = vmatpush.bf16.msra.mxu1 %v2962_v26 }
 0x117   :  { %1768 = vmatpush.bf16.msra.mxu0 %v2953_v7  ;;  %1781 = vmatpush.bf16.msra.mxu1 %v2961_v28 }
 0x11b   :  { %1769 = vmatpush.bf16.msra.mxu0 %v2952_v9  ;;  %1782 = vmatpush.bf16.msra.mxu1 %v2960_v32  ;;  %v2973_v9 = vld [vmem:[#allocation11 + $0x38] sm:$0xff] }
 0x11c   :  { %1860 = vmatpush.bf16.msra.mxu2 %v2973_v9 }
 0x11f   :  { %1770 = vmatpush.bf16.msra.mxu0 %v2951_v50  ;;  %1783 = vmatpush.bf16.msra.mxu1 %v2959_v23  ;;  %v2969_v50 = vld [vmem:[#allocation11 + $0x18] sm:$0xff] }
 0x123   :  { %1771 = vmatpush.bf16.msra.mxu0 %v2950_v13  ;;  %1784 = vmatpush.bf16.msra.mxu1 %v2958_v40  ;;  %v2967_v13 = vld [vmem:[#allocation11 + $0x8] sm:$0xff] }
 0x141   :  { %v1429_v6 = vpop.f32.mrf.mxu0  ;;  %v1442_v5 = vpop.f32.mrf.mxu1 }
 0x142   :  { %v1430_v20 = vadd.f32 %v1429_v6, %v776_v14  ;;  %v2966_v14 = vld [vmem:[#allocation11] sm:$0xff] }
 0x144   :  { %v1443_v21 = vadd.f32 %v1442_v5, %v1430_v20 }
 0x149   :  { %v1431_v8 = vpop.f32.mrf.mxu0  ;;  %v1444_v10 = vpop.f32.mrf.mxu1 }
 0x14a   :  { %v2972_v8 = vld [vmem:[#allocation11 + $0x30] sm:$0xff]  ;;  %v2971_v10 = vld [vmem:[#allocation11 + $0x28] sm:$0xff] }
 0x14b   :  { %1861 = vmatpush.bf16.msra.mxu2 %v2972_v8 }
 0x14f   :  { %v1468_v12 = vpop.f32.mrf.mxu3  ;;  %1862 = vmatpush.bf16.msra.mxu2 %v2971_v10 }
 0x150   :  { %v1455_v11 = vpop.f32.mrf.mxu2 }
 0x151   :  { %v1456_v25 = vadd.f32 %v1455_v11, %v1443_v21  ;;  %v2970_v11 = vld [vmem:[#allocation11 + $0x20] sm:$0xff] }
 0x153   :  { %v1469_v27 = vadd.f32 %v1468_v12, %v1456_v25  ;;  %1863 = vmatpush.bf16.msra.mxu2 %v2970_v11  ;;  %v2968_v12 = vld [vmem:[#allocation11 + $0x10] sm:$0xff] }
 0x157   :  { %v1470_v17 = vpop.f32.mrf.mxu3  ;;  %1864 = vmatpush.bf16.msra.mxu2 %v2969_v50 }
 0x158   :  { %v1457_v16 = vpop.f32.mrf.mxu2 }
 0x159   :  { %v2987_v16 = vld [vmem:[%s3318_s6] ss:$0 sm:$0xff] }
 0x15b   :  { %1865 = vmatpush.bf16.msra.mxu2 %v2968_v12 }
 0x15f   :  { %1866 = vmatpush.bf16.msra.mxu2 %v2967_v13 }
 0x161   :  { %v1481_v22 = vpop.f32.mrf.mxu0  ;;  %v1494_v24 = vpop.f32.mrf.mxu1 }
 0x162   :  { %v1482_v29 = vadd.f32 %v1481_v22, %v1469_v27 }
 0x163   :  { %1867 = vmatpush.bf16.msra.mxu2 %v2966_v14 }
 0x164   :  { %v1495_v33 = vadd.f32 %v1494_v24, %v1482_v29  ;;  %v2988_v24 = vld [vmem:[%s3320_s8] ss:$0 sm:$0xff] }
 0x169   :  { %v1483_v30 = vpop.f32.mrf.mxu0  ;;  %v1496_v31 = vpop.f32.mrf.mxu1 }
 0x16f   :  { %v1507_v34 = vpop.f32.mrf.mxu2  ;;  %v1520_v35 = vpop.f32.mrf.mxu3 }
 0x170   :  { %v1508_v18 = vadd.f32 %v1507_v34, %v1495_v33 }
 0x171   :  { %v1533_v37 = vpop.f32.mrf.mxu0  ;;  %v1546_v38 = vpop.f32.mrf.mxu1 }
 0x172   :  { %v1521_v36 = vadd.f32 %v1520_v35, %v1508_v18  ;;  %v1534_v51 = vadd.f32 %v1533_v37, %v777_v47 }
 0x174   :  { %v1628_v39 = vmax.f32 %v1521_v36, 0.0  ;;  %v1547_v54 = vadd.f32 %v1546_v38, %v1534_v51 }
 0x176   :  { %v1630_v42 = vpack.c.bf16 %v1628_v39, %v1628_v39 }
 0x177   :  { %v1509_v43 = vpop.f32.mrf.mxu2  ;;  %v1522_v45 = vpop.f32.mrf.mxu3 }
 0x178   :  { %1772 = vmatmul.bf16.vlgmr.msra.gmra.mxu0 %v1630_v42 }
 0x179   :  { %v1535_v48 = vpop.f32.mrf.mxu0  ;;  %v1548_v49 = vpop.f32.mrf.mxu1 }
 0x17f   :  { %v1559_v52 = vpop.f32.mrf.mxu2  ;;  %v1572_v53 = vpop.f32.mrf.mxu3 }
 0x180   :  { %v1560_v55 = vadd.f32 %v1559_v52, %v1547_v54 }
 0x182   :  { %v1585_v56 = vpop.f32.mrf.mxu0  ;;  %v1573_v57 = vadd.f32 %v1572_v53, %v1560_v55 }
 0x183   :  { %v1598_v41 = vpop.f32.mrf.mxu1 }
 0x184   :  { %v1586_v59 = vadd.f32 %v1585_v56, %v1573_v57 }
 0x186   :  { %v1599_v62 = vadd.f32 %v1598_v41, %v1586_v59 }
 0x187   :  { %v1561_v58 = vpop.f32.mrf.mxu2  ;;  %v1574_v46 = vpop.f32.mrf.mxu3 }
 0x18a   :  { %v1587_v60 = vpop.f32.mrf.mxu0 }
 0x18b   :  { %v1600_v61 = vpop.f32.mrf.mxu1 }
 0x18f   :  { %v1624_v1 = vpop.f32.mrf.mxu3 }
 0x190   :  { %v1611_v63 = vpop.f32.mrf.mxu2 }
 0x191   :  { %v1612_v0 = vadd.f32 %v1611_v63, %v1599_v62 }
 0x193   :  { %v1625_v3 = vadd.f32 %v1624_v1, %v1612_v0 }
 0x195   :  { %v1629_v4 = vmax.f32 %v1625_v3, 0.0 }
 0x197   :  { %v1631_v6 = vpack.c.bf16 %v1629_v4, %v1629_v4  ;;  %v1626_v7 = vpop.f32.mrf.mxu3 }
 0x198   :  { %v1613_v5 = vpop.f32.mrf.mxu2 }
 0x199   :  { %1785 = vmatmul.bf16.vlgmr.msra.gmra.mxu1 %v1631_v6 }
 0x1f5   :  { %v1773_v44 = vpop.f32.mrf.mxu0 }
 0x1f6   :  { %v1774_v17 = vadd.f32 %v2987_v16, %v1773_v44 }
 0x1fd   :  { %v1775_v15 = vpop.f32.mrf.mxu0 }
 0x216   :  { %v1786_v19 = vpop.f32.mrf.mxu1 }
 0x217   :  { %v1787_v20 = vadd.f32 %v1786_v19, %v1774_v17 }
 0x219   :  { %v1790_v21 = vmax.f32 %v1787_v20, 0.0 }
 0x21b   :  { %v1791_v2 = vpack.c.bf16 %v1790_v21, %v1790_v21 }
 0x21d   :  { %1868 = vmatmul.bf16.vlgmr.msra.gmra.mxu2 %v1791_v2 }
 0x21e   :  { %v1788_v22 = vpop.f32.mrf.mxu1 }
 0x2a0   :  { %v1869_v25 = vpop.f32.mrf.mxu2 }
 0x2a1   :  { %v1870_v26 = vadd.f32 %v2988_v24, %v1869_v25 }
 0x2a3   :  { %1873 = vst [vmem:[#allocation13] sm:$0xff] %v1870_v26 }
 0x2a4   :  { %1884 = dma.vmem_to_hbm [thread:$0]  %s1880_s23, 128, %s1882_s26, [#allocation4]  }
 0x2a8   :  { %v1871_v27 = vpop.f32.mrf.mxu2 }
 0x2a9   :  { %3165 = dma.done.wait [#allocation4], 128  }
 0x2aa   :  { %3166 = vsyncadd [#allocation4], 4294967168 }
 0x2ab   :  { %1889 = vsyncpa [#allocation3], 1 }
 0x2ac   :  { %1890 = vsyncpa [#allocation6], 1 }
 0x2ad   :  { %1891 = vsyncpa [#allocation9], 1 }
 0x2ae   :  { %1892 = vsyncpa [#allocation12], 1 }
 0x2af   :  { %1893 = vsyncpa [#allocation4], 1 }

// kernel: tpu_custom_call.1
= control target key start
LH: loop header
LB: loop body
LE: loop exit
PB: predicated region body
PF: predicated region fallthrough
CT: control target
= control target key end

     0   :  { %14 = vsyncpa [#allocation3], 0  ;;  %s3312_s0 = inlined_call_operand.hbm [shape: bf16[8,128], index: 0, kind: input, shape index: {}]   ;;  %s3313_s1 = inlined_call_operand.hbm [shape: bf16[128,1024], index: 1, kind: input, shape index: {}]   ;;  %s3314_s2 = inlined_call_operand.hbm [shape: f32[1,1024], index: 2, kind: input, shape index: {}]   ;;  %s3315_s3 = inlined_call_operand.hbm [shape: bf16[1024,256], index: 3, kind: input, shape index: {}]   ;;  %s3316_s4 = inlined_call_operand.vmem [shape: f32[1,256], index: 4, kind: input, shape index: {}]   ;;  %s3317_s5 = inlined_call_operand.hbm [shape: bf16[256,128], index: 5, kind: input, shape index: {}]   ;;  %s3318_s6 = inlined_call_operand.vmem [shape: f32[1,128], index: 6, kind: input, shape index: {}]   ;;  %s3319_s7 = inlined_call_operand.hbm [shape: bf16[128,128], index: 7, kind: input, shape index: {}]   ;;  %s3320_s8 = inlined_call_operand.vmem [shape: f32[1,128], index: 8, kind: input, shape index: {}]   ;;  %s3321_s9 = inlined_call_operand.hbm [shape: f32[8,128], index: 9, kind: output, shape index: {}]  }
   0x1   :  { %15 = vsyncpa [#allocation6], 0 }
   0x2   :  { %16 = vsyncpa [#allocation9], 0 }
   0x3   :  { %17 = vsyncpa [#allocation12], 0  ;;  %s34_s11 = sshll.u32 %s3313_s1, 4  ;;  %s35_s11 = int_to_ptr.hbm [resolvable:$true] %s34_s11 }
   0x4   :  { %18 = vsyncpa [#allocation4], 0  ;;  %s3167_s12 = smov [#allocation5]   ;;  %s58_s16 = sshll.u32 %s3315_s3, 4  ;;  %s59_s16 = int_to_ptr.hbm [resolvable:$true] %s58_s16 }
   0x5   :  { %s36_s13 = sshll.u32 %s3167_s12, 4  ;;  %s3168_s17 = smov 512   ;;  %s37_s13 = int_to_ptr.vmem [resolvable:$true] %s36_s13 }
   0x6   :  { %s3169_s18 = smov 32   ;;  %s3170_s19 = smov [#allocation8]  }
   0x7   :  { %42 = dma.hbm_to_vmem [thread:$0]  %s35_s11, 8192, %s37_s13, [#allocation6], %s3168_s17, %s3168_s17, %s3169_s18  }
   0x8   :  { %s60_s20 = sshll.u32 %s3170_s19, 4  ;;  %s3171_s21 = smov 128   ;;  %s61_s20 = int_to_ptr.vmem [resolvable:$true] %s60_s20 }
   0x9   :  { %s3172_s22 = smov 8   ;;  %s24_s24 = sshll.u32 %s3312_s0, 4  ;;  %s25_s24 = int_to_ptr.hbm [resolvable:$true] %s24_s24 }
   0xa   :  { %66 = dma.hbm_to_vmem [thread:$0]  %s59_s16, 16384, %s61_s20, [#allocation9], %s3171_s21, %s3171_s21, %s3172_s22  }
   0xb   :  { %s3173_s25 = smov [#allocation2]   ;;  %s48_s28 = sshll.u32 %s3314_s2, 4  ;;  %s49_s28 = int_to_ptr.hbm [resolvable:$true] %s48_s28 }
   0xc   :  { %s26_s26 = sshll.u32 %s3173_s25, 4  ;;  %s3174_s29 = smov [#allocation7]   ;;  %s27_s26 = int_to_ptr.vmem [resolvable:$true] %s26_s26 }
   0xd   :  { %29 = dma.hbm_to_vmem [thread:$0]  %s25_s24, 64, %s27_s26, [#allocation3]  }
   0xe   :  { %s50_s30 = sshll.u32 %s3174_s29, 4  ;;  %s73_s12 = sshll.u32 %s3317_s5, 4  ;;  %s51_s30 = int_to_ptr.vmem [resolvable:$true] %s50_s30  ;;  %s74_s12 = int_to_ptr.hbm [resolvable:$true] %s73_s12 }
   0xf   :  { %53 = dma.hbm_to_vmem [thread:$0]  %s49_s28, 128, %s51_s30, [#allocation6]  }
  0x10   :  { %s3175_s0 = smov [#allocation10]   ;;  %s88_s16 = sshll.u32 %s3319_s7, 4  ;;  %s89_s16 = int_to_ptr.hbm [resolvable:$true] %s88_s16 }
  0x11   :  { %s75_s13 = sshll.u32 %s3175_s0, 4  ;;  %s3176_s17 = smov 64   ;;  %s76_s13 = int_to_ptr.vmem [resolvable:$true] %s75_s13 }
  0x12   :  { %s3177_s2 = smov 4   ;;  %s3178_s18 = smov [#allocation11]  }
  0x13   :  { %81 = dma.hbm_to_vmem [thread:$0]  %s74_s12, 2048, %s76_s13, [#allocation9], %s3176_s17, %s3176_s17, %s3177_s2  }
  0x14   :  { %s90_s19 = sshll.u32 %s3178_s18, 4  ;;  %s91_s19 = int_to_ptr.vmem [resolvable:$true] %s90_s19 }
  0x15   :  { %96 = dma.hbm_to_vmem [thread:$0]  %s89_s16, 1024, %s91_s19, [#allocation12], %s3176_s17, %s3176_s17, %s3177_s2  }
  0x16   :  { %3157 = dma.done.wait [#allocation3], 64  }
  0x17   :  { %3158 = vsyncadd [#allocation3], 4294967232 }
  0x18   :  { %3159 = dma.done.wait [#allocation6], 8320  }
  0x19   :  { %3160 = vsyncadd [#allocation6], 4294958976 }
  0x1a   :  { %3161 = dma.done.wait [#allocation9], 18432  }
  0x1b   :  { %3162 = vsyncadd [#allocation9], 4294948864 }
  0x1c   :  { %3163 = dma.done.wait [#allocation12], 1024  }
  0x1d   :  { %3164 = vsyncadd [#allocation12], 4294966272  ;;  %v2120_v0 = vld [vmem:[#allocation5 + $0x1c0] sm:$0xf]  ;;  %v2814_v2 = vld [vmem:[#allocation5 + $0x1c4] sm:$0xf] }
  0x1e   :  { %v2818_v1 = vld [vmem:[#allocation5 + $0x1dc] sm:$0xf0]  ;;  %v2122_v4 = vld [vmem:[#allocation5 + $0x1e0] sm:$0xf0]  ;;  %v2128_v5 = vld [vmem:[#allocation5 + $0x1c8] sm:$0xf] }
  0x1f   :  { %v2121_v3 = vor.u32 %v2818_v1, %v2120_v0  ;;  %v2819_v6 = vld [vmem:[#allocation5 + $0x1e4] sm:$0xf0]  ;;  %v2125_v7 = vor.u32 %v2814_v2, %v2122_v4  ;;  %v2815_v9 = vld [vmem:[#allocation5 + $0x1cc] sm:$0xf]  ;;  %v2088_v11 = vld [vmem:[#allocation5 + $0x180] sm:$0xf] }
  0x20   :  { %v2129_v8 = vor.u32 %v2819_v6, %v2128_v5  ;;  %v2130_v10 = vld [vmem:[#allocation5 + $0x1e8] sm:$0xf0]  ;;  %v2810_v13 = vld [vmem:[#allocation5 + $0x19c] sm:$0xf0]  ;;  %v2806_v14 = vld [vmem:[#allocation5 + $0x184] sm:$0xf] }
  0x21   :  { %526 = vmatpush.bf16.msra.mxu0 %v2121_v3  ;;  %v2133_v12 = vor.u32 %v2815_v9, %v2130_v10  ;;  %v2090_v15 = vld [vmem:[#allocation5 + $0x1a0] sm:$0xf0]  ;;  %539 = vmatpush.bf16.msra.mxu1 %v2125_v7  ;;  %v2089_v16 = vor.u32 %v2810_v13, %v2088_v11  ;;  %v2096_v18 = vld [vmem:[#allocation5 + $0x188] sm:$0xf]  ;;  %v2807_v20 = vld [vmem:[#allocation5 + $0x18c] sm:$0xf] }
  0x22   :  { %552 = vmatpush.bf16.msra.mxu2 %v2129_v8  ;;  %v2093_v17 = vor.u32 %v2806_v14, %v2090_v15  ;;  %v2811_v19 = vld [vmem:[#allocation5 + $0x1a4] sm:$0xf0]  ;;  %v2098_v22 = vld [vmem:[#allocation5 + $0x1a8] sm:$0xf0]  ;;  %v2056_v23 = vld [vmem:[#allocation5 + $0x140] sm:$0xf] }
  0x23   :  { %565 = vmatpush.bf16.msra.mxu3 %v2133_v12  ;;  %v2097_v21 = vor.u32 %v2811_v19, %v2096_v18  ;;  %v2802_v24 = vld [vmem:[#allocation5 + $0x15c] sm:$0xf0]  ;;  %v2101_v25 = vor.u32 %v2807_v20, %v2098_v22  ;;  %v2798_v26 = vld [vmem:[#allocation5 + $0x144] sm:$0xf]  ;;  %v2064_v28 = vld [vmem:[#allocation5 + $0x148] sm:$0xf] }
  0x24   :  { %v2058_v27 = vld [vmem:[#allocation5 + $0x160] sm:$0xf0]  ;;  %v2057_v29 = vor.u32 %v2802_v24, %v2056_v23  ;;  %v2803_v30 = vld [vmem:[#allocation5 + $0x164] sm:$0xf0]  ;;  %v2799_v31 = vld [vmem:[#allocation5 + $0x14c] sm:$0xf] }
  0x25   :  { %527 = vmatpush.bf16.msra.mxu0 %v2089_v16  ;;  %v2066_v32 = vld [vmem:[#allocation5 + $0x168] sm:$0xf0]  ;;  %540 = vmatpush.bf16.msra.mxu1 %v2093_v17  ;;  %v2061_v33 = vor.u32 %v2798_v26, %v2058_v27  ;;  %v2065_v34 = vor.u32 %v2803_v30, %v2064_v28  ;;  %v2024_v35 = vld [vmem:[#allocation5 + $0x100] sm:$0xf]  ;;  %v2790_v37 = vld [vmem:[#allocation5 + $0x104] sm:$0xf] }
  0x26   :  { %553 = vmatpush.bf16.msra.mxu2 %v2097_v21  ;;  %v2794_v36 = vld [vmem:[#allocation5 + $0x11c] sm:$0xf0]  ;;  %v2069_v38 = vor.u32 %v2799_v31, %v2066_v32  ;;  %v2026_v39 = vld [vmem:[#allocation5 + $0x120] sm:$0xf0]  ;;  %v2032_v40 = vld [vmem:[#allocation5 + $0x108] sm:$0xf] }
  0x27   :  { %566 = vmatpush.bf16.msra.mxu3 %v2101_v25  ;;  %v2795_v41 = vld [vmem:[#allocation5 + $0x124] sm:$0xf0]  ;;  %v2791_v42 = vld [vmem:[#allocation5 + $0x10c] sm:$0xf]  ;;  %v2025_v44 = vor.u32 %v2794_v36, %v2024_v35  ;;  %v2029_v45 = vor.u32 %v2790_v37, %v2026_v39  ;;  %v1992_v47 = vld [vmem:[#allocation5 + $0xc0] sm:$0xf] }
  0x28   :  { %v2034_v43 = vld [vmem:[#allocation5 + $0x128] sm:$0xf0]  ;;  %v2033_v46 = vor.u32 %v2795_v41, %v2032_v40  ;;  %v2786_v48 = vld [vmem:[#allocation5 + $0xdc] sm:$0xf0]  ;;  %v2782_v49 = vld [vmem:[#allocation5 + $0xc4] sm:$0xf] }
  0x29   :  { %528 = vmatpush.bf16.msra.mxu0 %v2057_v29  ;;  %541 = vmatpush.bf16.msra.mxu1 %v2061_v33  ;;  %v2037_v50 = vor.u32 %v2791_v42, %v2034_v43  ;;  %v1994_v51 = vld [vmem:[#allocation5 + $0xe0] sm:$0xf0]  ;;  %v2000_v52 = vld [vmem:[#allocation5 + $0xc8] sm:$0xf]  ;;  %v2783_v54 = vld [vmem:[#allocation5 + $0xcc] sm:$0xf]  ;;  %v1993_v56 = vor.u32 %v2786_v48, %v1992_v47 }
  0x2a   :  { %554 = vmatpush.bf16.msra.mxu2 %v2065_v34  ;;  %v2787_v53 = vld [vmem:[#allocation5 + $0xe4] sm:$0xf0]  ;;  %v2002_v55 = vld [vmem:[#allocation5 + $0xe8] sm:$0xf0]  ;;  %v1997_v57 = vor.u32 %v2782_v49, %v1994_v51  ;;  %v1960_v59 = vld [vmem:[#allocation5 + $0x80] sm:$0xf] }
  0x2b   :  { %567 = vmatpush.bf16.msra.mxu3 %v2069_v38  ;;  %v2001_v58 = vor.u32 %v2787_v53, %v2000_v52  ;;  %v2778_v60 = vld [vmem:[#allocation5 + $0x9c] sm:$0xf0]  ;;  %v2774_v61 = vld [vmem:[#allocation5 + $0x84] sm:$0xf]  ;;  %v2005_v62 = vor.u32 %v2783_v54, %v2002_v55  ;;  %v1968_v0 = vld [vmem:[#allocation5 + $0x88] sm:$0xf] }
  0x2c   :  { %v1962_v63 = vld [vmem:[#allocation5 + $0xa0] sm:$0xf0]  ;;  %v2779_v1 = vld [vmem:[#allocation5 + $0xa4] sm:$0xf0]  ;;  %v2775_v2 = vld [vmem:[#allocation5 + $0x8c] sm:$0xf]  ;;  %v1961_v4 = vor.u32 %v2778_v60, %v1960_v59 }
  0x2d   :  { %529 = vmatpush.bf16.msra.mxu0 %v2025_v44  ;;  %542 = vmatpush.bf16.msra.mxu1 %v2029_v45  ;;  %v1970_v3 = vld [vmem:[#allocation5 + $0xa8] sm:$0xf0]  ;;  %v1965_v5 = vor.u32 %v2774_v61, %v1962_v63  ;;  %v1969_v6 = vor.u32 %v2779_v1, %v1968_v0  ;;  %v1928_v7 = vld [vmem:[#allocation5 + $0x40] sm:$0xf]  ;;  %v2766_v9 = vld [vmem:[#allocation5 + $0x44] sm:$0xf] }
  0x2e   :  { %555 = vmatpush.bf16.msra.mxu2 %v2033_v46  ;;  %v2770_v8 = vld [vmem:[#allocation5 + $0x5c] sm:$0xf0]  ;;  %v1973_v10 = vor.u32 %v2775_v2, %v1970_v3  ;;  %v1930_v11 = vld [vmem:[#allocation5 + $0x60] sm:$0xf0]  ;;  %v1936_v12 = vld [vmem:[#allocation5 + $0x48] sm:$0xf] }
  0x2f   :  { %568 = vmatpush.bf16.msra.mxu3 %v2037_v50  ;;  %v2771_v13 = vld [vmem:[#allocation5 + $0x64] sm:$0xf0]  ;;  %v2767_v14 = vld [vmem:[#allocation5 + $0x4c] sm:$0xf]  ;;  %v1929_v16 = vor.u32 %v2770_v8, %v1928_v7  ;;  %v1896_v17 = vld [vmem:[#allocation5] sm:$0xf]  ;;  %v1933_v19 = vor.u32 %v2766_v9, %v1930_v11 }
  0x30   :  { %v1938_v15 = vld [vmem:[#allocation5 + $0x68] sm:$0xf0]  ;;  %v2762_v18 = vld [vmem:[#allocation5 + $0x1c] sm:$0xf0]  ;;  %v1937_v20 = vor.u32 %v2771_v13, %v1936_v12  ;;  %v2758_v21 = vld [vmem:[#allocation5 + $0x4] sm:$0xf] }
  0x31   :  { %530 = vmatpush.bf16.msra.mxu0 %v1993_v56  ;;  %543 = vmatpush.bf16.msra.mxu1 %v1997_v57  ;;  %v1898_v22 = vld [vmem:[#allocation5 + $0x20] sm:$0xf0]  ;;  %v1904_v23 = vld [vmem:[#allocation5 + $0x8] sm:$0xf]  ;;  %v1941_v24 = vor.u32 %v2767_v14, %v1938_v15  ;;  %v2759_v26 = vld [vmem:[#allocation5 + $0xc] sm:$0xf]  ;;  %v1897_v31 = vor.u32 %v2762_v18, %v1896_v17 }
  0x32   :  { %556 = vmatpush.bf16.msra.mxu2 %v2001_v58  ;;  %v2763_v25 = vld [vmem:[#allocation5 + $0x24] sm:$0xf0]  ;;  %v1906_v27 = vld [vmem:[#allocation5 + $0x28] sm:$0xf0]  ;;  %v2136_v28 = vld [vmem:[#allocation5 + $0x1d0] sm:$0xf]  ;;  %v1901_v35 = vor.u32 %v2758_v21, %v1898_v22 }
  0x33   :  { %569 = vmatpush.bf16.msra.mxu3 %v2005_v62  ;;  %v2820_v29 = vld [vmem:[#allocation5 + $0x1ec] sm:$0xf0]  ;;  %v2816_v30 = vld [vmem:[#allocation5 + $0x1d4] sm:$0xf]  ;;  %v2144_v33 = vld [vmem:[#allocation5 + $0x1d8] sm:$0xf]  ;;  %v1905_v36 = vor.u32 %v2763_v25, %v1904_v23  ;;  %v1909_v39 = vor.u32 %v2759_v26, %v1906_v27 }
  0x34   :  { %v2138_v32 = vld [vmem:[#allocation5 + $0x1f0] sm:$0xf0]  ;;  %v2821_v34 = vld [vmem:[#allocation5 + $0x1f4] sm:$0xf0]  ;;  %v2817_v37 = vld [vmem:[#allocation5 + $0x1dc] sm:$0xf]  ;;  %v2137_v40 = vor.u32 %v2820_v29, %v2136_v28 }
  0x35   :  { %531 = vmatpush.bf16.msra.mxu0 %v1961_v4  ;;  %544 = vmatpush.bf16.msra.mxu1 %v1965_v5  ;;  %v2146_v38 = vld [vmem:[#allocation5 + $0x1f8] sm:$0xf0]  ;;  %v2141_v41 = vor.u32 %v2816_v30, %v2138_v32  ;;  %v2145_v42 = vor.u32 %v2821_v34, %v2144_v33  ;;  %v2104_v43 = vld [vmem:[#allocation5 + $0x190] sm:$0xf]  ;;  %v2808_v45 = vld [vmem:[#allocation5 + $0x194] sm:$0xf] }
  0x36   :  { %557 = vmatpush.bf16.msra.mxu2 %v1969_v6  ;;  %v2812_v44 = vld [vmem:[#allocation5 + $0x1ac] sm:$0xf0]  ;;  %v2149_v46 = vor.u32 %v2817_v37, %v2146_v38  ;;  %v2106_v47 = vld [vmem:[#allocation5 + $0x1b0] sm:$0xf0]  ;;  %v2112_v48 = vld [vmem:[#allocation5 + $0x198] sm:$0xf] }
  0x37   :  { %570 = vmatpush.bf16.msra.mxu3 %v1973_v10  ;;  %v2813_v49 = vld [vmem:[#allocation5 + $0x1b4] sm:$0xf0]  ;;  %v3248_v50 = vld [vmem:[#allocation2] sm:$0xf]  ;;  %v2105_v53 = vor.u32 %v2812_v44, %v2104_v43  ;;  %v2109_v54 = vor.u32 %v2808_v45, %v2106_v47  ;;  %v2072_v56 = vld [vmem:[#allocation5 + $0x150] sm:$0xf] }
  0x38   :  { %v2809_v51 = vld [vmem:[#allocation5 + $0x19c] sm:$0xf]  ;;  %v2113_v55 = vor.u32 %v2813_v49, %v2112_v48  ;;  %v2804_v57 = vld [vmem:[#allocation5 + $0x16c] sm:$0xf0]  ;;  %v2800_v58 = vld [vmem:[#allocation5 + $0x154] sm:$0xf] }
  0x39   :  { %532 = vmatpush.bf16.msra.mxu0 %v1929_v16  ;;  %545 = vmatpush.bf16.msra.mxu1 %v1933_v19  ;;  %v2114_v52 = vld [vmem:[#allocation5 + $0x1b8] sm:$0xf0]  ;;  %v2074_v60 = vld [vmem:[#allocation5 + $0x170] sm:$0xf0]  ;;  %v2080_v61 = vld [vmem:[#allocation5 + $0x158] sm:$0xf]  ;;  %v2073_v1 = vor.u32 %v2804_v57, %v2072_v56 }
  0x3a   :  { %558 = vmatpush.bf16.msra.mxu2 %v1937_v20  ;;  %v2117_v59 = vor.u32 %v2809_v51, %v2114_v52  ;;  %v2805_v62 = vld [vmem:[#allocation5 + $0x174] sm:$0xf0]  ;;  %v2801_v63 = vld [vmem:[#allocation5 + $0x15c] sm:$0xf]  ;;  %v2077_v2 = vor.u32 %v2800_v58, %v2074_v60  ;;  %v2040_v4 = vld [vmem:[#allocation5 + $0x110] sm:$0xf] }
  0x3b   :  { %571 = vmatpush.bf16.msra.mxu3 %v1941_v24  ;;  %v2082_v0 = vld [vmem:[#allocation5 + $0x178] sm:$0xf0]  ;;  %v2081_v3 = vor.u32 %v2805_v62, %v2080_v61  ;;  %v2796_v5 = vld [vmem:[#allocation5 + $0x12c] sm:$0xf0]  ;;  %v2792_v6 = vld [vmem:[#allocation5 + $0x114] sm:$0xf] }
  0x3c   :  { %v2085_v7 = vor.u32 %v2801_v63, %v2082_v0  ;;  %v2042_v8 = vld [vmem:[#allocation5 + $0x130] sm:$0xf0]  ;;  %v2048_v9 = vld [vmem:[#allocation5 + $0x118] sm:$0xf]  ;;  %v2793_v11 = vld [vmem:[#allocation5 + $0x11c] sm:$0xf]  ;;  %v2041_v13 = vor.u32 %v2796_v5, %v2040_v4 }
  0x3d   :  { %533 = vmatpush.bf16.msra.mxu0 %v1897_v31  ;;  %546 = vmatpush.bf16.msra.mxu1 %v1901_v35  ;;  %v2797_v10 = vld [vmem:[#allocation5 + $0x134] sm:$0xf0]  ;;  %v2050_v12 = vld [vmem:[#allocation5 + $0x138] sm:$0xf0]  ;;  %v2045_v14 = vor.u32 %v2792_v6, %v2042_v8  ;;  %v2008_v16 = vld [vmem:[#allocation5 + $0xd0] sm:$0xf] }
  0x3e   :  { %559 = vmatpush.bf16.msra.mxu2 %v1905_v36  ;;  %v2049_v15 = vor.u32 %v2797_v10, %v2048_v9  ;;  %v2788_v17 = vld [vmem:[#allocation5 + $0xec] sm:$0xf0]  ;;  %v2784_v18 = vld [vmem:[#allocation5 + $0xd4] sm:$0xf]  ;;  %v2053_v19 = vor.u32 %v2793_v11, %v2050_v12  ;;  %v2016_v21 = vld [vmem:[#allocation5 + $0xd8] sm:$0xf] }
  0x3f   :  { %572 = vmatpush.bf16.msra.mxu3 %v1909_v39  ;;  %v2010_v20 = vld [vmem:[#allocation5 + $0xf0] sm:$0xf0]  ;;  %v2789_v22 = vld [vmem:[#allocation5 + $0xf4] sm:$0xf0]  ;;  %v2785_v23 = vld [vmem:[#allocation5 + $0xdc] sm:$0xf]  ;;  %v2009_v25 = vor.u32 %v2788_v17, %v2008_v16 }
  0x40   :  { %534 = vmatmul.bf16.vlgmr.msra.gmra.mxu0 %v3248_v50  ;;  %547 = vmatmul.bf16.vlgmr.msra.gmra.mxu1 %v3248_v50  ;;  %v2018_v24 = vld [vmem:[#allocation5 + $0xf8] sm:$0xf0]  ;;  %v2013_v26 = vor.u32 %v2784_v18, %v2010_v20  ;;  %v2017_v27 = vor.u32 %v2789_v22, %v2016_v21  ;;  %v1976_v28 = vld [vmem:[#allocation5 + $0x90] sm:$0xf]  ;;  %v2776_v30 = vld [vmem:[#allocation5 + $0x94] sm:$0xf] }
  0x41   :  { %578 = vmatpush.bf16.msrb.mxu0 %v2137_v40  ;;  %591 = vmatpush.bf16.msrb.mxu1 %v2141_v41  ;;  %v2780_v29 = vld [vmem:[#allocation5 + $0xac] sm:$0xf0]  ;;  %v2021_v31 = vor.u32 %v2785_v23, %v2018_v24  ;;  %v1978_v32 = vld [vmem:[#allocation5 + $0xb0] sm:$0xf0]  ;;  %v1984_v33 = vld [vmem:[#allocation5 + $0x98] sm:$0xf] }
  0x42   :  { %604 = vmatpush.bf16.msrb.mxu2 %v2145_v42  ;;  %573 = vmatmul.bf16.vlgmr.msra.gmra.mxu3 %v3248_v50  ;;  %v2781_v34 = vld [vmem:[#allocation5 + $0xb4] sm:$0xf0]  ;;  %v2777_v35 = vld [vmem:[#allocation5 + $0x9c] sm:$0xf]  ;;  %v1977_v37 = vor.u32 %v2780_v29, %v1976_v28  ;;  %v1981_v38 = vor.u32 %v2776_v30, %v1978_v32  ;;  %v1944_v40 = vld [vmem:[#allocation5 + $0x50] sm:$0xf] }
  0x43   :  { %617 = vmatpush.bf16.msrb.mxu3 %v2149_v46  ;;  %560 = vmatmul.bf16.vlgmr.msra.gmra.mxu2 %v3248_v50  ;;  %v1986_v36 = vld [vmem:[#allocation5 + $0xb8] sm:$0xf0]  ;;  %v1985_v39 = vor.u32 %v2781_v34, %v1984_v33  ;;  %v2772_v41 = vld [vmem:[#allocation5 + $0x6c] sm:$0xf0]  ;;  %v2768_v42 = vld [vmem:[#allocation5 + $0x54] sm:$0xf] }
  0x44   :  { %v1989_v43 = vor.u32 %v2777_v35, %v1986_v36  ;;  %v1946_v44 = vld [vmem:[#allocation5 + $0x70] sm:$0xf0]  ;;  %v1952_v45 = vld [vmem:[#allocation5 + $0x58] sm:$0xf]  ;;  %v2769_v47 = vld [vmem:[#allocation5 + $0x5c] sm:$0xf]  ;;  %v1945_v49 = vor.u32 %v2772_v41, %v1944_v40 }
  0x45   :  { %579 = vmatpush.bf16.msrb.mxu0 %v2105_v53  ;;  %592 = vmatpush.bf16.msrb.mxu1 %v2109_v54  ;;  %v2773_v46 = vld [vmem:[#allocation5 + $0x74] sm:$0xf0]  ;;  %v1954_v48 = vld [vmem:[#allocation5 + $0x78] sm:$0xf0]  ;;  %v1912_v51 = vld [vmem:[#allocation5 + $0x10] sm:$0xf]  ;;  %v1949_v52 = vor.u32 %v2768_v42, %v1946_v44 }
  0x46   :  { %605 = vmatpush.bf16.msrb.mxu2 %v2113_v55  ;;  %v1953_v53 = vor.u32 %v2773_v46, %v1952_v45  ;;  %v2764_v54 = vld [vmem:[#allocation5 + $0x2c] sm:$0xf0]  ;;  %v2760_v55 = vld [vmem:[#allocation5 + $0x14] sm:$0xf]  ;;  %v1957_v57 = vor.u32 %v2769_v47, %v1954_v48  ;;  %v1920_v58 = vld [vmem:[#allocation5 + $0x18] sm:$0xf] }
  0x47   :  { %618 = vmatpush.bf16.msrb.mxu3 %v2117_v59  ;;  %v1914_v56 = vld [vmem:[#allocation5 + $0x30] sm:$0xf0]  ;;  %v2765_v59 = vld [vmem:[#allocation5 + $0x34] sm:$0xf0]  ;;  %v2761_v60 = vld [vmem:[#allocation5 + $0x1c] sm:$0xf]  ;;  %v1913_v0 = vor.u32 %v2764_v54, %v1912_v51 }
  0x48   :  { %v1922_v61 = vld [vmem:[#allocation5 + $0x38] sm:$0xf0]  ;;  %v2208_v62 = vld [vmem:[#allocation8 + $0x70] sm:$0xf]  ;;  %v2837_v63 = vld [vmem:[#allocation8 + $0x74] sm:$0xf0]  ;;  %v1921_v4 = vor.u32 %v2765_v59, %v1920_v58 }
  0x49   :  { %580 = vmatpush.bf16.msrb.mxu0 %v2073_v1  ;;  %593 = vmatpush.bf16.msrb.mxu1 %v2077_v2  ;;  %v2272_v1 = vld [vmem:[#allocation8 + $0xf0] sm:$0xf]  ;;  %v2853_v2 = vld [vmem:[#allocation8 + $0xf4] sm:$0xf0]  ;;  %v1925_v5 = vor.u32 %v2761_v60, %v1922_v61  ;;  %v2209_v6 = vor.u32 %v2837_v63, %v2208_v62  ;;  %v2835_v11 = vld [vmem:[#allocation8 + $0x64] sm:$0xf0] }
  0x4a   :  { %606 = vmatpush.bf16.msrb.mxu2 %v2081_v3  ;;  %v1917_v3 = vor.u32 %v2760_v55, %v1914_v56  ;;  %v2336_v8 = vld [vmem:[#allocation8 + $0x170] sm:$0xf]  ;;  %v2869_v9 = vld [vmem:[#allocation8 + $0x174] sm:$0xf0]  ;;  %v2273_v10 = vor.u32 %v2853_v2, %v2272_v1  ;;  %v2328_v20 = vld [vmem:[#allocation8 + $0x160] sm:$0xf] }
  0x4b   :  { %619 = vmatpush.bf16.msrb.mxu3 %v2085_v7  ;;  %v2200_v7 = vld [vmem:[#allocation8 + $0x60] sm:$0xf]  ;;  %v2400_v12 = vld [vmem:[#allocation8 + $0x1f0] sm:$0xf]  ;;  %v2337_v16 = vor.u32 %v2869_v9, %v2336_v8  ;;  %v2867_v21 = vld [vmem:[#allocation8 + $0x164] sm:$0xf0] }
  0x4c   :  { %v2201_v17 = vor.u32 %v2835_v11, %v2200_v7  ;;  %v2833_v23 = vld [vmem:[#allocation8 + $0x54] sm:$0xf0]  ;;  %v2392_v24 = vld [vmem:[#allocation8 + $0x1e0] sm:$0xf]  ;;  %v2329_v28 = vor.u32 %v2867_v21, %v2328_v20  ;;  %v2320_v32 = vld [vmem:[#allocation8 + $0x150] sm:$0xf] }
  0x4d   :  { %581 = vmatpush.bf16.msrb.mxu0 %v2041_v13  ;;  %594 = vmatpush.bf16.msrb.mxu1 %v2045_v14  ;;  %v2885_v13 = vld [vmem:[#allocation8 + $0x1f4] sm:$0xf0]  ;;  %v2264_v14 = vld [vmem:[#allocation8 + $0xe0] sm:$0xf]  ;;  %v2831_v35 = vld [vmem:[#allocation8 + $0x44] sm:$0xf0] }
  0x4e   :  { %607 = vmatpush.bf16.msrb.mxu2 %v2049_v15  ;;  %v2851_v15 = vld [vmem:[#allocation8 + $0xe4] sm:$0xf0]  ;;  %v2401_v18 = vor.u32 %v2885_v13, %v2400_v12  ;;  %v2865_v33 = vld [vmem:[#allocation8 + $0x154] sm:$0xf0]  ;;  %v2384_v36 = vld [vmem:[#allocation8 + $0x1d0] sm:$0xf] }
  0x4f   :  { %620 = vmatpush.bf16.msrb.mxu3 %v2053_v19  ;;  %v2192_v19 = vld [vmem:[#allocation8 + $0x50] sm:$0xf]  ;;  %v2265_v22 = vor.u32 %v2851_v15, %v2264_v14  ;;  %v2321_v40 = vor.u32 %v2865_v33, %v2320_v32  ;;  %v2312_v44 = vld [vmem:[#allocation8 + $0x140] sm:$0xf]  ;;  %v2863_v45 = vld [vmem:[#allocation8 + $0x144] sm:$0xf0] }
  0x50   :  { %v2193_v29 = vor.u32 %v2833_v23, %v2192_v19  ;;  %v2176_v41 = vld [vmem:[#allocation8 + $0x30] sm:$0xf]  ;;  %v2376_v47 = vld [vmem:[#allocation8 + $0x1c0] sm:$0xf]  ;;  %v2879_v48 = vld [vmem:[#allocation8 + $0x1c4] sm:$0xf0] }
  0x51   :  { %582 = vmatpush.bf16.msrb.mxu0 %v2009_v25  ;;  %595 = vmatpush.bf16.msrb.mxu1 %v2013_v26  ;;  %v2883_v25 = vld [vmem:[#allocation8 + $0x1e4] sm:$0xf0]  ;;  %v2256_v26 = vld [vmem:[#allocation8 + $0xd0] sm:$0xf]  ;;  %v2845_v51 = vld [vmem:[#allocation8 + $0xb4] sm:$0xf0]  ;;  %v2377_v54 = vor.u32 %v2879_v48, %v2376_v47 }
  0x52   :  { %608 = vmatpush.bf16.msrb.mxu2 %v2017_v27  ;;  %v2849_v27 = vld [vmem:[#allocation8 + $0xd4] sm:$0xf0]  ;;  %v2393_v30 = vor.u32 %v2883_v25, %v2392_v24  ;;  %v2168_v55 = vld [vmem:[#allocation8 + $0x20] sm:$0xf]  ;;  %v2304_v56 = vld [vmem:[#allocation8 + $0x130] sm:$0xf] }
  0x53   :  { %621 = vmatpush.bf16.msrb.mxu3 %v2021_v31  ;;  %v2184_v31 = vld [vmem:[#allocation8 + $0x40] sm:$0xf]  ;;  %v2257_v34 = vor.u32 %v2849_v27, %v2256_v26  ;;  %v2827_v59 = vld [vmem:[#allocation8 + $0x24] sm:$0xf0]  ;;  %v2368_v60 = vld [vmem:[#allocation8 + $0x1b0] sm:$0xf] }
  0x54   :  { %v2185_v42 = vor.u32 %v2831_v35, %v2184_v31  ;;  %v2877_v61 = vld [vmem:[#allocation8 + $0x1b4] sm:$0xf0]  ;;  %v2232_v62 = vld [vmem:[#allocation8 + $0xa0] sm:$0xf]  ;;  %v2843_v63 = vld [vmem:[#allocation8 + $0xa4] sm:$0xf0]  ;;  %v2169_v1 = vor.u32 %v2827_v59, %v2168_v55 }
  0x55   :  { %583 = vmatpush.bf16.msrb.mxu0 %v1977_v37  ;;  %596 = vmatpush.bf16.msrb.mxu1 %v1981_v38  ;;  %v2881_v37 = vld [vmem:[#allocation8 + $0x1d4] sm:$0xf0]  ;;  %v2248_v38 = vld [vmem:[#allocation8 + $0xc0] sm:$0xf]  ;;  %v2369_v2 = vor.u32 %v2877_v61, %v2368_v60  ;;  %v2875_v9 = vld [vmem:[#allocation8 + $0x1a4] sm:$0xf0] }
  0x56   :  { %609 = vmatpush.bf16.msrb.mxu2 %v1985_v39  ;;  %v2847_v39 = vld [vmem:[#allocation8 + $0xc4] sm:$0xf0]  ;;  %v2825_v7 = vld [vmem:[#allocation8 + $0x14] sm:$0xf0]  ;;  %v2360_v8 = vld [vmem:[#allocation8 + $0x1a0] sm:$0xf] }
  0x57   :  { %622 = vmatpush.bf16.msrb.mxu3 %v1989_v43  ;;  %v2385_v43 = vor.u32 %v2881_v37, %v2384_v36  ;;  %v2249_v46 = vor.u32 %v2847_v39, %v2248_v38  ;;  %v2841_v11 = vld [vmem:[#allocation8 + $0x94] sm:$0xf0]  ;;  %v2152_v13 = vld [vmem:[#allocation8] sm:$0xf]  ;;  %v2361_v15 = vor.u32 %v2875_v9, %v2360_v8  ;;  %v2352_v21 = vld [vmem:[#allocation8 + $0x190] sm:$0xf] }
  0x58   :  { %v2216_v20 = vld [vmem:[#allocation8 + $0x80] sm:$0xf]  ;;  %v2839_v23 = vld [vmem:[#allocation8 + $0x84] sm:$0xf0]  ;;  %v2464_v24 = vld [vmem:[#allocation8 + $0x270] sm:$0xf] }
  0x59   :  { %584 = vmatpush.bf16.msrb.mxu0 %v1945_v49  ;;  %597 = vmatpush.bf16.msrb.mxu1 %v1949_v52  ;;  %v2240_v49 = vld [vmem:[#allocation8 + $0xb0] sm:$0xf]  ;;  %v2313_v52 = vor.u32 %v2863_v45, %v2312_v44  ;;  %v2901_v25 = vld [vmem:[#allocation8 + $0x274] sm:$0xf0]  ;;  %v2456_v31 = vld [vmem:[#allocation8 + $0x260] sm:$0xf]  ;;  %v2217_v35 = vor.u32 %v2839_v23, %v2216_v20 }
  0x5a   :  { %610 = vmatpush.bf16.msrb.mxu2 %v1953_v53  ;;  %v2241_v58 = vor.u32 %v2845_v51, %v2240_v49  ;;  %v2528_v26 = vld [vmem:[#allocation8 + $0x2f0] sm:$0xf]  ;;  %v2917_v27 = vld [vmem:[#allocation8 + $0x2f4] sm:$0xf0]  ;;  %v2280_v32 = vld [vmem:[#allocation8 + $0x100] sm:$0xf]  ;;  %v2465_v36 = vor.u32 %v2901_v25, %v2464_v24 }
  0x5b   :  { %623 = vmatpush.bf16.msrb.mxu3 %v1957_v57  ;;  %v2861_v57 = vld [vmem:[#allocation8 + $0x134] sm:$0xf0]  ;;  %v2855_v33 = vld [vmem:[#allocation8 + $0x104] sm:$0xf0]  ;;  %v2592_v38 = vld [vmem:[#allocation8 + $0x370] sm:$0xf] }
  0x5c   :  { %v2871_v37 = vld [vmem:[#allocation8 + $0x184] sm:$0xf0]  ;;  %v2933_v39 = vld [vmem:[#allocation8 + $0x374] sm:$0xf0]  ;;  %v2281_v45 = vor.u32 %v2855_v33, %v2280_v32  ;;  %v2448_v51 = vld [vmem:[#allocation8 + $0x250] sm:$0xf] }
  0x5d   :  { %585 = vmatpush.bf16.msrb.mxu0 %v1913_v0  ;;  %598 = vmatpush.bf16.msrb.mxu1 %v1917_v3  ;;  %v2305_v0 = vor.u32 %v2861_v57, %v2304_v56  ;;  %v2160_v3 = vld [vmem:[#allocation8 + $0x10] sm:$0xf]  ;;  %v2915_v44 = vld [vmem:[#allocation8 + $0x2e4] sm:$0xf0]  ;;  %v2593_v47 = vor.u32 %v2933_v39, %v2592_v38  ;;  %v2897_v55 = vld [vmem:[#allocation8 + $0x254] sm:$0xf0] }
  0x5e   :  { %611 = vmatpush.bf16.msrb.mxu2 %v1921_v4  ;;  %v2296_v4 = vld [vmem:[#allocation8 + $0x120] sm:$0xf]  ;;  %v2161_v14 = vor.u32 %v2825_v7, %v2160_v3  ;;  %v2947_v57 = vld [vmem:[#allocation8 + $0x3e4] sm:$0xf0]  ;;  %v2913_v59 = vld [vmem:[#allocation8 + $0x2d4] sm:$0xf0]  ;;  %v2449_v61 = vor.u32 %v2897_v55, %v2448_v51 }
  0x5f   :  { %624 = vmatpush.bf16.msrb.mxu3 %v1925_v5  ;;  %v2859_v5 = vld [vmem:[#allocation8 + $0x124] sm:$0xf0]  ;;  %v2648_v56 = vld [vmem:[#allocation8 + $0x3e0] sm:$0xf]  ;;  %v2624_v32 = vld [vmem:[#allocation8 + $0x3b0] sm:$0xf] }
  0x60   :  { %586 = vmatmul.bf16.vlgmr.msrb.gmra.mxu0 %v3248_v50  ;;  %599 = vmatmul.bf16.vlgmr.msrb.gmra.mxu1 %v3248_v50  ;;  %v2297_v12 = vor.u32 %v2859_v5, %v2296_v4  ;;  %v2895_v3 = vld [vmem:[#allocation8 + $0x244] sm:$0xf0]  ;;  %v2640_v4 = vld [vmem:[#allocation8 + $0x3d0] sm:$0xf]  ;;  %v2945_v5 = vld [vmem:[#allocation8 + $0x3d4] sm:$0xf0] }
  0x61   :  { %1420 = vmatpush.bf16.msra.mxu0 %v2209_v6  ;;  %1433 = vmatpush.bf16.msra.mxu1 %v2273_v10  ;;  %v2233_v6 = vor.u32 %v2843_v63, %v2232_v62  ;;  %v2224_v10 = vld [vmem:[#allocation8 + $0x90] sm:$0xf]  ;;  %v2649_v62 = vor.u32 %v2947_v57, %v2648_v56  ;;  %v2440_v63 = vld [vmem:[#allocation8 + $0x240] sm:$0xf]  ;;  %v2911_v7 = vld [vmem:[#allocation8 + $0x2c4] sm:$0xf0] }
  0x62   :  { %612 = vmatmul.bf16.vlgmr.msrb.gmra.mxu2 %v3248_v50  ;;  %625 = vmatmul.bf16.vlgmr.msrb.gmra.mxu3 %v3248_v50  ;;  %v2829_v50 = vld [vmem:[#allocation8 + $0x34] sm:$0xf0]  ;;  %v2225_v19 = vor.u32 %v2841_v11, %v2224_v10  ;;  %v2441_v9 = vor.u32 %v2895_v3, %v2440_v63  ;;  %v2641_v10 = vor.u32 %v2945_v5, %v2640_v4  ;;  %v2432_v11 = vld [vmem:[#allocation8 + $0x230] sm:$0xf]  ;;  %v2424_v24 = vld [vmem:[#allocation8 + $0x220] sm:$0xf] }
  0x63   :  { %1446 = vmatpush.bf16.msra.mxu2 %v2337_v16  ;;  %1459 = vmatpush.bf16.msra.mxu3 %v2401_v18  ;;  %v2177_v53 = vor.u32 %v2829_v50, %v2176_v41  ;;  %v2823_v16 = vld [vmem:[#allocation8 + $0x4] sm:$0xf0]  ;;  %v2857_v18 = vld [vmem:[#allocation8 + $0x114] sm:$0xf0]  ;;  %v2656_v50 = vld [vmem:[#allocation8 + $0x3f0] sm:$0xf] }
  0x64   :  { %v2899_v41 = vld [vmem:[#allocation8 + $0x264] sm:$0xf0]  ;;  %v2480_v39 = vld [vmem:[#allocation8 + $0x290] sm:$0xf]  ;;  %v2921_v55 = vld [vmem:[#allocation8 + $0x314] sm:$0xf0] }
  0x65   :  { %1421 = vmatpush.bf16.msra.mxu0 %v2201_v17  ;;  %1434 = vmatpush.bf16.msra.mxu1 %v2265_v22  ;;  %v2288_v17 = vld [vmem:[#allocation8 + $0x110] sm:$0xf]  ;;  %v2873_v22 = vld [vmem:[#allocation8 + $0x194] sm:$0xf0]  ;;  %v2457_v48 = vor.u32 %v2899_v41, %v2456_v31  ;;  %v2891_v25 = vld [vmem:[#allocation8 + $0x224] sm:$0xf0] }
  0x66   :  { %v2925_v31 = vld [vmem:[#allocation8 + $0x334] sm:$0xf0]  ;;  %v2608_v56 = vld [vmem:[#allocation8 + $0x390] sm:$0xf]  ;;  %v2600_v63 = vld [vmem:[#allocation8 + $0x380] sm:$0xf] }
  0x67   :  { %1447 = vmatpush.bf16.msra.mxu2 %v2329_v28  ;;  %1460 = vmatpush.bf16.msra.mxu3 %v2393_v30  ;;  %v2289_v28 = vor.u32 %v2857_v18, %v2288_v17  ;;  %v2353_v30 = vor.u32 %v2873_v22, %v2352_v21  ;;  %v2943_v17 = vld [vmem:[#allocation8 + $0x3c4] sm:$0xf0]  ;;  %v2496_v18 = vld [vmem:[#allocation8 + $0x2b0] sm:$0xf]  ;;  %s3179_s1 = smov [#allocation13]   ;;  %s1881_s26 = sshll.u32 %s3321_s9, 4  ;;  %s1882_s26 = int_to_ptr.hbm [resolvable:$true] %s1881_s26 }
  0x68   :  { %s1879_s23 = sshll.u32 %s3179_s1, 4  ;;  %s1880_s23 = int_to_ptr.vmem [resolvable:$true] %s1879_s23 }
  0x69   :  { %1422 = vmatpush.bf16.msra.mxu0 %v2193_v29  ;;  %1435 = vmatpush.bf16.msra.mxu1 %v2257_v34  ;;  %v2153_v29 = vor.u32 %v2823_v16, %v2152_v13  ;;  %v2344_v34 = vld [vmem:[#allocation8 + $0x180] sm:$0xf]  ;;  %v2927_v13 = vld [vmem:[#allocation8 + $0x344] sm:$0xf0] }
  0x6a   :  { %v2632_v16 = vld [vmem:[#allocation8 + $0x3c0] sm:$0xf] }
  0x6b   :  { %1448 = vmatpush.bf16.msra.mxu2 %v2321_v40  ;;  %1461 = vmatpush.bf16.msra.mxu3 %v2385_v43  ;;  %v2529_v40 = vor.u32 %v2917_v27, %v2528_v26  ;;  %v2520_v43 = vld [vmem:[#allocation8 + $0x2e0] sm:$0xf]  ;;  %v2633_v22 = vor.u32 %v2943_v17, %v2632_v16  ;;  %v2907_v27 = vld [vmem:[#allocation8 + $0x2a4] sm:$0xf0] }
  0x6c   :  { %v2488_v26 = vld [vmem:[#allocation8 + $0x2a0] sm:$0xf] }
  0x6d   :  { %1423 = vmatpush.bf16.msra.mxu0 %v2185_v42  ;;  %1436 = vmatpush.bf16.msra.mxu1 %v2249_v46  ;;  %v2949_v42 = vld [vmem:[#allocation8 + $0x3f4] sm:$0xf0]  ;;  %v2345_v46 = vor.u32 %v2871_v37, %v2344_v34 }
  0x6e   :  { %v2657_v49 = vor.u32 %v2949_v42, %v2656_v50  ;;  %v2941_v34 = vld [vmem:[#allocation8 + $0x3b4] sm:$0xf0]  ;;  %v2552_v50 = vld [vmem:[#allocation8 + $0x320] sm:$0xf]  ;;  %v2923_v42 = vld [vmem:[#allocation8 + $0x324] sm:$0xf0] }
  0x6f   :  { %1449 = vmatpush.bf16.msra.mxu2 %v2313_v52  ;;  %1462 = vmatpush.bf16.msra.mxu3 %v2377_v54  ;;  %v2584_v52 = vld [vmem:[#allocation8 + $0x360] sm:$0xf]  ;;  %v2521_v54 = vor.u32 %v2915_v44, %v2520_v43  ;;  %v2889_v37 = vld [vmem:[#allocation8 + $0x214] sm:$0xf0]  ;;  %v2553_v44 = vor.u32 %v2923_v42, %v2552_v50 }
  0x70   :  { %v2616_v43 = vld [vmem:[#allocation8 + $0x3a0] sm:$0xf] }
  0x71   :  { %1424 = vmatpush.bf16.msra.mxu0 %v2177_v53  ;;  %1437 = vmatpush.bf16.msra.mxu1 %v2241_v58  ;;  %v2931_v53 = vld [vmem:[#allocation8 + $0x364] sm:$0xf0]  ;;  %v2512_v58 = vld [vmem:[#allocation8 + $0x2d0] sm:$0xf] }
  0x72   :  { %v2585_v60 = vor.u32 %v2931_v53, %v2584_v52  ;;  %v2903_v52 = vld [vmem:[#allocation8 + $0x284] sm:$0xf0] }
  0x73   :  { %1450 = vmatpush.bf16.msra.mxu2 %v2305_v0  ;;  %1463 = vmatpush.bf16.msra.mxu3 %v2369_v2  ;;  %v2576_v0 = vld [vmem:[#allocation8 + $0x350] sm:$0xf]  ;;  %v2513_v2 = vor.u32 %v2913_v59, %v2512_v58  ;;  %v2937_v58 = vld [vmem:[#allocation8 + $0x394] sm:$0xf0] }
  0x74   :  { %v2609_v59 = vor.u32 %v2937_v58, %v2608_v56 }
  0x75   :  { %1425 = vmatpush.bf16.msra.mxu0 %v2169_v1  ;;  %1438 = vmatpush.bf16.msra.mxu1 %v2233_v6  ;;  %v2929_v1 = vld [vmem:[#allocation8 + $0x354] sm:$0xf0]  ;;  %v2504_v6 = vld [vmem:[#allocation8 + $0x2c0] sm:$0xf] }
  0x76   :  { %v2577_v8 = vor.u32 %v2929_v1, %v2576_v0  ;;  %v2935_v0 = vld [vmem:[#allocation8 + $0x384] sm:$0xf0] }
  0x77   :  { %1451 = vmatpush.bf16.msra.mxu2 %v2297_v12  ;;  %1464 = vmatpush.bf16.msra.mxu3 %v2361_v15  ;;  %v2568_v12 = vld [vmem:[#allocation8 + $0x340] sm:$0xf]  ;;  %v2893_v15 = vld [vmem:[#allocation8 + $0x234] sm:$0xf0]  ;;  %v2601_v1 = vor.u32 %v2935_v0, %v2600_v63  ;;  %v2880_v63 = vld [vmem:[#allocation8 + $0x1d4] sm:$0xf] }
  0x78   :  { %v2569_v20 = vor.u32 %v2927_v13, %v2568_v12  ;;  %v2433_v21 = vor.u32 %v2893_v15, %v2432_v11  ;;  %v2852_v12 = vld [vmem:[#allocation8 + $0xf4] sm:$0xf]  ;;  %v2274_v13 = vld [vmem:[#allocation8 + $0xf8] sm:$0xf0] }
  0x79   :  { %1426 = vmatpush.bf16.msra.mxu0 %v2161_v14  ;;  %1439 = vmatpush.bf16.msra.mxu1 %v2225_v19  ;;  %v2505_v14 = vor.u32 %v2911_v7, %v2504_v6  ;;  %v2909_v19 = vld [vmem:[#allocation8 + $0x2b4] sm:$0xf0]  ;;  %v2386_v0 = vld [vmem:[#allocation8 + $0x1d8] sm:$0xf0] }
  0x7a   :  { %v2497_v23 = vor.u32 %v2909_v19, %v2496_v18 }
  0x7b   :  { %1452 = vmatpush.bf16.msra.mxu2 %v2289_v28  ;;  %1465 = vmatpush.bf16.msra.mxu3 %v2353_v30  ;;  %v2425_v28 = vor.u32 %v2891_v25, %v2424_v24  ;;  %v2560_v30 = vld [vmem:[#allocation8 + $0x330] sm:$0xf] }
  0x7c   :  { %v2561_v33 = vor.u32 %v2925_v31, %v2560_v30  ;;  %v2338_v30 = vld [vmem:[#allocation8 + $0x178] sm:$0xf0]  ;;  %v2884_v31 = vld [vmem:[#allocation8 + $0x1f4] sm:$0xf] }
  0x7d   :  { %1427 = vmatpush.bf16.msra.mxu0 %v2153_v29  ;;  %1440 = vmatpush.bf16.msra.mxu1 %v2217_v35  ;;  %v2489_v29 = vor.u32 %v2907_v27, %v2488_v26  ;;  %v2625_v35 = vor.u32 %v2941_v34, %v2624_v32  ;;  %v2850_v26 = vld [vmem:[#allocation8 + $0xe4] sm:$0xf]  ;;  %v2266_v27 = vld [vmem:[#allocation8 + $0xe8] sm:$0xf0]  ;;  %v2402_v32 = vld [vmem:[#allocation8 + $0x1f8] sm:$0xf0] }
  0x7e   :  { %v2405_v42 = vor.u32 %v2884_v31, %v2402_v32  ;;  %v2824_v32 = vld [vmem:[#allocation8 + $0x14] sm:$0xf] }
  0x7f   :  { %1453 = vmatpush.bf16.msra.mxu2 %v2281_v45  ;;  %1466 = vmatpush.bf16.msra.mxu3 %v2345_v46  ;;  %v2939_v45 = vld [vmem:[#allocation8 + $0x3a4] sm:$0xf0] }
  0x80   :  { %v2617_v46 = vor.u32 %v2939_v45, %v2616_v43  ;;  %v2848_v43 = vld [vmem:[#allocation8 + $0xd4] sm:$0xf]  ;;  %v2866_v45 = vld [vmem:[#allocation8 + $0x164] sm:$0xf] }
  0x81   :  { %1472 = vmatpush.bf16.msrb.mxu0 %v2465_v36  ;;  %1485 = vmatpush.bf16.msrb.mxu1 %v2529_v40  ;;  %v2416_v36 = vld [vmem:[#allocation8 + $0x210] sm:$0xf]  ;;  %v2905_v40 = vld [vmem:[#allocation8 + $0x294] sm:$0xf0] }
  0x82   :  { %v2417_v38 = vor.u32 %v2889_v37, %v2416_v36  ;;  %v2481_v41 = vor.u32 %v2905_v40, %v2480_v39  ;;  %v2832_v39 = vld [vmem:[#allocation8 + $0x54] sm:$0xf]  ;;  %v2194_v40 = vld [vmem:[#allocation8 + $0x58] sm:$0xf0] }
  0x83   :  { %1498 = vmatpush.bf16.msrb.mxu2 %v2593_v47  ;;  %1511 = vmatpush.bf16.msrb.mxu3 %v2657_v49  ;;  %v2408_v47 = vld [vmem:[#allocation8 + $0x200] sm:$0xf] }
  0x84   :  { %v2472_v49 = vld [vmem:[#allocation8 + $0x280] sm:$0xf] }
  0x85   :  { %1473 = vmatpush.bf16.msrb.mxu0 %v2457_v48  ;;  %1486 = vmatpush.bf16.msrb.mxu1 %v2521_v54  ;;  %v2887_v48 = vld [vmem:[#allocation8 + $0x204] sm:$0xf0]  ;;  %v2473_v53 = vor.u32 %v2903_v52, %v2472_v49  ;;  %v2544_v54 = vld [vmem:[#allocation8 + $0x310] sm:$0xf]  ;;  %v2394_v49 = vld [vmem:[#allocation8 + $0x1e8] sm:$0xf0] }
  0x86   :  { %v2409_v51 = vor.u32 %v2887_v48, %v2408_v47  ;;  %v2545_v57 = vor.u32 %v2921_v55, %v2544_v54  ;;  %v2330_v47 = vld [vmem:[#allocation8 + $0x168] sm:$0xf0]  ;;  %v2882_v48 = vld [vmem:[#allocation8 + $0x1e4] sm:$0xf] }
  0x87   :  { %1499 = vmatpush.bf16.msrb.mxu2 %v2585_v60  ;;  %1512 = vmatpush.bf16.msrb.mxu3 %v2649_v62  ;;  %v2536_v60 = vld [vmem:[#allocation8 + $0x300] sm:$0xf]  ;;  %v2830_v54 = vld [vmem:[#allocation8 + $0x44] sm:$0xf]  ;;  %v2186_v55 = vld [vmem:[#allocation8 + $0x48] sm:$0xf0]  ;;  %v2397_v58 = vor.u32 %v2882_v48, %v2394_v49 }
  0x89   :  { %1474 = vmatpush.bf16.msrb.mxu0 %v2449_v61  ;;  %1487 = vmatpush.bf16.msrb.mxu1 %v2513_v2  ;;  %v2919_v61 = vld [vmem:[#allocation8 + $0x304] sm:$0xf0]  ;;  %v3258_v2 = vld [vmem:[#allocation7] sm:$0xff] }
  0x8a   :  { %v2537_v62 = vor.u32 %v2919_v61, %v2536_v60  ;;  %v190_v3 = vperm.slane %v3258_v2, 0  ;;  %v191_v4 = vperm.slane %v3258_v2, 1  ;;  %v192_v11 = vperm.slane %v3258_v2, 2  ;;  %v2250_v60 = vld [vmem:[#allocation8 + $0xc8] sm:$0xf0] }
  0x8b   :  { %1500 = vmatpush.bf16.msrb.mxu2 %v2577_v8  ;;  %1513 = vmatpush.bf16.msrb.mxu3 %v2641_v10  ;;  %v2836_v8 = vld [vmem:[#allocation8 + $0x74] sm:$0xf]  ;;  %v193_v15 = vperm.slane %v3258_v2, 3  ;;  %v195_v31 = vperm.slane %v3258_v2, 5 }
  0x8c   :  { %v2864_v61 = vld [vmem:[#allocation8 + $0x154] sm:$0xf] }
  0x8d   :  { %1475 = vmatpush.bf16.msrb.mxu0 %v2441_v9  ;;  %1488 = vmatpush.bf16.msrb.mxu1 %v2505_v14  ;;  %v2210_v9 = vld [vmem:[#allocation8 + $0x78] sm:$0xf0] }
  0x8e   :  { %v2213_v17 = vor.u32 %v2836_v8, %v2210_v9  ;;  %v2844_v8 = vld [vmem:[#allocation8 + $0xb4] sm:$0xf]  ;;  %v2242_v9 = vld [vmem:[#allocation8 + $0xb8] sm:$0xf0] }
  0x8f   :  { %1501 = vmatpush.bf16.msrb.mxu2 %v2569_v20  ;;  %1514 = vmatpush.bf16.msrb.mxu3 %v2633_v22  ;;  %v2277_v20 = vor.u32 %v2852_v12, %v2274_v13  ;;  %v2202_v22 = vld [vmem:[#allocation8 + $0x68] sm:$0xf0]  ;;  %v2878_v12 = vld [vmem:[#allocation8 + $0x1c4] sm:$0xf] }
  0x90   :  { %v2378_v13 = vld [vmem:[#allocation8 + $0x1c8] sm:$0xf0] }
  0x91   :  { %1476 = vmatpush.bf16.msrb.mxu0 %v2433_v21  ;;  %1489 = vmatpush.bf16.msrb.mxu1 %v2497_v23  ;;  %v2834_v21 = vld [vmem:[#allocation8 + $0x64] sm:$0xf] }
  0x93   :  { %1502 = vmatpush.bf16.msrb.mxu2 %v2561_v33  ;;  %1515 = vmatpush.bf16.msrb.mxu3 %v2625_v35  ;;  %v2205_v35 = vor.u32 %v2834_v21, %v2202_v22  ;;  %v2842_v21 = vld [vmem:[#allocation8 + $0xa4] sm:$0xf]  ;;  %v2234_v22 = vld [vmem:[#allocation8 + $0xa8] sm:$0xf0] }
  0x95   :  { %1477 = vmatpush.bf16.msrb.mxu0 %v2425_v28  ;;  %1490 = vmatpush.bf16.msrb.mxu1 %v2489_v29  ;;  %v2868_v28 = vld [vmem:[#allocation8 + $0x174] sm:$0xf] }
  0x96   :  { %v2341_v50 = vor.u32 %v2868_v28, %v2338_v30  ;;  %v194_v30 = vperm.slane %v3258_v2, 4 }
  0x97   :  { %1503 = vmatpush.bf16.msrb.mxu2 %v2553_v44  ;;  %1516 = vmatpush.bf16.msrb.mxu3 %v2617_v46  ;;  %v2258_v44 = vld [vmem:[#allocation8 + $0xd8] sm:$0xf0] }
  0x99   :  { %1478 = vmatpush.bf16.msrb.mxu0 %v2417_v38  ;;  %1491 = vmatpush.bf16.msrb.mxu1 %v2481_v41  ;;  %v2269_v38 = vor.u32 %v2850_v26, %v2266_v27  ;;  %v2876_v26 = vld [vmem:[#allocation8 + $0x1b4] sm:$0xf]  ;;  %v2370_v27 = vld [vmem:[#allocation8 + $0x1b8] sm:$0xf0] }
  0x9b   :  { %1504 = vmatpush.bf16.msrb.mxu2 %v2545_v57  ;;  %1517 = vmatpush.bf16.msrb.mxu3 %v2609_v59  ;;  %v2333_v57 = vor.u32 %v2866_v45, %v2330_v47  ;;  %v2846_v59 = vld [vmem:[#allocation8 + $0xc4] sm:$0xf]  ;;  %v2154_v45 = vld [vmem:[#allocation8 + $0x8] sm:$0xf0] }
  0x9d   :  { %1479 = vmatpush.bf16.msrb.mxu0 %v2409_v51  ;;  %1492 = vmatpush.bf16.msrb.mxu1 %v2473_v53  ;;  %v2197_v51 = vor.u32 %v2832_v39, %v2194_v40  ;;  %v2261_v53 = vor.u32 %v2848_v43, %v2258_v44  ;;  %v2298_v39 = vld [vmem:[#allocation8 + $0x128] sm:$0xf0]  ;;  %v2874_v40 = vld [vmem:[#allocation8 + $0x1a4] sm:$0xf] }
  0x9e   :  { %v2822_v44 = vld [vmem:[#allocation8 + $0x4] sm:$0xf] }
  0x9f   :  { %1505 = vmatpush.bf16.msrb.mxu2 %v2537_v62  ;;  %1518 = vmatpush.bf16.msrb.mxu3 %v2601_v1  ;;  %v2322_v62 = vld [vmem:[#allocation8 + $0x158] sm:$0xf0]  ;;  %v2189_v1 = vor.u32 %v2830_v54, %v2186_v55 }
  0xbd   :  { %v535_v5 = vpop.f32.mrf.mxu0  ;;  %v548_v7 = vpop.f32.mrf.mxu1 }
  0xbe   :  { %v536_v6 = vadd.f32 %v535_v5, %v190_v3  ;;  %v549_v10 = vadd.f32 %v548_v7, %v191_v4  ;;  %v2253_v3 = vor.u32 %v2846_v59, %v2250_v60  ;;  %v2828_v4 = vld [vmem:[#allocation8 + $0x34] sm:$0xf]  ;;  %v2178_v5 = vld [vmem:[#allocation8 + $0x38] sm:$0xf0]  ;;  %v2389_v7 = vor.u32 %v2880_v63, %v2386_v0 }
  0xbf   :  { %v2530_v59 = vld [vmem:[#allocation8 + $0x2f8] sm:$0xf0]  ;;  %v196_v0 = vperm.slane %v3258_v2, 6 }
  0xc0   :  { %v630_v14 = vmax.f32 %v536_v6, 0.0  ;;  %v631_v16 = vmax.f32 %v549_v10, 0.0  ;;  %v2325_v6 = vor.u32 %v2864_v61, %v2322_v62  ;;  %v2862_v10 = vld [vmem:[#allocation8 + $0x144] sm:$0xf]  ;;  %v2856_v61 = vld [vmem:[#allocation8 + $0x114] sm:$0xf] }
  0xc1   :  { %v2290_v62 = vld [vmem:[#allocation8 + $0x118] sm:$0xf0] }
  0xc2   :  { %v3264_v18 = vpack.c.bf16 %v630_v14, %v630_v14  ;;  %v3266_v23 = vpack.c.bf16 %v631_v16, %v631_v16  ;;  %v2181_v14 = vor.u32 %v2828_v4, %v2178_v5  ;;  %v2826_v16 = vld [vmem:[#allocation8 + $0x24] sm:$0xf]  ;;  %v2354_v4 = vld [vmem:[#allocation8 + $0x198] sm:$0xf0] }
  0xc4   :  { %1428 = vmatmul.bf16.vlgmr.msra.gmra.mxu0 %v3264_v18  ;;  %1441 = vmatmul.bf16.vlgmr.msra.gmra.mxu1 %v3266_v23 }
  0xc5   :  { %v574_v25 = vpop.f32.mrf.mxu3  ;;  %1524 = vmatpush.bf16.msra.mxu0 %v2213_v17  ;;  %v537_v34 = vpop.f32.mrf.mxu0  ;;  %1537 = vmatpush.bf16.msra.mxu1 %v2277_v20  ;;  %v2170_v17 = vld [vmem:[#allocation8 + $0x28] sm:$0xf0]  ;;  %v2381_v20 = vor.u32 %v2878_v12, %v2378_v13  ;;  %v2898_v12 = vld [vmem:[#allocation8 + $0x264] sm:$0xf] }
  0xc6   :  { %v561_v19 = vpop.f32.mrf.mxu2  ;;  %v575_v29 = vadd.f32 %v574_v25, %v193_v15  ;;  %v550_v37 = vpop.f32.mrf.mxu1  ;;  %v2245_v15 = vor.u32 %v2844_v8, %v2242_v9  ;;  %v2306_v25 = vld [vmem:[#allocation8 + $0x138] sm:$0xf0]  ;;  %v2173_v28 = vor.u32 %v2826_v16, %v2170_v17  ;;  %v2458_v13 = vld [vmem:[#allocation8 + $0x268] sm:$0xf0] }
  0xc7   :  { %v562_v24 = vadd.f32 %v561_v19, %v192_v11  ;;  %v2314_v11 = vld [vmem:[#allocation8 + $0x148] sm:$0xf0]  ;;  %v2226_v37 = vld [vmem:[#allocation8 + $0x98] sm:$0xf0] }
  0xc8   :  { %v633_v36 = vmax.f32 %v575_v29, 0.0  ;;  %v2317_v19 = vor.u32 %v2862_v10, %v2314_v11  ;;  %v2237_v29 = vor.u32 %v2842_v21, %v2234_v22  ;;  %v2293_v11 = vor.u32 %v2856_v61, %v2290_v62  ;;  %v2522_v17 = vld [vmem:[#allocation8 + $0x2e8] sm:$0xf0] }
  0xc9   :  { %v632_v33 = vmax.f32 %v562_v24, 0.0  ;;  %1525 = vmatpush.bf16.msra.mxu0 %v2205_v35  ;;  %1538 = vmatpush.bf16.msra.mxu1 %v2269_v38  ;;  %v2860_v24 = vld [vmem:[#allocation8 + $0x134] sm:$0xf]  ;;  %v2373_v35 = vor.u32 %v2876_v26, %v2370_v27  ;;  %v2858_v38 = vld [vmem:[#allocation8 + $0x124] sm:$0xf] }
  0xca   :  { %v3272_v46 = vpack.c.bf16 %v633_v36, %v633_v36  ;;  %v2309_v34 = vor.u32 %v2860_v24, %v2306_v25  ;;  %v2840_v36 = vld [vmem:[#allocation8 + $0x94] sm:$0xf]  ;;  %v2301_v55 = vor.u32 %v2858_v38, %v2298_v39  ;;  %v2870_v24 = vld [vmem:[#allocation8 + $0x184] sm:$0xf]  ;;  %v2346_v25 = vld [vmem:[#allocation8 + $0x188] sm:$0xf0] }
  0xcb   :  { %v3270_v41 = vpack.c.bf16 %v632_v33, %v632_v33  ;;  %v2162_v33 = vld [vmem:[#allocation8 + $0x18] sm:$0xf0]  ;;  %v2229_v49 = vor.u32 %v2840_v36, %v2226_v37  ;;  %v2932_v26 = vld [vmem:[#allocation8 + $0x374] sm:$0xf] }
  0xcc   :  { %1467 = vmatmul.bf16.vlgmr.msra.gmra.mxu3 %v3272_v46  ;;  %v2165_v43 = vor.u32 %v2824_v32, %v2162_v33  ;;  %v2658_v32 = vld [vmem:[#allocation8 + $0x3f8] sm:$0xf0]  ;;  %v2912_v39 = vld [vmem:[#allocation8 + $0x2d4] sm:$0xf] }
  0xcd   :  { %1454 = vmatmul.bf16.vlgmr.msra.gmra.mxu2 %v3270_v41  ;;  %v576_v56 = vpop.f32.mrf.mxu3  ;;  %1563 = vmatpush.bf16.msra.mxu3 %v2405_v42  ;;  %v2450_v36 = vld [vmem:[#allocation8 + $0x258] sm:$0xf0] }
  0xce   :  { %v563_v52 = vpop.f32.mrf.mxu2  ;;  %1550 = vmatpush.bf16.msra.mxu2 %v2341_v50  ;;  %1526 = vmatpush.bf16.msra.mxu0 %v2197_v51  ;;  %v2362_v50 = vld [vmem:[#allocation8 + $0x1a8] sm:$0xf0]  ;;  %v2838_v51 = vld [vmem:[#allocation8 + $0x84] sm:$0xf] }
  0xcf   :  { %1539 = vmatpush.bf16.msra.mxu1 %v2261_v53  ;;  %v2218_v52 = vld [vmem:[#allocation8 + $0x88] sm:$0xf0]  ;;  %v2900_v53 = vld [vmem:[#allocation8 + $0x274] sm:$0xf]  ;;  %v2365_v56 = vor.u32 %v2874_v40, %v2362_v50  ;;  %v2514_v40 = vld [vmem:[#allocation8 + $0x2d8] sm:$0xf0] }
  0xd1   :  { %1564 = vmatpush.bf16.msra.mxu3 %v2397_v58  ;;  %v2916_v58 = vld [vmem:[#allocation8 + $0x2f4] sm:$0xf] }
  0xd2   :  { %1551 = vmatpush.bf16.msra.mxu2 %v2333_v57  ;;  %1527 = vmatpush.bf16.msra.mxu0 %v2189_v1  ;;  %v2466_v57 = vld [vmem:[#allocation8 + $0x278] sm:$0xf0]  ;;  %v2157_v1 = vor.u32 %v2822_v44, %v2154_v45  ;;  %v2533_v10 = vor.u32 %v2916_v58, %v2530_v59  ;;  %v2506_v58 = vld [vmem:[#allocation8 + $0x2c8] sm:$0xf0] }
  0xd3   :  { %1540 = vmatpush.bf16.msra.mxu1 %v2253_v3  ;;  %v2872_v3 = vld [vmem:[#allocation8 + $0x194] sm:$0xf]  ;;  %v2469_v8 = vor.u32 %v2900_v53, %v2466_v57  ;;  %v2650_v53 = vld [vmem:[#allocation8 + $0x3e8] sm:$0xf0]  ;;  %v2910_v57 = vld [vmem:[#allocation8 + $0x2c4] sm:$0xf] }
  0xd4   :  { %v2357_v16 = vor.u32 %v2872_v3, %v2354_v4  ;;  %v2509_v3 = vor.u32 %v2910_v57, %v2506_v58  ;;  %v2642_v4 = vld [vmem:[#allocation8 + $0x3d8] sm:$0xf0] }
  0xd5   :  { %1565 = vmatpush.bf16.msra.mxu3 %v2389_v7  ;;  %v2221_v7 = vor.u32 %v2838_v51, %v2218_v52  ;;  %v2946_v51 = vld [vmem:[#allocation8 + $0x3e4] sm:$0xf]  ;;  %v2517_v52 = vor.u32 %v2912_v39, %v2514_v40 }
  0xd6   :  { %1552 = vmatpush.bf16.msra.mxu2 %v2325_v6  ;;  %1528 = vmatpush.bf16.msra.mxu0 %v2181_v14  ;;  %v197_v6 = vperm.slane %v3258_v2, 7  ;;  %v2914_v14 = vld [vmem:[#allocation8 + $0x2e4] sm:$0xf]  ;;  %v2653_v61 = vor.u32 %v2946_v51, %v2650_v53  ;;  %v2920_v53 = vld [vmem:[#allocation8 + $0x314] sm:$0xf] }
  0xd7   :  { %1541 = vmatpush.bf16.msra.mxu1 %v2245_v15  ;;  %v2938_v39 = vld [vmem:[#allocation8 + $0x3a4] sm:$0xf] }
  0xd9   :  { %1566 = vmatpush.bf16.msra.mxu3 %v2381_v20  ;;  %v2282_v20 = vld [vmem:[#allocation8 + $0x108] sm:$0xf0] }
  0xda   :  { %1553 = vmatpush.bf16.msra.mxu2 %v2317_v19  ;;  %1529 = vmatpush.bf16.msra.mxu0 %v2173_v28  ;;  %v2854_v19 = vld [vmem:[#allocation8 + $0x104] sm:$0xf] }
  0xdb   :  { %1542 = vmatpush.bf16.msra.mxu1 %v2237_v29  ;;  %v2461_v29 = vor.u32 %v2898_v12, %v2458_v13  ;;  %v2285_v38 = vor.u32 %v2854_v19, %v2282_v20  ;;  %v2634_v19 = vld [vmem:[#allocation8 + $0x3c8] sm:$0xf0]  ;;  %v2890_v20 = vld [vmem:[#allocation8 + $0x224] sm:$0xf] }
  0xdd   :  { %v587_v42 = vpop.f32.mrf.mxu0  ;;  %v600_v48 = vpop.f32.mrf.mxu1  ;;  %1567 = vmatpush.bf16.msra.mxu3 %v2373_v35  ;;  %v2896_v35 = vld [vmem:[#allocation8 + $0x254] sm:$0xf] }
  0xde   :  { %v588_v47 = vadd.f32 %v587_v42, %v194_v30  ;;  %v601_v54 = vadd.f32 %v600_v48, %v195_v31  ;;  %1554 = vmatpush.bf16.msra.mxu2 %v2309_v34  ;;  %1530 = vmatpush.bf16.msra.mxu0 %v2165_v43  ;;  %v2594_v30 = vld [vmem:[#allocation8 + $0x378] sm:$0xf0]  ;;  %v2948_v31 = vld [vmem:[#allocation8 + $0x3f4] sm:$0xf]  ;;  %v2525_v34 = vor.u32 %v2914_v14, %v2522_v17  ;;  %v2930_v48 = vld [vmem:[#allocation8 + $0x364] sm:$0xf] }
  0xdf   :  { %1543 = vmatpush.bf16.msra.mxu1 %v2229_v49  ;;  %v2349_v42 = vor.u32 %v2870_v24, %v2346_v25  ;;  %v2597_v43 = vor.u32 %v2932_v26, %v2594_v30  ;;  %v2661_v45 = vor.u32 %v2948_v31, %v2658_v32  ;;  %v2586_v49 = vld [vmem:[#allocation8 + $0x368] sm:$0xf0]  ;;  %v2926_v14 = vld [vmem:[#allocation8 + $0x344] sm:$0xf]  ;;  %v2626_v31 = vld [vmem:[#allocation8 + $0x3b8] sm:$0xf0] }
  0xe0   :  { %v634_v60 = vmax.f32 %v588_v47, 0.0  ;;  %v635_v63 = vmax.f32 %v601_v54, 0.0  ;;  %v2453_v47 = vor.u32 %v2896_v35, %v2450_v36  ;;  %v2894_v54 = vld [vmem:[#allocation8 + $0x244] sm:$0xf]  ;;  %v2888_v32 = vld [vmem:[#allocation8 + $0x214] sm:$0xf] }
  0xe1   :  { %1568 = vmatpush.bf16.msra.mxu3 %v2365_v56 }
  0xe2   :  { %v3279_v5 = vpack.c.bf16 %v634_v60, %v634_v60  ;;  %v3282_v9 = vpack.c.bf16 %v635_v63, %v635_v63  ;;  %1555 = vmatpush.bf16.msra.mxu2 %v2301_v55  ;;  %1531 = vmatpush.bf16.msra.mxu0 %v2157_v1  ;;  %v2442_v55 = vld [vmem:[#allocation8 + $0x248] sm:$0xf0]  ;;  %v2589_v60 = vor.u32 %v2930_v48, %v2586_v49  ;;  %v2928_v63 = vld [vmem:[#allocation8 + $0x354] sm:$0xf] }
  0xe3   :  { %1544 = vmatpush.bf16.msra.mxu1 %v2221_v7  ;;  %v2445_v62 = vor.u32 %v2894_v54, %v2442_v55  ;;  %v2944_v1 = vld [vmem:[#allocation8 + $0x3d4] sm:$0xf]  ;;  %v2434_v7 = vld [vmem:[#allocation8 + $0x238] sm:$0xf0]  ;;  %v2474_v48 = vld [vmem:[#allocation8 + $0x288] sm:$0xf0] }
  0xe4   :  { %1480 = vmatmul.bf16.vlgmr.msrb.gmra.mxu0 %v3279_v5  ;;  %1493 = vmatmul.bf16.vlgmr.msrb.gmra.mxu1 %v3282_v9  ;;  %v2645_v12 = vor.u32 %v2944_v1, %v2642_v4  ;;  %v2546_v54 = vld [vmem:[#allocation8 + $0x318] sm:$0xf0]  ;;  %v2956_v1 = vld [vmem:[#allocation10 + $0x30] sm:$0xff]  ;;  %v2954_v4 = vld [vmem:[#allocation10 + $0x20] sm:$0xff] }
  0xe5   :  { %v613_v15 = vpop.f32.mrf.mxu2  ;;  %v626_v2 = vpop.f32.mrf.mxu3  ;;  %1569 = vmatpush.bf16.msra.mxu3 %v2357_v16  ;;  %v2942_v16 = vld [vmem:[#allocation8 + $0x3c4] sm:$0xf]  ;;  %v2549_v57 = vor.u32 %v2920_v53, %v2546_v54 }
  0xe6   :  { %v614_v21 = vadd.f32 %v613_v15, %v196_v0  ;;  %v589_v22 = vpop.f32.mrf.mxu0  ;;  %v627_v27 = vadd.f32 %v626_v2, %v197_v6  ;;  %1576 = vmatpush.bf16.msrb.mxu0 %v2469_v8  ;;  %v602_v28 = vpop.f32.mrf.mxu1  ;;  %1556 = vmatpush.bf16.msra.mxu2 %v2293_v11  ;;  %v2578_v0 = vld [vmem:[#allocation8 + $0x358] sm:$0xf0]  ;;  %v2892_v6 = vld [vmem:[#allocation8 + $0x234] sm:$0xf]  ;;  %v2570_v15 = vld [vmem:[#allocation8 + $0x348] sm:$0xf0]  ;;  %v2637_v25 = vor.u32 %v2942_v16, %v2634_v19 }
  0xe7   :  { %1589 = vmatpush.bf16.msrb.mxu1 %v2533_v10  ;;  %v2908_v8 = vld [vmem:[#allocation8 + $0x2b4] sm:$0xf]  ;;  %v2498_v10 = vld [vmem:[#allocation8 + $0x2b8] sm:$0xf0]  ;;  %v2581_v11 = vor.u32 %v2928_v63, %v2578_v0  ;;  %v2437_v13 = vor.u32 %v2892_v6, %v2434_v7  ;;  %v2906_v2 = vld [vmem:[#allocation8 + $0x2a4] sm:$0xf]  ;;  %v2573_v24 = vor.u32 %v2926_v14, %v2570_v15 }
  0xe8   :  { %v636_v33 = vmax.f32 %v614_v21, 0.0  ;;  %v637_v37 = vmax.f32 %v627_v27, 0.0  ;;  %v2501_v17 = vor.u32 %v2908_v8, %v2498_v10  ;;  %v2426_v21 = vld [vmem:[#allocation8 + $0x228] sm:$0xf0]  ;;  %v2924_v27 = vld [vmem:[#allocation8 + $0x334] sm:$0xf] }
  0xe9   :  { %1570 = vmatpush.bf16.msra.mxu3 %v2349_v42  ;;  %v2490_v22 = vld [vmem:[#allocation8 + $0x2a8] sm:$0xf0]  ;;  %v2429_v26 = vor.u32 %v2890_v20, %v2426_v21  ;;  %v2562_v28 = vld [vmem:[#allocation8 + $0x338] sm:$0xf0]  ;;  %v2964_v19 = vld [vmem:[#allocation10 + $0x70] sm:$0xff] }
  0xea   :  { %v3286_v50 = vpack.c.bf16 %v636_v33, %v636_v33  ;;  %v3288_v44 = vpack.c.bf16 %v637_v37, %v637_v37  ;;  %1577 = vmatpush.bf16.msrb.mxu0 %v2461_v29  ;;  %1557 = vmatpush.bf16.msra.mxu2 %v2285_v38  ;;  %v2940_v29 = vld [vmem:[#allocation8 + $0x3b4] sm:$0xf]  ;;  %v2493_v30 = vor.u32 %v2906_v2, %v2490_v22  ;;  %v2418_v33 = vld [vmem:[#allocation8 + $0x218] sm:$0xf0]  ;;  %v2922_v37 = vld [vmem:[#allocation8 + $0x324] sm:$0xf] }
  0xeb   :  { %1590 = vmatpush.bf16.msrb.mxu1 %v2525_v34  ;;  %v2904_v34 = vld [vmem:[#allocation8 + $0x294] sm:$0xf]  ;;  %v2565_v35 = vor.u32 %v2924_v27, %v2562_v28  ;;  %v2421_v36 = vor.u32 %v2888_v32, %v2418_v33  ;;  %v2554_v38 = vld [vmem:[#allocation8 + $0x328] sm:$0xf0]  ;;  %v2957_v0 = vld [vmem:[#allocation10 + $0x38] sm:$0xff] }
  0xec   :  { %1506 = vmatmul.bf16.vlgmr.msrb.gmra.mxu2 %v3286_v50  ;;  %1519 = vmatmul.bf16.vlgmr.msrb.gmra.mxu3 %v3288_v44  ;;  %v2618_v42 = vld [vmem:[#allocation8 + $0x3a8] sm:$0xf0]  ;;  %v2557_v49 = vor.u32 %v2922_v37, %v2554_v38  ;;  %v2953_v7 = vld [vmem:[#allocation10 + $0x18] sm:$0xff]  ;;  %v2960_v32 = vld [vmem:[#allocation10 + $0x50] sm:$0xff] }
  0xed   :  { %v615_v56 = vpop.f32.mrf.mxu2  ;;  %v628_v59 = vpop.f32.mrf.mxu3  ;;  %1615 = vmatpush.bf16.msrb.mxu3 %v2661_v45  ;;  %v2410_v45 = vld [vmem:[#allocation8 + $0x208] sm:$0xf0]  ;;  %v2621_v51 = vor.u32 %v2938_v39, %v2618_v42  ;;  %v2965_v15 = vld [vmem:[#allocation10 + $0x78] sm:$0xff] }
  0xee   :  { %1602 = vmatpush.bf16.msrb.mxu2 %v2597_v43  ;;  %1578 = vmatpush.bf16.msrb.mxu0 %v2453_v47  ;;  %v2886_v43 = vld [vmem:[#allocation8 + $0x204] sm:$0xf]  ;;  %v2936_v56 = vld [vmem:[#allocation8 + $0x394] sm:$0xf]  ;;  %v2538_v59 = vld [vmem:[#allocation8 + $0x308] sm:$0xf0] }
  0xef   :  { %1591 = vmatpush.bf16.msrb.mxu1 %v2517_v52  ;;  %v2902_v47 = vld [vmem:[#allocation8 + $0x284] sm:$0xf]  ;;  %v2413_v52 = vor.u32 %v2886_v43, %v2410_v45  ;;  %v2963_v2 = vld [vmem:[#allocation10 + $0x68] sm:$0xff]  ;;  %v2961_v28 = vld [vmem:[#allocation10 + $0x58] sm:$0xff] }
  0xf0   :  { %v2477_v55 = vor.u32 %v2902_v47, %v2474_v48 }
  0xf1   :  { %1616 = vmatpush.bf16.msrb.mxu3 %v2653_v61  ;;  %v2602_v61 = vld [vmem:[#allocation8 + $0x388] sm:$0xf0] }
  0xf2   :  { %1603 = vmatpush.bf16.msrb.mxu2 %v2589_v60  ;;  %1579 = vmatpush.bf16.msrb.mxu0 %v2445_v62  ;;  %v2934_v60 = vld [vmem:[#allocation8 + $0x384] sm:$0xf] }
  0xf3   :  { %1592 = vmatpush.bf16.msrb.mxu1 %v2509_v3  ;;  %v2605_v63 = vor.u32 %v2934_v60, %v2602_v61  ;;  %v2955_v3 = vld [vmem:[#allocation10 + $0x28] sm:$0xff] }
  0xf4   :  { %1532 = vmatmul.bf16.vlgmr.msra.gmra.mxu0 %v3264_v18  ;;  %1545 = vmatmul.bf16.vlgmr.msra.gmra.mxu1 %v3266_v23  ;;  %v2482_v18 = vld [vmem:[#allocation8 + $0x298] sm:$0xf0]  ;;  %v2629_v23 = vor.u32 %v2940_v29, %v2626_v31 }
  0xf5   :  { %1617 = vmatpush.bf16.msrb.mxu3 %v2645_v12  ;;  %v2485_v40 = vor.u32 %v2904_v34, %v2482_v18 }
  0xf6   :  { %1604 = vmatpush.bf16.msrb.mxu2 %v2581_v11  ;;  %1580 = vmatpush.bf16.msrb.mxu0 %v2437_v13  ;;  %v2950_v13 = vld [vmem:[#allocation10] sm:$0xff] }
  0xf7   :  { %1593 = vmatpush.bf16.msrb.mxu1 %v2501_v17 }
  0xf9   :  { %1618 = vmatpush.bf16.msrb.mxu3 %v2637_v25 }
  0xfa   :  { %1605 = vmatpush.bf16.msrb.mxu2 %v2573_v24  ;;  %1581 = vmatpush.bf16.msrb.mxu0 %v2429_v26  ;;  %v2962_v26 = vld [vmem:[#allocation10 + $0x60] sm:$0xff] }
  0xfb   :  { %1594 = vmatpush.bf16.msrb.mxu1 %v2493_v30 }
  0xfc   :  { %1558 = vmatmul.bf16.vlgmr.msra.gmra.mxu2 %v3270_v41  ;;  %1571 = vmatmul.bf16.vlgmr.msra.gmra.mxu3 %v3272_v46  ;;  %v2610_v41 = vld [vmem:[#allocation8 + $0x398] sm:$0xf0]  ;;  %v2918_v46 = vld [vmem:[#allocation8 + $0x304] sm:$0xf] }
  0xfd   :  { %1619 = vmatpush.bf16.msrb.mxu3 %v2629_v23  ;;  %v2613_v58 = vor.u32 %v2936_v56, %v2610_v41  ;;  %v2541_v62 = vor.u32 %v2918_v46, %v2538_v59  ;;  %v2959_v23 = vld [vmem:[#allocation10 + $0x48] sm:$0xff] }
  0xfe   :  { %1606 = vmatpush.bf16.msrb.mxu2 %v2565_v35  ;;  %1582 = vmatpush.bf16.msrb.mxu0 %v2421_v36 }
  0xff   :  { %1595 = vmatpush.bf16.msrb.mxu1 %v2485_v40  ;;  %v2958_v40 = vld [vmem:[#allocation10 + $0x40] sm:$0xff] }
 0x101   :  { %1620 = vmatpush.bf16.msrb.mxu3 %v2621_v51 }
 0x102   :  { %1607 = vmatpush.bf16.msrb.mxu2 %v2557_v49  ;;  %1583 = vmatpush.bf16.msrb.mxu0 %v2413_v52 }
 0x103   :  { %1596 = vmatpush.bf16.msrb.mxu1 %v2477_v55 }
 0x105   :  { %1584 = vmatmul.bf16.vlgmr.msrb.gmra.mxu0 %v3279_v5  ;;  %1621 = vmatpush.bf16.msrb.mxu3 %v2613_v58 }
 0x106   :  { %1608 = vmatpush.bf16.msrb.mxu2 %v2549_v57  ;;  %1597 = vmatmul.bf16.vlgmr.msrb.gmra.mxu1 %v3282_v9  ;;  %v2952_v9 = vld [vmem:[#allocation10 + $0x10] sm:$0xff] }
 0x107   :  { %1764 = vmatpush.bf16.msra.mxu0 %v2957_v0  ;;  %1777 = vmatpush.bf16.msra.mxu1 %v2965_v15 }
 0x109   :  { %1622 = vmatpush.bf16.msrb.mxu3 %v2605_v63 }
 0x10a   :  { %1609 = vmatpush.bf16.msrb.mxu2 %v2541_v62 }
 0x10b   :  { %1765 = vmatpush.bf16.msra.mxu0 %v2956_v1  ;;  %1778 = vmatpush.bf16.msra.mxu1 %v2964_v19 }
 0x10c   :  { %1623 = vmatmul.bf16.vlgmr.msrb.gmra.mxu3 %v3288_v44  ;;  %v774_v44 = vld [vmem:[%s3316_s4] sm:$0x3] }
 0x10d   :  { %1610 = vmatmul.bf16.vlgmr.msrb.gmra.mxu2 %v3286_v50  ;;  %v2951_v50 = vld [vmem:[#allocation10 + $0x8] sm:$0xff]  ;;  %v776_v14 = vperm.slane %v774_v44, 0  ;;  %v777_v47 = vperm.slane %v774_v44, 1 }
 0x10f   :  { %1766 = vmatpush.bf16.msra.mxu0 %v2955_v3  ;;  %1779 = vmatpush.bf16.msra.mxu1 %v2963_v2 }
 0x113   :  { %1767 = vmatpush.bf16.msra.mxu0 %v2954_v4  ;;  %1780 = vmatpush.bf16.msra.mxu1 %v2962_v26 }
 0x117   :  { %1768 = vmatpush.bf16.msra.mxu0 %v2953_v7  ;;  %1781 = vmatpush.bf16.msra.mxu1 %v2961_v28 }
 0x11b   :  { %1769 = vmatpush.bf16.msra.mxu0 %v2952_v9  ;;  %1782 = vmatpush.bf16.msra.mxu1 %v2960_v32  ;;  %v2973_v9 = vld [vmem:[#allocation11 + $0x38] sm:$0xff] }
 0x11c   :  { %1860 = vmatpush.bf16.msra.mxu2 %v2973_v9 }
 0x11f   :  { %1770 = vmatpush.bf16.msra.mxu0 %v2951_v50  ;;  %1783 = vmatpush.bf16.msra.mxu1 %v2959_v23  ;;  %v2969_v50 = vld [vmem:[#allocation11 + $0x18] sm:$0xff] }
 0x123   :  { %1771 = vmatpush.bf16.msra.mxu0 %v2950_v13  ;;  %1784 = vmatpush.bf16.msra.mxu1 %v2958_v40  ;;  %v2967_v13 = vld [vmem:[#allocation11 + $0x8] sm:$0xff] }
 0x141   :  { %v1429_v6 = vpop.f32.mrf.mxu0  ;;  %v1442_v5 = vpop.f32.mrf.mxu1 }
 0x142   :  { %v1430_v20 = vadd.f32 %v1429_v6, %v776_v14  ;;  %v2966_v14 = vld [vmem:[#allocation11] sm:$0xff] }
 0x144   :  { %v1443_v21 = vadd.f32 %v1442_v5, %v1430_v20 }
 0x149   :  { %v1431_v8 = vpop.f32.mrf.mxu0  ;;  %v1444_v10 = vpop.f32.mrf.mxu1 }
 0x14a   :  { %v2972_v8 = vld [vmem:[#allocation11 + $0x30] sm:$0xff]  ;;  %v2971_v10 = vld [vmem:[#allocation11 + $0x28] sm:$0xff] }
 0x14b   :  { %1861 = vmatpush.bf16.msra.mxu2 %v2972_v8 }
 0x14f   :  { %v1468_v12 = vpop.f32.mrf.mxu3  ;;  %1862 = vmatpush.bf16.msra.mxu2 %v2971_v10 }
 0x150   :  { %v1455_v11 = vpop.f32.mrf.mxu2 }
 0x151   :  { %v1456_v25 = vadd.f32 %v1455_v11, %v1443_v21  ;;  %v2970_v11 = vld [vmem:[#allocation11 + $0x20] sm:$0xff] }
 0x153   :  { %v1469_v27 = vadd.f32 %v1468_v12, %v1456_v25  ;;  %1863 = vmatpush.bf16.msra.mxu2 %v2970_v11  ;;  %v2968_v12 = vld [vmem:[#allocation11 + $0x10] sm:$0xff] }
 0x157   :  { %v1470_v17 = vpop.f32.mrf.mxu3  ;;  %1864 = vmatpush.bf16.msra.mxu2 %v2969_v50 }
 0x158   :  { %v1457_v16 = vpop.f32.mrf.mxu2 }
 0x159   :  { %v2987_v16 = vld [vmem:[%s3318_s6] ss:$0 sm:$0xff] }
 0x15b   :  { %1865 = vmatpush.bf16.msra.mxu2 %v2968_v12 }
 0x15f   :  { %1866 = vmatpush.bf16.msra.mxu2 %v2967_v13 }
 0x161   :  { %v1481_v22 = vpop.f32.mrf.mxu0  ;;  %v1494_v24 = vpop.f32.mrf.mxu1 }
 0x162   :  { %v1482_v29 = vadd.f32 %v1481_v22, %v1469_v27 }
 0x163   :  { %1867 = vmatpush.bf16.msra.mxu2 %v2966_v14 }
 0x164   :  { %v1495_v33 = vadd.f32 %v1494_v24, %v1482_v29  ;;  %v2988_v24 = vld [vmem:[%s3320_s8] ss:$0 sm:$0xff] }
 0x169   :  { %v1483_v30 = vpop.f32.mrf.mxu0  ;;  %v1496_v31 = vpop.f32.mrf.mxu1 }
 0x16f   :  { %v1507_v34 = vpop.f32.mrf.mxu2  ;;  %v1520_v35 = vpop.f32.mrf.mxu3 }
 0x170   :  { %v1508_v18 = vadd.f32 %v1507_v34, %v1495_v33 }
 0x171   :  { %v1533_v37 = vpop.f32.mrf.mxu0  ;;  %v1546_v38 = vpop.f32.mrf.mxu1 }
 0x172   :  { %v1521_v36 = vadd.f32 %v1520_v35, %v1508_v18  ;;  %v1534_v51 = vadd.f32 %v1533_v37, %v777_v47 }
 0x174   :  { %v1628_v39 = vmax.f32 %v1521_v36, 0.0  ;;  %v1547_v54 = vadd.f32 %v1546_v38, %v1534_v51 }
 0x176   :  { %v1630_v42 = vpack.c.bf16 %v1628_v39, %v1628_v39 }
 0x177   :  { %v1509_v43 = vpop.f32.mrf.mxu2  ;;  %v1522_v45 = vpop.f32.mrf.mxu3 }
 0x178   :  { %1772 = vmatmul.bf16.vlgmr.msra.gmra.mxu0 %v1630_v42 }
 0x179   :  { %v1535_v48 = vpop.f32.mrf.mxu0  ;;  %v1548_v49 = vpop.f32.mrf.mxu1 }
 0x17f   :  { %v1559_v52 = vpop.f32.mrf.mxu2  ;;  %v1572_v53 = vpop.f32.mrf.mxu3 }
 0x180   :  { %v1560_v55 = vadd.f32 %v1559_v52, %v1547_v54 }
 0x182   :  { %v1585_v56 = vpop.f32.mrf.mxu0  ;;  %v1573_v57 = vadd.f32 %v1572_v53, %v1560_v55 }
 0x183   :  { %v1598_v41 = vpop.f32.mrf.mxu1 }
 0x184   :  { %v1586_v59 = vadd.f32 %v1585_v56, %v1573_v57 }
 0x186   :  { %v1599_v62 = vadd.f32 %v1598_v41, %v1586_v59 }
 0x187   :  { %v1561_v58 = vpop.f32.mrf.mxu2  ;;  %v1574_v46 = vpop.f32.mrf.mxu3 }
 0x18a   :  { %v1587_v60 = vpop.f32.mrf.mxu0 }
 0x18b   :  { %v1600_v61 = vpop.f32.mrf.mxu1 }
 0x18f   :  { %v1624_v1 = vpop.f32.mrf.mxu3 }
 0x190   :  { %v1611_v63 = vpop.f32.mrf.mxu2 }
 0x191   :  { %v1612_v0 = vadd.f32 %v1611_v63, %v1599_v62 }
 0x193   :  { %v1625_v3 = vadd.f32 %v1624_v1, %v1612_v0 }
 0x195   :  { %v1629_v4 = vmax.f32 %v1625_v3, 0.0 }
 0x197   :  { %v1631_v6 = vpack.c.bf16 %v1629_v4, %v1629_v4  ;;  %v1626_v7 = vpop.f32.mrf.mxu3 }
 0x198   :  { %v1613_v5 = vpop.f32.mrf.mxu2 }
 0x199   :  { %1785 = vmatmul.bf16.vlgmr.msra.gmra.mxu1 %v1631_v6 }
 0x1f5   :  { %v1773_v44 = vpop.f32.mrf.mxu0 }
 0x1f6   :  { %v1774_v17 = vadd.f32 %v2987_v16, %v1773_v44 }
 0x1fd   :  { %v1775_v15 = vpop.f32.mrf.mxu0 }
 0x216   :  { %v1786_v19 = vpop.f32.mrf.mxu1 }
 0x217   :  { %v1787_v20 = vadd.f32 %v1786_v19, %v1774_v17 }
 0x219   :  { %v1790_v21 = vmax.f32 %v1787_v20, 0.0 }
 0x21b   :  { %v1791_v2 = vpack.c.bf16 %v1790_v21, %v1790_v21 }
 0x21d   :  { %1868 = vmatmul.bf16.vlgmr.msra.gmra.mxu2 %v1791_v2 }
 0x21e   :  { %v1788_v22 = vpop.f32.mrf.mxu1 }
 0x2a0   :  { %v1869_v25 = vpop.f32.mrf.mxu2 }
 0x2a1   :  { %v1870_v26 = vadd.f32 %v2988_v24, %v1869_v25 }
 0x2a3   :  { %1873 = vst [vmem:[#allocation13] sm:$0xff] %v1870_v26 }
 0x2a4   :  { %1884 = dma.vmem_to_hbm [thread:$0]  %s1880_s23, 128, %s1882_s26, [#allocation4]  }
 0x2a8   :  { %v1871_v27 = vpop.f32.mrf.mxu2 }
 0x2a9   :  { %3165 = dma.done.wait [#allocation4], 128  }
 0x2aa   :  { %3166 = vsyncadd [#allocation4], 4294967168 }
 0x2ab   :  { %1889 = vsyncpa [#allocation3], 1 }
 0x2ac   :  { %1890 = vsyncpa [#allocation6], 1 }
 0x2ad   :  { %1891 = vsyncpa [#allocation9], 1 }
 0x2ae   :  { %1892 = vsyncpa [#allocation12], 1 }
 0x2af   :  { %1893 = vsyncpa [#allocation4], 1 }

</bundles_post_ra>
